<compile_context>
chip_gen: v7x
topology: tpu7x:2x2x1
jax: 0.10.0
libtpu: 0.0.40
codegen_flags: <defaults>
</compile_context>

<pallas_src>
import jax
import jax.numpy as jnp
from jax.experimental import pallas as pl
from jax.experimental.pallas import tpu as pltpu

HIDDEN = 768  # BERT hidden size expected by the classifier head.


def _round_up(x, m):
    return ((x + m - 1) // m) * m


def _fused_kernel(ids_ref, mask_ref, emb_ref, w_ref, bias_ref, out_ref, tok_ref):
    """One (batch block, vocab chunk) step of the fused forward."""
    tb, S = ids_ref.shape
    tv = emb_ref.shape[0]
    vi = pl.program_id(1)

    @pl.when(vi == 0)
    def _():
        tok_ref[...] = jnp.zeros_like(tok_ref)

    # Fold the Linear(768, 1) weight into this chunk of the embedding table:
    #   scores[v] = emb[v, :] @ w    (VPU multiply + lane reduction; an N=1
    #   MXU matmul would waste the array and adds no speed here).
    emb = emb_ref[...].astype(jnp.float32)                    # (tv, H)
    w_row = w_ref[...].astype(jnp.float32)                    # (1, H)
    scores = jnp.sum(emb * w_row, axis=-1, keepdims=True)     # (tv, 1)

    # In-kernel gather: one-hot select of each token's score from this chunk.
    # Layout-friendly ordering (tb, tv, S): ids/mask broadcast along sublanes,
    # scores broadcast along lanes, reduction over the sublane (tv) axis.
    ids = ids_ref[...]                                         # (tb, S) int32
    vid = vi * tv + jax.lax.broadcasted_iota(jnp.int32, (tb, tv, S), 1)
    hits = ids[:, None, :] == vid                              # (tb, tv, S)
    picked = jnp.where(hits, scores[None, :, :], 0.0)          # (tb, tv, S)
    tok_ref[...] += jnp.sum(picked, axis=1)                    # (tb, S)

    @pl.when(vi == pl.num_programs(1) - 1)
    def _():
        mask = mask_ref[...]                                   # (tb, S) f32, lane-dense
        num = jnp.sum(tok_ref[...] * mask, axis=-1, keepdims=True)   # (tb, 1)
        den = jnp.sum(mask, axis=-1, keepdims=True)                  # (tb, 1)
        pooled = num / jnp.maximum(den, 1e-9)
        out_ref[...] = jax.nn.sigmoid(pooled + bias_ref[0, 0]).astype(out_ref.dtype)


def sentiment_classifier_forward(input_ids, attention_mask, emb_table, w, b):
    """Forward: synthetic-BERT masked mean pooling + Linear(768,1) + Sigmoid."""
    # TODO(synk): the pretrained raceBERT transformer encoder + AutoTokenizer
    # are replaced by a synthetic embedding table with mask-weighted mean
    # pooling; there is no Pallas equivalent of a huggingface checkpoint.
    B, S = input_ids.shape
    V, H = emb_table.shape

    # Batch tile (sublane-aligned); batch axis is "parallel" for megacore.
    tb = 8
    B_pad = _round_up(B, tb)
    nb = B_pad // tb

    # Vocab tile: cdiv + zero padding, never a full-V fallback.  Budget keeps
    # the (tb, tv, S) one-hot slab and the double-buffered (tv, H) table
    # blocks comfortably inside the default scoped VMEM on v5e/v6e/v7x.
    slab_budget = 4 * 1024 * 1024
    tv = min(512, slab_budget // (tb * S * 4), _round_up(V, 8))
    tv = max(8, (tv // 8) * 8)
    V_pad = _round_up(V, tv)
    nv = V_pad // tv

    ids = input_ids.astype(jnp.int32)
    mask = attention_mask.astype(jnp.float32)
    if B_pad != B:
        ids = jnp.pad(ids, ((0, B_pad - B), (0, 0)))     # padded rows: all-zero mask
        mask = jnp.pad(mask, ((0, B_pad - B), (0, 0)))
    emb = emb_table
    if V_pad != V:
        emb = jnp.pad(emb, ((0, V_pad - V), (0, 0)))     # padded rows match no token id

    w_row = w.reshape(1, H).astype(jnp.float32)
    bias = jnp.reshape(b, (1, 1)).astype(jnp.float32)

    cost = pl.CostEstimate(
        flops=2 * nb * V_pad * H + 4 * B_pad * S * V_pad + 6 * B_pad * S + 8 * B_pad,
        transcendentals=B_pad,
        bytes_accessed=(nb * V_pad * H * emb.dtype.itemsize
                        + B_pad * S * (4 + 4) + H * 4 + B_pad * 4),
    )

    out = pl.pallas_call(
        _fused_kernel,
        out_shape=jax.ShapeDtypeStruct((B_pad, 1), jnp.float32),
        grid=(nb, nv),
        in_specs=[
            pl.BlockSpec((tb, S), lambda bi, vi: (bi, 0)),      # token ids (resident per batch block)
            pl.BlockSpec((tb, S), lambda bi, vi: (bi, 0)),      # attention mask (lane-dense)
            pl.BlockSpec((tv, H), lambda bi, vi: (vi, 0)),      # embedding-table chunk
            pl.BlockSpec((1, H), lambda bi, vi: (0, 0)),        # Linear(768,1) weight row
            pl.BlockSpec(memory_space=pltpu.MemorySpace.SMEM),  # classifier bias scalar
        ],
        out_specs=pl.BlockSpec((tb, 1), lambda bi, vi: (bi, 0)),
        scratch_shapes=[pltpu.VMEM((tb, S), jnp.float32)],      # per-token score accumulator
        compiler_params=pltpu.CompilerParams(
            dimension_semantics=("parallel", "arbitrary")),
        cost_estimate=cost,
    )(ids, mask, emb, w_row, bias)
    return out[:B]


if __name__ == "__main__":
    key = jax.random.PRNGKey(0)
    k_tab, k_w, k_b, k_ids, k_len = jax.random.split(key, 5)

    batch, seq, vocab = 8, 128, 2048

    # Deterministic synthetic parameters (module __init__ shapes).
    emb_table = jax.random.normal(k_tab, (vocab, HIDDEN), dtype=jnp.float32) * 0.02
    # nn.Linear(768, 1): torch weight (1, 768), bias (1,). Stored transposed.
    w = jax.random.normal(k_w, (HIDDEN, 1), dtype=jnp.float32) * 0.02
    b = jax.random.normal(k_b, (1,), dtype=jnp.float32) * 0.02

    # Example inputs: token ids + prefix attention masks of varying lengths.
    input_ids = jax.random.randint(k_ids, (batch, seq), 0, vocab, dtype=jnp.int32)
    lengths = jax.random.randint(k_len, (batch,), 1, seq + 1, dtype=jnp.int32)
    attention_mask = (jnp.arange(seq, dtype=jnp.int32)[None, :]
                      < lengths[:, None]).astype(jnp.float32)

    probs = sentiment_classifier_forward(input_ids, attention_mask, emb_table, w, b)
    probs = jax.block_until_ready(probs)

    # Pure-JAX reference of the original (unfolded) forward.
    emb_gather = emb_table[input_ids]                            # (B, S, H)
    m = attention_mask[..., None]
    pooled = jnp.sum(emb_gather * m, axis=1) / jnp.maximum(jnp.sum(m, axis=1), 1e-9)
    logits_ref = jnp.sum(pooled * w[:, 0][None, :], axis=-1, keepdims=True) + b[None, :]
    ref = jax.nn.sigmoid(logits_ref)

    assert probs.shape == (batch, 1), probs.shape
    assert jnp.allclose(probs, ref, atol=5e-5), (probs, ref)

    print("KERNEL_OK")
</pallas_src>

<mosaic_0001>
module attributes {stable_mosaic.version = 11 : i64} {
  func.func @_fused_kernel(%arg0: i32, %arg1: i32, %arg2: memref<8x128xi32, #tpu.memory_space<vmem>>, %arg3: memref<8x128xf32, #tpu.memory_space<vmem>>, %arg4: memref<512x768xf32, #tpu.memory_space<vmem>>, %arg5: memref<1x768xf32, #tpu.memory_space<vmem>>, %arg6: memref<1x1xf32, #tpu.memory_space<smem>>, %arg7: memref<8x1xf32, #tpu.memory_space<vmem>>, %arg8: memref<8x128xf32, #tpu.memory_space<vmem>>) attributes {dimension_semantics = [#tpu.dimension_semantics<parallel>, #tpu.dimension_semantics<arbitrary>], iteration_bounds = array<i64: 1, 4>, scalar_prefetch = 0 : i64, scratch_operands = 1 : i64, tpu.core_type = #tpu.core_type<tc>, window_params = [{transform_indices = @transform_0, window_bounds = array<i64: 8, 128>}, {transform_indices = @transform_1, window_bounds = array<i64: 8, 128>}, {transform_indices = @transform_2, window_bounds = array<i64: 512, 768>}, {pipeline_mode = #tpu.pipeline_mode<synchronous>, transform_indices = @transform_3, window_bounds = array<i64: 1, 768>}, {transform_indices = @transform_4, window_bounds = array<i64: 1, 1>}, {transform_indices = @transform_5, window_bounds = array<i64: 8, 1>}]} {
    %c0_i32 = arith.constant 0 : i32
    %0 = arith.cmpi eq, %arg1, %c0_i32 : i32
    %1 = arith.extui %0 : i1 to i32
    %c0_i32_0 = arith.constant 0 : i32
    %2 = arith.cmpi ne, %1, %c0_i32_0 : i32
    scf.if %2 {
      %cst_13 = arith.constant 0.000000e+00 : f32
      %29 = vector.broadcast %cst_13 : f32 to vector<8x128xf32>
      %c0_14 = arith.constant 0 : index
      %c0_15 = arith.constant 0 : index
      %30 = vector.load %arg8[%c0_14, %c0_15] : memref<8x128xf32, #tpu.memory_space<vmem>>, vector<8x128xf32>
      tpu.vector_store %arg8[%c0_14, %c0_15], %29 {strides = array<i32>} : memref<8x128xf32, #tpu.memory_space<vmem>>, vector<8x128xf32>,
    } else {
    }
    %c0 = arith.constant 0 : index
    %c0_1 = arith.constant 0 : index
    %3 = vector.load %arg4[%c0, %c0_1] : memref<512x768xf32, #tpu.memory_space<vmem>>, vector<512x768xf32>
    %c0_2 = arith.constant 0 : index
    %c0_3 = arith.constant 0 : index
    %4 = vector.load %arg5[%c0_2, %c0_3] : memref<1x768xf32, #tpu.memory_space<vmem>>, vector<1x768xf32>
    %5 = vector.broadcast %4 : vector<1x768xf32> to vector<512x768xf32>
    %6 = arith.mulf %3, %5 : vector<512x768xf32>
    %cst = arith.constant dense<0.000000e+00> : vector<512xf32>
    %7 = vector.multi_reduction <add>, %6, %cst [1] : vector<512x768xf32> to vector<512xf32>
    %8 = vector.shape_cast %7 : vector<512xf32> to vector<512x1xf32>
    %c0_4 = arith.constant 0 : index
    %c0_5 = arith.constant 0 : index
    %9 = vector.load %arg2[%c0_4, %c0_5] : memref<8x128xi32, #tpu.memory_space<vmem>>, vector<8x128xi32>
    %c512_i32 = arith.constant 512 : i32
    %10 = arith.muli %arg1, %c512_i32 : i32
    %11 = tpu.iota {dimensions = array<i32: 1>} : vector<8x512x128xi32>
    %12 = vector.broadcast %10 : i32 to vector<8x512x128xi32>
    %13 = arith.addi %12, %11 : vector<8x512x128xi32>
    %14 = vector.shape_cast %9 : vector<8x128xi32> to vector<8x1x128xi32>
    %15 = vector.broadcast %14 : vector<8x1x128xi32> to vector<8x512x128xi32>
    %16 = arith.cmpi eq, %15, %13 : vector<8x512x128xi32>
    %17 = vector.shape_cast %8 : vector<512x1xf32> to vector<1x512x1xf32>
    %cst_6 = arith.constant 0.000000e+00 : f32
    %18 = vector.shape_cast %17 : vector<1x512x1xf32> to vector<1x512x1xf32>
    %19 = vector.broadcast %18 : vector<1x512x1xf32> to vector<8x512x128xf32>
    %20 = vector.broadcast %cst_6 : f32 to vector<8x512x128xf32>
    %21 = arith.select %16, %19, %20 : vector<8x512x128xi1>, vector<8x512x128xf32>
    %c0_7 = arith.constant 0 : index
    %c0_8 = arith.constant 0 : index
    %22 = vector.load %arg8[%c0_7, %c0_8] : memref<8x128xf32, #tpu.memory_space<vmem>>, vector<8x128xf32>
    %cst_9 = arith.constant dense<0.000000e+00> : vector<8x128xf32>
    %23 = vector.multi_reduction <add>, %21, %cst_9 [1] : vector<8x512x128xf32> to vector<8x128xf32>
    %24 = arith.addf %22, %23 : vector<8x128xf32>
    %c0_10 = arith.constant 0 : index
    %c0_11 = arith.constant 0 : index
    %25 = vector.load %arg8[%c0_10, %c0_11] : memref<8x128xf32, #tpu.memory_space<vmem>>, vector<8x128xf32>
    tpu.vector_store %arg8[%c0_10, %c0_11], %24 {strides = array<i32>} : memref<8x128xf32, #tpu.memory_space<vmem>>, vector<8x128xf32>,
    %c3_i32 = arith.constant 3 : i32
    %26 = arith.cmpi eq, %arg1, %c3_i32 : i32
    %27 = arith.extui %26 : i1 to i32
    %c0_i32_12 = arith.constant 0 : i32
    %28 = arith.cmpi ne, %27, %c0_i32_12 : i32
    scf.if %28 {
      %c0_13 = arith.constant 0 : index
      %c0_14 = arith.constant 0 : index
      %29 = vector.load %arg3[%c0_13, %c0_14] : memref<8x128xf32, #tpu.memory_space<vmem>>, vector<8x128xf32>
      %c0_15 = arith.constant 0 : index
      %c0_16 = arith.constant 0 : index
      %30 = vector.load %arg8[%c0_15, %c0_16] : memref<8x128xf32, #tpu.memory_space<vmem>>, vector<8x128xf32>
      %31 = arith.mulf %30, %29 : vector<8x128xf32>
      %cst_17 = arith.constant dense<0.000000e+00> : vector<8xf32>
      %32 = vector.multi_reduction <add>, %31, %cst_17 [1] : vector<8x128xf32> to vector<8xf32>
      %33 = vector.shape_cast %32 : vector<8xf32> to vector<8x1xf32>
      %cst_18 = arith.constant dense<0.000000e+00> : vector<8xf32>
      %34 = vector.multi_reduction <add>, %29, %cst_18 [1] : vector<8x128xf32> to vector<8xf32>
      %35 = vector.shape_cast %34 : vector<8xf32> to vector<8x1xf32>
      %cst_19 = arith.constant 9.99999971E-10 : f32
      %36 = vector.broadcast %cst_19 : f32 to vector<8x1xf32>
      %37 = arith.maximumf %35, %36 : vector<8x1xf32>
      %38 = arith.divf %33, %37 : vector<8x1xf32>
      %c0_20 = arith.constant 0 : index
      %c0_21 = arith.constant 0 : index
      %39 = memref.load %arg6[%c0_20, %c0_21] : memref<1x1xf32, #tpu.memory_space<smem>>
      %40 = vector.broadcast %39 : f32 to vector<8x1xf32>
      %41 = arith.addf %38, %40 : vector<8x1xf32>
      %42 = arith.negf %41 : vector<8x1xf32>
      %43 = math.exp %42 : vector<8x1xf32>
      %cst_22 = arith.constant 1.000000e+00 : f32
      %44 = vector.broadcast %cst_22 : f32 to vector<8x1xf32>
      %45 = arith.addf %44, %43 : vector<8x1xf32>
      %46 = arith.divf %44, %45 : vector<8x1xf32>
      %c0_23 = arith.constant 0 : index
      %c0_24 = arith.constant 0 : index
      %47 = vector.load %arg7[%c0_23, %c0_24] : memref<8x1xf32, #tpu.memory_space<vmem>>, vector<8x1xf32>
      tpu.vector_store %arg7[%c0_23, %c0_24], %46 {strides = array<i32>} : memref<8x1xf32, #tpu.memory_space<vmem>>, vector<8x1xf32>,
    } else {
    }
    return
  }
  func.func @transform_0(%arg0: i32, %arg1: i32) -> (i32, i32) {
    %c0_i32 = arith.constant 0 : i32
    %c0_i32_0 = arith.constant 0 : i32
    return %arg0, %c0_i32 : i32, i32
  }
  func.func @transform_1(%arg0: i32, %arg1: i32) -> (i32, i32) {
    %c0_i32 = arith.constant 0 : i32
    %c0_i32_0 = arith.constant 0 : i32
    return %arg0, %c0_i32 : i32, i32
  }
  func.func @transform_2(%arg0: i32, %arg1: i32) -> (i32, i32) {
    %c0_i32 = arith.constant 0 : i32
    %c0_i32_0 = arith.constant 0 : i32
    return %arg1, %c0_i32 : i32, i32
  }
  func.func @transform_3(%arg0: i32, %arg1: i32) -> (i32, i32) {
    %c0_i32 = arith.constant 0 : i32
    %c0_i32_0 = arith.constant 0 : i32
    %c0_i32_1 = arith.constant 0 : i32
    return %c0_i32, %c0_i32_0 : i32, i32
  }
  func.func @transform_4(%arg0: i32, %arg1: i32) -> (i32, i32) {
    %c0_i32 = arith.constant 0 : i32
    %c0_i32_0 = arith.constant 0 : i32
    %c0_i32_1 = arith.constant 0 : i32
    return %c0_i32, %c0_i32_0 : i32, i32
  }
  func.func @transform_5(%arg0: i32, %arg1: i32) -> (i32, i32) {
    %c0_i32 = arith.constant 0 : i32
    %c0_i32_0 = arith.constant 0 : i32
    return %arg0, %c0_i32 : i32, i32
  }
}

</mosaic_0001>

<bundles_post_ra>
// kernel: tpu_custom_call.1
= control target key start
LH: loop header
LB: loop body
LE: loop exit
PB: predicated region body
PF: predicated region fallthrough
CT: control target
= control target key end

     0   :  { %s6024_s0 = inlined_call_operand.hbm [shape: s32[8,128], index: 0, kind: input, shape index: {}]   ;;  %s6025_s1 = inlined_call_operand.hbm [shape: f32[8,128], index: 1, kind: input, shape index: {}]   ;;  %s6026_s2 = inlined_call_operand.hbm [shape: f32[2048,768], index: 2, kind: input, shape index: {}]   ;;  %s6027_s3 = inlined_call_operand.hbm [shape: f32[1,768], index: 3, kind: input, shape index: {}]   ;;  %s6028_s4 = inlined_call_operand.<no memory space> [shape: f32[1,1], index: 4, kind: input, shape index: {}]   ;;  %s6029_s5 = inlined_call_operand.vmem [shape: f32[8,1], index: 5, kind: output, shape index: {}]  }
   0x1   :  { %10 = sst [smem:[#allocation3]] %s6028_s4 }
   0x2   :  { %11 = vsyncpa [#allocation5], 0 }
   0x3   :  { %12 = vsyncpa [#allocation7], 0  ;;  %s3841_s20 = smov 0   ;;  %s3843_s21 = smov 0  }
   0x4   :  { %s3845_s22 = smov 0   ;;  %s3847_s23 = smov 0  }
   0x5   :  { %s3849_s24 = smov 0   ;;  %s3851_s25 = smov 0  }
   0x6 LB: > { %s3502_s4 = sadd.s32 4294967295, %s3798_s25   ;;  %s89_s26 = sadd.s32 1, %s3786_s22  ;;  %s3798_s25 = sphi %s3851_s25, %s18_s25   ;;  %s3794_s24 = sphi %s3849_s24, %s6053_s24   ;;  %s3790_s23 = sphi %s3847_s23, %s6052_s23   ;;  %s3786_s22 = sphi %s3845_s22, %s6051_s22   ;;  %s3782_s21 = sphi %s3843_s21, %s6050_s21   ;;  %s3778_s20 = sphi %s3841_s20, %s6049_s20  }
   0x7   : > { %p96_p0 = scmp.ne.s32.totalorder %s3786_s22, %s3782_s21  ;;  %p97_p1 = scmp.eq.s32.totalorder %s3798_s25, 0 }
   0x8   : > { %p102_p2 = scmp.ne.s32.totalorder %s3782_s21, %s3778_s20  ;;  %p3877_p3 = scmp.eq.s32.totalorder %s3502_s4, 0 }
   0x9   : > { %p98_p4 = por %p97_p1, %p96_p0  ;;  %p3503_p5 = scmp.ge.s32.totalorder %s3798_s25, 1 }
   0xa   : > { %s6037_s27 = scalar_select %p3877_p3, 1, 0 }
   0xb   : > { %p3884_p6 = por %p3877_p3, %p102_p2  ;;  %p181_p7 = scmp.lt.s32.totalorder %s3798_s25, 5 }
   0xc   : > { %s3800_s30 = smov [#allocation4]   ;;  %p3556_p10 = scmp.lt.s32.totalorder %s3798_s25, 4 }
   0xd   : > { %s6038_s28 = scalar_select %p3884_p6, 1, 0 }
   0xe   : > { %p3889_p8 = pnand %p3503_p5, %p181_p7  ;;  %s196_s6 = sshll.u32 %s3800_s30, 4  ;;  %s197_s6 = int_to_ptr.vmem [resolvable:$true] %s196_s6 }
   0xf   : > { %p3902_p12 = pnand %p3556_p10, %p98_p4  ;;  %s3801_s9 = smov [#allocation6]  }
  0x10   : > { %s6039_s29 = scalar_select %p3889_p8, 1, 0 }
  0x11   : > { %p3539_p9 = pneg %p3889_p8  ;;  %s209_s10 = sshll.u32 %s3801_s9, 4  ;;  %s210_s10 = int_to_ptr.vmem [resolvable:$true] %s209_s10 }
  0x12   : > { %s6041_s8 = scalar_select %p3902_p12, 1, 0 }
  0x13   : > { %p3898_p11 = pnand %p3539_p9, %p3877_p3  ;;  %s3802_s11 = smov [#allocation9]  }
  0x14   : > { %s220_s12 = sshll.u32 %s3802_s11, 4  ;;  %s3622_s15 = scalar_lea.hbm %s6024_s0, 128  ;;  %s3930_s12 = int_to_ptr.vmem [resolvable:$true] %s220_s12 }
  0x15   : > { %p3623_p13 = scmp.ne.s32.totalorder %s6024_s0, %s3622_s15  ;;  %p3914_p0 = pneg %p3898_p11 }
  0x16   : > { %p3629_p4 = scmp.lt.u32.totalorder %s3622_s15, %s6024_s0 }
  0x17   : > { %p3625_p1 = pnand %p3914_p0, %p3623_p13 }
  0x19   : > { %p3626_p2 = pneg %p3625_p1 }
  0x1b   : > { %p3631_p5 = pnand %p3629_p4, %p3626_p2 }
  0x1d   : > { %3634 = shalt.err (!%p3631_p5)
}
  0x1e   : > { %s3635_s30 = scalar_lea.vmem %s197_s6, 128  ;;  %p3643_p6 = scmp.lt.s32.totalorder %s197_s6, %s197_s6 }
  0x1f   : > { %p3636_p7 = scmp.ne.s32.totalorder %s197_s6, %s3635_s30  ;;  %p3644_p3 = scmp.lt.s32.totalorder %s3635_s30, %s3635_s30 }
  0x21   : > { %p3638_p9 = pnand %p3636_p7, %p3914_p0  ;;  %p3645_p8 = por %p3644_p3, %p3643_p6 }
  0x23   : > { %p3639_p10 = pneg %p3638_p9 }
  0x25   : > { %p3646_p12 = pnand %p3645_p8, %p3639_p10 }
  0x27   : > { %3649 = shalt.err (!%p3646_p12)
}
  0x28   : > { %3542 = dma.hbm_to_vmem [thread:$0]  (!%p3898_p11), %s6024_s0, 128, %s197_s6, [#allocation5]  }
  0x29   : > { %s3650_s15 = scalar_lea.hbm %s6025_s1, 128 }
  0x2a   : > { %p3651_p3 = scmp.ne.s32.totalorder %s6025_s1, %s3650_s15  ;;  %p3657_p12 = scmp.lt.u32.totalorder %s3650_s15, %s6025_s1 }
  0x2c   : > { %p3653_p6 = pnand %p3651_p3, %p3914_p0 }
  0x2e   : > { %p3654_p8 = pneg %p3653_p6 }
  0x30   : > { %p3659_p13 = pnand %p3657_p12, %p3654_p8 }
  0x32   : > { %3662 = shalt.err (!%p3659_p13)
}
  0x33   : > { %s3663_s6 = scalar_lea.vmem %s210_s10, 128  ;;  %p3671_p5 = scmp.lt.s32.totalorder %s210_s10, %s210_s10 }
  0x34   : > { %p3664_p1 = scmp.ne.s32.totalorder %s210_s10, %s3663_s6  ;;  %p3672_p7 = scmp.lt.s32.totalorder %s3663_s6, %s3663_s6 }
  0x36   : > { %p3666_p2 = pnand %p3664_p1, %p3914_p0  ;;  %p3673_p9 = por %p3672_p7, %p3671_p5 }
  0x38   : > { %p3667_p4 = pneg %p3666_p2 }
  0x3a   : > { %p3674_p10 = pnand %p3673_p9, %p3667_p4 }
  0x3c   : > { %3677 = shalt.err (!%p3674_p10)
}
  0x3d   : > { %3545 = dma.hbm_to_vmem [thread:$0]  (!%p3898_p11), %s6025_s1, 128, %s210_s10, [#allocation7]  }
  0x3e   : > { %s3678_s14 = scalar_lea.hbm %s6027_s3, 96 }
  0x3f   : > { %p3679_p3 = scmp.ne.s32.totalorder %s6027_s3, %s3678_s14  ;;  %p3685_p12 = scmp.lt.u32.totalorder %s3678_s14, %s6027_s3 }
  0x41   : > { %p3681_p6 = pnand %p3679_p3, %p3914_p0 }
  0x43   : > { %p3682_p8 = pneg %p3681_p6 }
  0x45   : > { %p3687_p13 = pnand %p3685_p12, %p3682_p8 }
  0x47   : > { %3690 = shalt.err (!%p3687_p13)
}
  0x48   : > { %s3691_s10 = scalar_lea.vmem %s3930_s12, 96  ;;  %p3699_p5 = scmp.lt.s32.totalorder %s3930_s12, %s3930_s12 }
  0x49   : > { %p3692_p1 = scmp.ne.s32.totalorder %s3930_s12, %s3691_s10  ;;  %p3700_p7 = scmp.lt.s32.totalorder %s3691_s10, %s3691_s10 }
  0x4b   : > { %p3694_p2 = pnand %p3692_p1, %p3914_p0  ;;  %p3701_p9 = por %p3700_p7, %p3699_p5 }
  0x4d   : > { %p3695_p4 = pneg %p3694_p2 }
  0x4f   : > { %p3702_p10 = pnand %p3701_p9, %p3695_p4 }
  0x51   : > { %3705 = shalt.err (!%p3702_p10)
}
  0x52   : > { %3548 = dma.hbm_to_vmem [thread:$0]  (!%p3898_p11), %s6027_s3, 96, %s3930_s12, [#allocation7]  }
  0x53   : > { %s234_s18 = sand.u32 1, %s3798_s25   ;;  %s27_s30 = sadd.s32 1, %s3794_s24 }
  0x54   : > { %s236_s9 = sand.u32 1, %s3786_s22   ;;  %p28_p0 = scmp.ge.s32.totalorder %s27_s30, 4 }
  0x55   : > { %s3522_s11 = smul.u32 3072, %s236_s9  ;;  %s3993_s10 = scalar_lea.sflag [#allocation5], %s234_s18 }
  0x56   : > { %s3523_s7 = smul.u32 49152, %s3794_s24  ;;  %s6055_s30 = smov (%p28_p0, %s27_s30), 0 }
  0x57   : > { %s86_s12 = ssub.s32 %s3794_s24, %s6055_s30  ;;  %s238_s16 = scalar_lea.vmem [#allocation8], %s3522_s11 }
  0x58   : > { %s3982_s15 = scalar_lea.hbm %s6026_s2, %s3523_s7  ;;  %s246_s17 = sshll.u32 %s238_s16, 4  ;;  %s3986_s17 = int_to_ptr.vmem [resolvable:$true] %s246_s17 }
  0x59   : > { %p87_p11 = scmp.eq.s32.totalorder %s86_s12, 0  ;;  %s3706_s20 = scalar_lea.hbm %s3982_s15, 49152 }
  0x5a   : > { %p3707_p3 = scmp.ne.s32.totalorder %s3982_s15, %s3706_s20  ;;  %p6043_p6 = scmp.ne.s32.totalorder %s6041_s8, 0 }
  0x5b   : > { %s3991_s19 = scalar_select %p87_p11, %s3786_s22, %s89_s26  }
  0x5c   : > { %p3708_p8 = pneg %p6043_p6  ;;  %s3711_s11 = scalar_lea.hbm %s6026_s2, 196608 }
  0x5d   : > { %p3712_p1 = scmp.lt.u32.totalorder %s3982_s15, %s6026_s2  ;;  %p3713_p2 = scmp.lt.u32.totalorder %s3711_s11, %s3706_s20 }
  0x5e   : > { %p3709_p12 = pnand %p3708_p8, %p3707_p3  ;;  %p3715_p5 = scmp.lt.u32.totalorder %s3706_s20, %s3982_s15 }
  0x5f   : > { %p3714_p4 = por %p3713_p2, %p3712_p1 }
  0x60   : > { %p3710_p13 = pneg %p3709_p12 }
  0x61   : > { %p3716_p7 = por %p3715_p5, %p3714_p4 }
  0x63   : > { %p3717_p9 = pnand %p3716_p7, %p3710_p13 }
  0x65   : > { %3720 = shalt.err (!%p3717_p9)
}
  0x66   : > { %s3721_s26 = scalar_lea.vmem %s3986_s17, 49152  ;;  %s3803_s18 = smov [#allocation8]  }
  0x67   : > { %p3722_p10 = scmp.ne.s32.totalorder %s3986_s17, %s3721_s26  ;;  %s3726_s14 = sshll.u32 %s3803_s18, 4  ;;  %s3727_s14 = int_to_ptr.vmem [resolvable:$false] %s3726_s14 }
  0x68   : > { %s3728_s12 = scalar_lea.vmem %s3727_s14, 98304  ;;  %p3729_p3 = scmp.lt.s32.totalorder %s3986_s17, %s3727_s14 }
  0x69   : > { %p3724_p0 = pnand %p3722_p10, %p3708_p8  ;;  %p3730_p12 = scmp.lt.s32.totalorder %s3728_s12, %s3721_s26 }
  0x6b   : > { %p3725_p11 = pneg %p3724_p0  ;;  %p3731_p1 = por %p3730_p12, %p3729_p3 }
  0x6d   : > { %p3732_p2 = pnand %p3731_p1, %p3725_p11 }
  0x6f   : > { %3735 = shalt.err (!%p3732_p2)
}
  0x70   : > { %s3804_s16 = smov 768   ;;  %s3805_s20 = smov 48  }
  0x71   : > { %3552 = dma.hbm_to_vmem [thread:$0]  (!%p6043_p6), %s3982_s15, 49152, %s3986_s17, %s3993_s10, %s3804_s16, %s3804_s16, %s3805_s20  }
  0x72   : > { %p6044_p8 = scmp.ne.s32.totalorder %s6039_s29, 0 }
  0x74   : > { %258 = sbr.rel (%p6044_p8) target bundleno = 953 (0x3b9), region = 40 }
  0x7b   : > { %p6045_p13 = scmp.ne.s32.totalorder %s6037_s27, 0 }
  0x7d   : > { %3761 = dma.done.wait (%p6045_p13), [#allocation5], 128  }
  0x7e   : > { %3763 = vsyncadd (%p6045_p13), [#allocation5], 4294967168 }
  0x7f   : > { %3765 = dma.done.wait (%p6045_p13), [#allocation7], 128  }
  0x80   : > { %3767 = vsyncadd (%p6045_p13), [#allocation7], 4294967168  ;;  %s268_s8 = sand.u32 1, %s3502_s4   ;;  %s270_s15 = sand.u32 1, %s3782_s21  }
  0x81   : > { %s3524_s29 = smul.u32 3072, %s270_s15  ;;  %s269_s17 = scalar_lea.sflag [#allocation5], %s268_s8 }
  0x82   : > { %p6046_p6 = scmp.ne.s32.totalorder %s6038_s28, 0 }
  0x83   : > { %s4034_s10 = scalar_lea.vmem [#allocation8], %s3524_s29 }
  0x84   : > { %3769 = dma.done.wait (%p6046_p6), %s269_s17, 49152  }
  0x85   : > { %3771 = vsyncadd (%p6046_p6), %s269_s17, 4294918144 }
  0x86   : > { %3773 = dma.done.wait (%p6045_p13), [#allocation7], 96  }
  0x87   : > { %3775 = vsyncadd (%p6045_p13), [#allocation7], 4294967200  ;;  %p3515_p4 = scmp.ne.s32.totalorder %s3790_s23, 0 }
  0x88   : > { %v3806_v0 = vmov (!%p3515_p4), 0.0  }
  0x89   : > { %310 = sbr.rel (%p3515_p4) target bundleno = 144 (0x90), region = 60  ;;  %311 = vst [vmem:[#allocation2] sm:$0xff] (!%p3515_p4), %v3806_v0 }
  0x90 PF: > { %v698_v1 = vlaneseq  ;;  %v696_v3 = vld [vmem:[#allocation9] sm:$0x3f]  ;;  %v313_v5 = vld [vmem:[%s4034_s10 + $0x8] sm:$0xff]  ;;  %v314_v10 = vld [vmem:[%s4034_s10 + $0x10] sm:$0xff]  ;;  %s3516_s4 = sshll.u32 %s3790_s23, 9  ;;  %p3517_p5 = scmp.ne.s32.totalorder %s3790_s23, 3 }
  0x91   : > { %v312_v4 = vld [vmem:[%s4034_s10] sm:$0xff]  ;;  %v315_v11 = vld [vmem:[%s4034_s10 + $0x18] sm:$0xff]  ;;  %v317_v15 = vld [vmem:[%s4034_s10 + $0x28] sm:$0xff]  ;;  %s3389_s27 = sld [smem:[#allocation3]] (!%p3517_p5) }
  0x92   : > { %v4045_v2 = vshrl.u32 %v698_v1, 7  ;;  %v316_v12 = vld [vmem:[%s4034_s10 + $0x20] sm:$0xff]  ;;  %v325_v21 = vld [vmem:[%s4034_s10 + $0x68] sm:$0xff]  ;;  %v326_v24 = vld [vmem:[%s4034_s10 + $0x70] sm:$0xff] }
  0x93   : > { %v324_v20 = vld [vmem:[%s4034_s10 + $0x60] sm:$0xff]  ;;  %v327_v25 = vld [vmem:[%s4034_s10 + $0x78] sm:$0xff]  ;;  %v329_v31 = vld [vmem:[%s4034_s10 + $0x88] sm:$0xff] }
  0x94   : > { %6047 = vst [vmem:[#allocation14_spill] sm:$0xff] %v4045_v2  ;;  %v4050_v6 = vsub.s32 0, %v4045_v2  ;;  %v704_v7 = vsub.s32 1, %v4045_v2  ;;  %v708_v8 = vsub.s32 2, %v4045_v2  ;;  %v712_v9 = vsub.s32 3, %v4045_v2  ;;  %v328_v26 = vld [vmem:[%s4034_s10 + $0x80] sm:$0xff] }
  0x95   : > { %v716_v13 = vsub.s32 4, %v4045_v2  ;;  %v720_v14 = vsub.s32 5, %v4045_v2  ;;  %v318_v32 = vld [vmem:[%s4034_s10 + $0x30] sm:$0xff]  ;;  %v319_v33 = vld [vmem:[%s4034_s10 + $0x38] sm:$0xff]  ;;  %v320_v38 = vld [vmem:[%s4034_s10 + $0x40] sm:$0xff] }
  0x96   : > { %v4062_v16 = vrot.slane %v696_v3, %v4050_v6  ;;  %v4064_v17 = vrot.slane %v696_v3, %v704_v7  ;;  %v4066_v18 = vrot.slane %v696_v3, %v708_v8  ;;  %v4068_v19 = vrot.slane %v696_v3, %v712_v9  ;;  %v321_v39 = vld [vmem:[%s4034_s10 + $0x48] sm:$0xff]  ;;  %v322_v40 = vld [vmem:[%s4034_s10 + $0x50] sm:$0xff]  ;;  %v323_v45 = vld [vmem:[%s4034_s10 + $0x58] sm:$0xff] }
  0x97   : > { %v4072_v22 = vrot.slane %v696_v3, %v716_v13  ;;  %v4074_v23 = vrot.slane %v696_v3, %v720_v14  ;;  %v330_v46 = vld [vmem:[%s4034_s10 + $0x90] sm:$0xff]  ;;  %v331_v51 = vld [vmem:[%s4034_s10 + $0x98] sm:$0xff]  ;;  %v332_v52 = vld [vmem:[%s4034_s10 + $0xa0] sm:$0xff] }
  0x98   : > { %v728_v27 = vmul.f32 %v4062_v16, %v312_v4  ;;  %v729_v28 = vmul.f32 %v4064_v17, %v313_v5  ;;  %v730_v29 = vmul.f32 %v4066_v18, %v314_v10  ;;  %v731_v30 = vmul.f32 %v4068_v19, %v315_v11  ;;  %v333_v53 = vld [vmem:[%s4034_s10 + $0xa8] sm:$0xff]  ;;  %v334_v58 = vld [vmem:[%s4034_s10 + $0xb0] sm:$0xff]  ;;  %v335_v59 = vld [vmem:[%s4034_s10 + $0xb8] sm:$0xff] }
  0x99   : > { %v732_v34 = vmul.f32 %v4072_v22, %v316_v12  ;;  %v733_v35 = vmul.f32 %v4074_v23, %v317_v15  ;;  %v740_v36 = vmul.f32 %v4062_v16, %v324_v20  ;;  %v741_v37 = vmul.f32 %v4064_v17, %v325_v21  ;;  %v336_v0 = vld [vmem:[%s4034_s10 + $0xc0] sm:$0xff]  ;;  %v337_v1 = vld [vmem:[%s4034_s10 + $0xc8] sm:$0xff]  ;;  %v338_v8 = vld [vmem:[%s4034_s10 + $0xd0] sm:$0xff] }
  0x9a   : > { %v1112_v41 = vadd.f32 %v729_v28, %v728_v27  ;;  %v742_v42 = vmul.f32 %v4066_v18, %v326_v24  ;;  %v743_v43 = vmul.f32 %v4068_v19, %v327_v25  ;;  %v744_v44 = vmul.f32 %v4072_v22, %v328_v26  ;;  %v339_v9 = vld [vmem:[%s4034_s10 + $0xd8] sm:$0xff]  ;;  %v340_v14 = vld [vmem:[%s4034_s10 + $0xe0] sm:$0xff]  ;;  %v341_v15 = vld [vmem:[%s4034_s10 + $0xe8] sm:$0xff] }
  0x9b   : > { %v745_v47 = vmul.f32 %v4074_v23, %v329_v31  ;;  %v1126_v48 = vadd.f32 %v741_v37, %v740_v36  ;;  %v734_v49 = vmul.f32 %v4062_v16, %v318_v32  ;;  %v735_v50 = vmul.f32 %v4064_v17, %v319_v33  ;;  %v342_v26 = vld [vmem:[%s4034_s10 + $0xf0] sm:$0xff]  ;;  %v343_v31 = vld [vmem:[%s4034_s10 + $0xf8] sm:$0xff]  ;;  %v344_v32 = vld [vmem:[%s4034_s10 + $0x100] sm:$0xff] }
  0x9c   : > { %v1113_v54 = vadd.f32 %v1112_v41, %v730_v29  ;;  %v736_v55 = vmul.f32 %v4066_v18, %v320_v38  ;;  %v737_v56 = vmul.f32 %v4068_v19, %v321_v39  ;;  %v738_v57 = vmul.f32 %v4072_v22, %v322_v40  ;;  %v345_v33 = vld [vmem:[%s4034_s10 + $0x108] sm:$0xff]  ;;  %v346_v39 = vld [vmem:[%s4034_s10 + $0x110] sm:$0xff]  ;;  %v347_v40 = vld [vmem:[%s4034_s10 + $0x118] sm:$0xff] }
  0x9d   : > { %v1127_v60 = vadd.f32 %v1126_v48, %v742_v42  ;;  %v739_v61 = vmul.f32 %v4074_v23, %v323_v45  ;;  %v1119_v62 = vadd.f32 %v735_v50, %v734_v49  ;;  %v746_v63 = vmul.f32 %v4062_v16, %v330_v46  ;;  %v348_v45 = vld [vmem:[%s4034_s10 + $0x120] sm:$0xff]  ;;  %v349_v46 = vld [vmem:[%s4034_s10 + $0x128] sm:$0xff] }
  0x9e   : > { %v1114_v3 = vadd.f32 %v1113_v54, %v731_v30  ;;  %v747_v4 = vmul.f32 %v4064_v17, %v331_v51  ;;  %v748_v5 = vmul.f32 %v4066_v18, %v332_v52  ;;  %v749_v7 = vmul.f32 %v4068_v19, %v333_v53  ;;  %v350_v51 = vld [vmem:[%s4034_s10 + $0x130] sm:$0xff]  ;;  %v352_v52 = vld [vmem:[%s4034_s10 + $0x140] sm:$0xff] }
  0x9f   : > { %v1128_v10 = vadd.f32 %v1127_v60, %v743_v43  ;;  %v1120_v11 = vadd.f32 %v1119_v62, %v736_v55  ;;  %v750_v12 = vmul.f32 %v4072_v22, %v334_v58  ;;  %v751_v13 = vmul.f32 %v4074_v23, %v335_v59 }
  0xa0   : > { %v1115_v20 = vadd.f32 %v1114_v3, %v732_v34  ;;  %v1133_v21 = vadd.f32 %v747_v4, %v746_v63  ;;  %v752_v24 = vmul.f32 %v4062_v16, %v336_v0  ;;  %v753_v25 = vmul.f32 %v4064_v17, %v337_v1  ;;  %v354_v63 = vld [vmem:[%s4034_s10 + $0x150] sm:$0xff]  ;;  %v355_v0 = vld [vmem:[%s4034_s10 + $0x158] sm:$0xff]  ;;  %v356_v1 = vld [vmem:[%s4034_s10 + $0x160] sm:$0xff] }
  0xa1   : > { %v1129_v27 = vadd.f32 %v1128_v10, %v744_v44  ;;  %v1121_v28 = vadd.f32 %v1120_v11, %v737_v56  ;;  %v754_v29 = vmul.f32 %v4066_v18, %v338_v8  ;;  %v755_v30 = vmul.f32 %v4068_v19, %v339_v9  ;;  %v358_v8 = vld [vmem:[%s4034_s10 + $0x170] sm:$0xff] }
  0xa2   : > { %v1116_v34 = vadd.f32 %v1115_v20, %v733_v35  ;;  %v1134_v36 = vadd.f32 %v1133_v21, %v748_v5  ;;  %v756_v37 = vmul.f32 %v4072_v22, %v340_v14  ;;  %v757_v38 = vmul.f32 %v4074_v23, %v341_v15  ;;  %v359_v14 = vld [vmem:[%s4034_s10 + $0x178] sm:$0xff]  ;;  %v360_v15 = vld [vmem:[%s4034_s10 + $0x180] sm:$0xff] }
  0xa3   : > { %v1130_v41 = vadd.f32 %v1129_v27, %v745_v47  ;;  %v1122_v42 = vadd.f32 %v1121_v28, %v738_v57  ;;  %v1140_v43 = vadd.f32 %v753_v25, %v752_v24  ;;  %v758_v44 = vmul.f32 %v4062_v16, %v342_v26  ;;  %v351_v47 = vld [vmem:[%s4034_s10 + $0x138] sm:$0xff]  ;;  %v353_v57 = vld [vmem:[%s4034_s10 + $0x148] sm:$0xff]  ;;  %v362_v27 = vld [vmem:[%s4034_s10 + $0x190] sm:$0xff] }
  0xa4   : > { %1117 = vadd.xlane.f32.xlu0 %v1116_v34  ;;  %v1135_v35 = vadd.f32 %v1134_v36, %v749_v7  ;;  %v759_v48 = vmul.f32 %v4064_v17, %v343_v31  ;;  %v760_v49 = vmul.f32 %v4066_v18, %v344_v32  ;;  %v761_v50 = vmul.f32 %v4068_v19, %v345_v33  ;;  %v357_v7 = vld [vmem:[%s4034_s10 + $0x168] sm:$0xff]  ;;  %v363_v31 = vld [vmem:[%s4034_s10 + $0x198] sm:$0xff]  ;;  %v364_v32 = vld [vmem:[%s4034_s10 + $0x1a0] sm:$0xff] }
  0xa5   : > { %1131 = vadd.xlane.f32.xlu1 %v1130_v41  ;;  %v1123_v53 = vadd.f32 %v1122_v42, %v739_v61  ;;  %v1141_v54 = vadd.f32 %v1140_v43, %v754_v29  ;;  %v762_v55 = vmul.f32 %v4072_v22, %v346_v39  ;;  %v763_v56 = vmul.f32 %v4074_v23, %v347_v40  ;;  %v361_v26 = vld [vmem:[%s4034_s10 + $0x188] sm:$0xff]  ;;  %v366_v40 = vld [vmem:[%s4034_s10 + $0x1b0] sm:$0xff] }
  0xa6   : > { %v1136_v58 = vadd.f32 %v1135_v35, %v750_v12  ;;  %v1147_v59 = vadd.f32 %v759_v48, %v758_v44  ;;  %v764_v60 = vmul.f32 %v4062_v16, %v348_v45  ;;  %v765_v62 = vmul.f32 %v4064_v17, %v349_v46  ;;  %v365_v33 = vld [vmem:[%s4034_s10 + $0x1a8] sm:$0xff]  ;;  %v367_v45 = vld [vmem:[%s4034_s10 + $0x1b8] sm:$0xff]  ;;  %v368_v46 = vld [vmem:[%s4034_s10 + $0x1c0] sm:$0xff] }
  0xa7   : > { %v1142_v61 = vadd.f32 %v1141_v54, %v755_v30  ;;  %v766_v3 = vmul.f32 %v4066_v18, %v350_v51  ;;  %v767_v4 = vmul.f32 %v4068_v19, %v351_v47  ;;  %v768_v5 = vmul.f32 %v4072_v22, %v352_v52  ;;  %v369_v35 = vld [vmem:[%s4034_s10 + $0x1c8] sm:$0xff]  ;;  %v370_v51 = vld [vmem:[%s4034_s10 + $0x1d0] sm:$0xff]  ;;  %v371_v47 = vld [vmem:[%s4034_s10 + $0x1d8] sm:$0xff] }
  0xa8   : > { %1124 = vadd.xlane.f32.xlu0 %v1123_v53  ;;  %v1137_v9 = vadd.f32 %v1136_v58, %v751_v13  ;;  %v1148_v10 = vadd.f32 %v1147_v59, %v760_v49  ;;  %v769_v11 = vmul.f32 %v4074_v23, %v353_v57  ;;  %v1154_v12 = vadd.f32 %v765_v62, %v764_v60  ;;  %v372_v57 = vld [vmem:[%s4034_s10 + $0x1e0] sm:$0xff]  ;;  %v373_v58 = vld [vmem:[%s4034_s10 + $0x1e8] sm:$0xff] }
  0xa9   : > { %v1143_v20 = vadd.f32 %v1142_v61, %v756_v37  ;;  %v770_v21 = vmul.f32 %v4062_v16, %v354_v63  ;;  %v771_v24 = vmul.f32 %v4064_v17, %v355_v0  ;;  %v772_v25 = vmul.f32 %v4066_v18, %v356_v1  ;;  %v374_v0 = vld [vmem:[%s4034_s10 + $0x1f0] sm:$0xff]  ;;  %v375_v1 = vld [vmem:[%s4034_s10 + $0x1f8] sm:$0xff] }
  0xaa   : > { %1138 = vadd.xlane.f32.xlu1 %v1137_v9  ;;  %v1149_v13 = vadd.f32 %v1148_v10, %v761_v50  ;;  %v1155_v28 = vadd.f32 %v1154_v12, %v766_v3  ;;  %v773_v29 = vmul.f32 %v4068_v19, %v357_v7  ;;  %v774_v30 = vmul.f32 %v4072_v22, %v358_v8  ;;  %v377_v7 = vld [vmem:[%s4034_s10 + $0x208] sm:$0xff] }
  0xab   : > { %v1144_v34 = vadd.f32 %v1143_v20, %v757_v38  ;;  %v775_v36 = vmul.f32 %v4074_v23, %v359_v14  ;;  %v1161_v37 = vadd.f32 %v771_v24, %v770_v21  ;;  %v776_v39 = vmul.f32 %v4062_v16, %v360_v15  ;;  %v378_v14 = vld [vmem:[%s4034_s10 + $0x210] sm:$0xff]  ;;  %v379_v15 = vld [vmem:[%s4034_s10 + $0x218] sm:$0xff]  ;;  %v380_v20 = vld [vmem:[%s4034_s10 + $0x220] sm:$0xff] }
  0xac   : > { %v1150_v41 = vadd.f32 %v1149_v13, %v762_v55  ;;  %v1156_v42 = vadd.f32 %v1155_v28, %v767_v4  ;;  %v777_v43 = vmul.f32 %v4064_v17, %v361_v26  ;;  %v778_v44 = vmul.f32 %v4066_v18, %v362_v27  ;;  %v381_v26 = vld [vmem:[%s4034_s10 + $0x228] sm:$0xff]  ;;  %v382_v27 = vld [vmem:[%s4034_s10 + $0x230] sm:$0xff] }
  0xad   : > { %1145 = vadd.xlane.f32.xlu0 %v1144_v34  ;;  %v1162_v38 = vadd.f32 %v1161_v37, %v772_v25  ;;  %v779_v48 = vmul.f32 %v4068_v19, %v363_v31  ;;  %v780_v49 = vmul.f32 %v4072_v22, %v364_v32  ;;  %v781_v50 = vmul.f32 %v4074_v23, %v365_v33  ;;  %v383_v31 = vld [vmem:[%s4034_s10 + $0x238] sm:$0xff]  ;;  %v384_v32 = vld [vmem:[%s4034_s10 + $0x240] sm:$0xff] }
  0xae   : > { %v1151_v52 = vadd.f32 %v1150_v41, %v763_v56  ;;  %v1157_v53 = vadd.f32 %v1156_v42, %v768_v5  ;;  %v1168_v54 = vadd.f32 %v777_v43, %v776_v39  ;;  %v782_v55 = vmul.f32 %v4062_v16, %v366_v40  ;;  %v376_v56 = vld [vmem:[%s4034_s10 + $0x200] sm:$0xff]  ;;  %v385_v40 = vld [vmem:[%s4034_s10 + $0x248] sm:$0xff]  ;;  %v386_v41 = vld [vmem:[%s4034_s10 + $0x250] sm:$0xff] }
  0xaf   : > { %v1163_v59 = vadd.f32 %v1162_v38, %v773_v29  ;;  %v783_v60 = vmul.f32 %v4064_v17, %v367_v45  ;;  %v784_v62 = vmul.f32 %v4066_v18, %v368_v46  ;;  %v785_v63 = vmul.f32 %v4068_v19, %v369_v35  ;;  %v387_v45 = vld [vmem:[%s4034_s10 + $0x258] sm:$0xff]  ;;  %v388_v46 = vld [vmem:[%s4034_s10 + $0x260] sm:$0xff]  ;;  %v389_v35 = vld [vmem:[%s4034_s10 + $0x268] sm:$0xff] }
  0xb0   : > { %1152 = vadd.xlane.f32.xlu1 %v1151_v52  ;;  %v1158_v61 = vadd.f32 %v1157_v53, %v769_v11  ;;  %v1169_v3 = vadd.f32 %v1168_v54, %v778_v44  ;;  %v786_v4 = vmul.f32 %v4072_v22, %v370_v51  ;;  %v787_v5 = vmul.f32 %v4074_v23, %v371_v47  ;;  %v390_v47 = vld [vmem:[%s4034_s10 + $0x270] sm:$0xff] }
  0xb1   : > { %v1164_v8 = vadd.f32 %v1163_v59, %v774_v30  ;;  %v1175_v9 = vadd.f32 %v783_v60, %v782_v55  ;;  %v788_v10 = vmul.f32 %v4062_v16, %v372_v57  ;;  %v789_v12 = vmul.f32 %v4064_v17, %v373_v58  ;;  %v391_v57 = vld [vmem:[%s4034_s10 + $0x278] sm:$0xff]  ;;  %v392_v58 = vld [vmem:[%s4034_s10 + $0x280] sm:$0xff]  ;;  %v393_v59 = vld [vmem:[%s4034_s10 + $0x288] sm:$0xff] }
  0xb2   : > { %1159 = vadd.xlane.f32.xlu0 %v1158_v61  ;;  %v1170_v11 = vadd.f32 %v1169_v3, %v779_v48  ;;  %v790_v21 = vmul.f32 %v4066_v18, %v374_v0  ;;  %v791_v24 = vmul.f32 %v4068_v19, %v375_v1  ;;  %v792_v25 = vmul.f32 %v4072_v22, %v376_v56  ;;  %v394_v0 = vld [vmem:[%s4034_s10 + $0x290] sm:$0xff]  ;;  %v395_v1 = vld [vmem:[%s4034_s10 + $0x298] sm:$0xff] }
  0xb3   : > { %v1165_v13 = vadd.f32 %v1164_v8, %v775_v36  ;;  %v1176_v28 = vadd.f32 %v1175_v9, %v784_v62  ;;  %v793_v29 = vmul.f32 %v4074_v23, %v377_v7  ;;  %v1182_v30 = vadd.f32 %v789_v12, %v788_v10  ;;  %v396_v7 = vld [vmem:[%s4034_s10 + $0x2a0] sm:$0xff]  ;;  %v397_v8 = vld [vmem:[%s4034_s10 + $0x2a8] sm:$0xff] }
  0xb4   : > { %v1171_v33 = vadd.f32 %v1170_v11, %v780_v49  ;;  %v794_v34 = vmul.f32 %v4062_v16, %v378_v14  ;;  %v795_v37 = vmul.f32 %v4064_v17, %v379_v15  ;;  %v796_v39 = vmul.f32 %v4066_v18, %v380_v20  ;;  %v398_v15 = vld [vmem:[%s4034_s10 + $0x2b0] sm:$0xff]  ;;  %v399_v20 = vld [vmem:[%s4034_s10 + $0x2b8] sm:$0xff] }
  0xb5   : > { %1166 = vadd.xlane.f32.xlu1 %v1165_v13  ;;  %v1177_v36 = vadd.f32 %v1176_v28, %v785_v63  ;;  %v1183_v42 = vadd.f32 %v1182_v30, %v790_v21  ;;  %v797_v43 = vmul.f32 %v4068_v19, %v381_v26  ;;  %v798_v44 = vmul.f32 %v4072_v22, %v382_v27  ;;  %v401_v26 = vld [vmem:[%s4034_s10 + $0x2c8] sm:$0xff] }
  0xb6   : > { %v1172_v38 = vadd.f32 %v1171_v33, %v781_v50  ;;  %v799_v48 = vmul.f32 %v4074_v23, %v383_v31  ;;  %v1189_v49 = vadd.f32 %v795_v37, %v794_v34  ;;  %v800_v51 = vmul.f32 %v4062_v16, %v384_v32  ;;  %v402_v31 = vld [vmem:[%s4034_s10 + $0x2d0] sm:$0xff]  ;;  %v403_v32 = vld [vmem:[%s4034_s10 + $0x2d8] sm:$0xff]  ;;  %v404_v33 = vld [vmem:[%s4034_s10 + $0x2e0] sm:$0xff] }
  0xb7   : > { %v1178_v52 = vadd.f32 %v1177_v36, %v786_v4  ;;  %v1184_v53 = vadd.f32 %v1183_v42, %v791_v24  ;;  %v801_v54 = vmul.f32 %v4064_v17, %v385_v40  ;;  %v802_v55 = vmul.f32 %v4066_v18, %v386_v41  ;;  %v405_v40 = vld [vmem:[%s4034_s10 + $0x2e8] sm:$0xff]  ;;  %v406_v41 = vld [vmem:[%s4034_s10 + $0x2f0] sm:$0xff] }
  0xb8   : > { %1173 = vadd.xlane.f32.xlu0 %v1172_v38  ;;  %v1190_v50 = vadd.f32 %v1189_v49, %v796_v39  ;;  %v803_v60 = vmul.f32 %v4068_v19, %v387_v45  ;;  %v804_v62 = vmul.f32 %v4072_v22, %v388_v46  ;;  %v805_v63 = vmul.f32 %v4074_v23, %v389_v35  ;;  %v407_v45 = vld [vmem:[%s4034_s10 + $0x2f8] sm:$0xff]  ;;  %v408_v46 = vld [vmem:[%s4034_s10 + $0x300] sm:$0xff] }
  0xb9   : > { %v1179_v56 = vadd.f32 %v1178_v52, %v787_v5  ;;  %v1185_v61 = vadd.f32 %v1184_v53, %v792_v25  ;;  %v1196_v3 = vadd.f32 %v801_v54, %v800_v51  ;;  %v806_v4 = vmul.f32 %v4062_v16, %v390_v47  ;;  %v400_v5 = vld [vmem:[%s4034_s10 + $0x2c0] sm:$0xff]  ;;  %v409_v47 = vld [vmem:[%s4034_s10 + $0x308] sm:$0xff]  ;;  %v410_v52 = vld [vmem:[%s4034_s10 + $0x310] sm:$0xff] }
  0xba   : > { %v1191_v9 = vadd.f32 %v1190_v50, %v797_v43  ;;  %v807_v10 = vmul.f32 %v4064_v17, %v391_v57  ;;  %v808_v12 = vmul.f32 %v4066_v18, %v392_v58  ;;  %v809_v14 = vmul.f32 %v4068_v19, %v393_v59  ;;  %v411_v57 = vld [vmem:[%s4034_s10 + $0x318] sm:$0xff]  ;;  %v412_v58 = vld [vmem:[%s4034_s10 + $0x320] sm:$0xff]  ;;  %v413_v59 = vld [vmem:[%s4034_s10 + $0x328] sm:$0xff] }
  0xbb   : > { %1180 = vadd.xlane.f32.xlu1 %v1179_v56  ;;  %v1186_v11 = vadd.f32 %v1185_v61, %v793_v29  ;;  %v1197_v21 = vadd.f32 %v1196_v3, %v802_v55  ;;  %v810_v24 = vmul.f32 %v4072_v22, %v394_v0  ;;  %v811_v25 = vmul.f32 %v4074_v23, %v395_v1  ;;  %v414_v1 = vld [vmem:[%s4034_s10 + $0x330] sm:$0xff] }
  0xbc   : > { %v1192_v27 = vadd.f32 %v1191_v9, %v798_v44  ;;  %v1203_v13 = vadd.f32 %v807_v10, %v806_v4  ;;  %v812_v28 = vmul.f32 %v4062_v16, %v396_v7  ;;  %v813_v30 = vmul.f32 %v4064_v17, %v397_v8  ;;  %v415_v7 = vld [vmem:[%s4034_s10 + $0x338] sm:$0xff]  ;;  %v416_v8 = vld [vmem:[%s4034_s10 + $0x340] sm:$0xff]  ;;  %v417_v9 = vld [vmem:[%s4034_s10 + $0x348] sm:$0xff] }
  0xbd   : > { %1187 = vadd.xlane.f32.xlu0 %v1186_v11  ;;  %v1198_v29 = vadd.f32 %v1197_v21, %v803_v60  ;;  %v814_v34 = vmul.f32 %v4066_v18, %v398_v15  ;;  %v815_v37 = vmul.f32 %v4068_v19, %v399_v20  ;;  %v816_v39 = vmul.f32 %v4072_v22, %v400_v5  ;;  %v418_v15 = vld [vmem:[%s4034_s10 + $0x350] sm:$0xff]  ;;  %v419_v20 = vld [vmem:[%s4034_s10 + $0x358] sm:$0xff] }
  0xbe   : > { %v1193_v36 = vadd.f32 %v1192_v27, %v799_v48  ;;  %v1204_v42 = vadd.f32 %v1203_v13, %v808_v12  ;;  %v817_v43 = vmul.f32 %v4074_v23, %v401_v26  ;;  %v1210_v44 = vadd.f32 %v813_v30, %v812_v28  ;;  %v420_v26 = vld [vmem:[%s4034_s10 + $0x360] sm:$0xff]  ;;  %v421_v27 = vld [vmem:[%s4034_s10 + $0x368] sm:$0xff] }
  0xbf   : > { %v1199_v35 = vadd.f32 %v1198_v29, %v804_v62  ;;  %v818_v38 = vmul.f32 %v4062_v16, %v402_v31  ;;  %v819_v49 = vmul.f32 %v4064_v17, %v403_v32  ;;  %v820_v51 = vmul.f32 %v4066_v18, %v404_v33  ;;  %v422_v32 = vld [vmem:[%s4034_s10 + $0x370] sm:$0xff]  ;;  %v423_v33 = vld [vmem:[%s4034_s10 + $0x378] sm:$0xff] }
  0xc0   : > { %1194 = vadd.xlane.f32.xlu1 %v1193_v36  ;;  %v1205_v48 = vadd.f32 %v1204_v42, %v809_v14  ;;  %v1211_v53 = vadd.f32 %v1210_v44, %v814_v34  ;;  %v821_v54 = vmul.f32 %v4068_v19, %v405_v40  ;;  %v822_v55 = vmul.f32 %v4072_v22, %v406_v41  ;;  %v425_v40 = vld [vmem:[%s4034_s10 + $0x388] sm:$0xff] }
  0xc1   : > { %v1200_v50 = vadd.f32 %v1199_v35, %v805_v63  ;;  %v823_v60 = vmul.f32 %v4074_v23, %v407_v45  ;;  %v1217_v62 = vadd.f32 %v819_v49, %v818_v38  ;;  %v824_v0 = vmul.f32 %v4062_v16, %v408_v46  ;;  %v426_v45 = vld [vmem:[%s4034_s10 + $0x390] sm:$0xff]  ;;  %v427_v46 = vld [vmem:[%s4034_s10 + $0x398] sm:$0xff]  ;;  %v428_v35 = vld [vmem:[%s4034_s10 + $0x3a0] sm:$0xff] }
  0xc2   : > { %v1206_v56 = vadd.f32 %v1205_v48, %v810_v24  ;;  %v1212_v61 = vadd.f32 %v1211_v53, %v815_v37  ;;  %v825_v3 = vmul.f32 %v4064_v17, %v409_v47  ;;  %v826_v4 = vmul.f32 %v4066_v18, %v410_v52  ;;  %v429_v47 = vld [vmem:[%s4034_s10 + $0x3a8] sm:$0xff]  ;;  %v430_v52 = vld [vmem:[%s4034_s10 + $0x3b0] sm:$0xff] }
  0xc3   : > { %1201 = vadd.xlane.f32.xlu0 %v1200_v50  ;;  %v1218_v63 = vadd.f32 %v1217_v62, %v820_v51  ;;  %v827_v10 = vmul.f32 %v4068_v19, %v411_v57  ;;  %v828_v12 = vmul.f32 %v4072_v22, %v412_v58  ;;  %v829_v14 = vmul.f32 %v4074_v23, %v413_v59  ;;  %v431_v57 = vld [vmem:[%s4034_s10 + $0x3b8] sm:$0xff]  ;;  %v432_v58 = vld [vmem:[%s4034_s10 + $0x3c0] sm:$0xff] }
  0xc4   : > { %v1207_v5 = vadd.f32 %v1206_v56, %v811_v25  ;;  %v1213_v11 = vadd.f32 %v1212_v61, %v816_v39  ;;  %v1224_v21 = vadd.f32 %v825_v3, %v824_v0  ;;  %v830_v24 = vmul.f32 %v4062_v16, %v414_v1  ;;  %v424_v25 = vld [vmem:[%s4034_s10 + $0x380] sm:$0xff]  ;;  %v433_v1 = vld [vmem:[%s4034_s10 + $0x3c8] sm:$0xff]  ;;  %v434_v56 = vld [vmem:[%s4034_s10 + $0x3d0] sm:$0xff] }
  0xc5   : > { %v1219_v13 = vadd.f32 %v1218_v63, %v821_v54  ;;  %v831_v28 = vmul.f32 %v4064_v17, %v415_v7  ;;  %v832_v30 = vmul.f32 %v4066_v18, %v416_v8  ;;  %v833_v31 = vmul.f32 %v4068_v19, %v417_v9  ;;  %v435_v7 = vld [vmem:[%s4034_s10 + $0x3d8] sm:$0xff]  ;;  %v436_v8 = vld [vmem:[%s4034_s10 + $0x3e0] sm:$0xff]  ;;  %v437_v9 = vld [vmem:[%s4034_s10 + $0x3e8] sm:$0xff] }
  0xc6   : > { %1208 = vadd.xlane.f32.xlu1 %v1207_v5  ;;  %v1214_v29 = vadd.f32 %v1213_v11, %v817_v43  ;;  %v1225_v34 = vadd.f32 %v1224_v21, %v826_v4  ;;  %v834_v37 = vmul.f32 %v4072_v22, %v418_v15  ;;  %v835_v39 = vmul.f32 %v4074_v23, %v419_v20  ;;  %v438_v20 = vld [vmem:[%s4034_s10 + $0x3f0] sm:$0xff] }
  0xc7   : > { %v1220_v41 = vadd.f32 %v1219_v13, %v822_v55  ;;  %v1231_v36 = vadd.f32 %v831_v28, %v830_v24  ;;  %v836_v42 = vmul.f32 %v4062_v16, %v420_v26  ;;  %v837_v44 = vmul.f32 %v4064_v17, %v421_v27  ;;  %v439_v26 = vld [vmem:[%s4034_s10 + $0x3f8] sm:$0xff]  ;;  %v440_v27 = vld [vmem:[%s4034_s10 + $0x400] sm:$0xff]  ;;  %v441_v13 = vld [vmem:[%s4034_s10 + $0x408] sm:$0xff] }
  0xc8   : > { %1215 = vadd.xlane.f32.xlu0 %v1214_v29  ;;  %v1226_v43 = vadd.f32 %v1225_v34, %v827_v10  ;;  %v838_v38 = vmul.f32 %v4066_v18, %v422_v32  ;;  %v839_v49 = vmul.f32 %v4068_v19, %v423_v33  ;;  %v840_v51 = vmul.f32 %v4072_v22, %v424_v25  ;;  %v442_v32 = vld [vmem:[%s4034_s10 + $0x410] sm:$0xff]  ;;  %v443_v33 = vld [vmem:[%s4034_s10 + $0x418] sm:$0xff] }
  0xc9   : > { %v1221_v48 = vadd.f32 %v1220_v41, %v823_v60  ;;  %v1232_v53 = vadd.f32 %v1231_v36, %v832_v30  ;;  %v841_v54 = vmul.f32 %v4074_v23, %v425_v40  ;;  %v1238_v55 = vadd.f32 %v837_v44, %v836_v42  ;;  %v444_v40 = vld [vmem:[%s4034_s10 + $0x420] sm:$0xff]  ;;  %v445_v41 = vld [vmem:[%s4034_s10 + $0x428] sm:$0xff] }
  0xca   : > { %v1227_v59 = vadd.f32 %v1226_v43, %v828_v12  ;;  %v842_v50 = vmul.f32 %v4062_v16, %v426_v45  ;;  %v843_v62 = vmul.f32 %v4064_v17, %v427_v46  ;;  %v844_v0 = vmul.f32 %v4066_v18, %v428_v35  ;;  %v446_v46 = vld [vmem:[%s4034_s10 + $0x430] sm:$0xff]  ;;  %v447_v35 = vld [vmem:[%s4034_s10 + $0x438] sm:$0xff] }
  0xcb   : > { %1222 = vadd.xlane.f32.xlu1 %v1221_v48  ;;  %v1233_v60 = vadd.f32 %v1232_v53, %v833_v31  ;;  %v1239_v61 = vadd.f32 %v1238_v55, %v838_v38  ;;  %v845_v3 = vmul.f32 %v4068_v19, %v429_v47  ;;  %v846_v4 = vmul.f32 %v4072_v22, %v430_v52  ;;  %v449_v47 = vld [vmem:[%s4034_s10 + $0x448] sm:$0xff] }
  0xcc   : > { %v1228_v63 = vadd.f32 %v1227_v59, %v829_v14  ;;  %v847_v10 = vmul.f32 %v4074_v23, %v431_v57  ;;  %v1245_v12 = vadd.f32 %v843_v62, %v842_v50  ;;  %v848_v15 = vmul.f32 %v4062_v16, %v432_v58  ;;  %v450_v57 = vld [vmem:[%s4034_s10 + $0x450] sm:$0xff]  ;;  %v451_v58 = vld [vmem:[%s4034_s10 + $0x458] sm:$0xff]  ;;  %v452_v59 = vld [vmem:[%s4034_s10 + $0x460] sm:$0xff] }
  0xcd   : > { %v1234_v5 = vadd.f32 %v1233_v60, %v834_v37  ;;  %v1240_v11 = vadd.f32 %v1239_v61, %v839_v49  ;;  %v849_v21 = vmul.f32 %v4064_v17, %v433_v1  ;;  %v850_v24 = vmul.f32 %v4066_v18, %v434_v56  ;;  %v453_v1 = vld [vmem:[%s4034_s10 + $0x468] sm:$0xff]  ;;  %v454_v56 = vld [vmem:[%s4034_s10 + $0x470] sm:$0xff] }
  0xce   : > { %1229 = vadd.xlane.f32.xlu0 %v1228_v63  ;;  %v1246_v14 = vadd.f32 %v1245_v12, %v844_v0  ;;  %v851_v28 = vmul.f32 %v4068_v19, %v435_v7  ;;  %v852_v30 = vmul.f32 %v4072_v22, %v436_v8  ;;  %v853_v31 = vmul.f32 %v4074_v23, %v437_v9  ;;  %v455_v7 = vld [vmem:[%s4034_s10 + $0x478] sm:$0xff]  ;;  %v456_v8 = vld [vmem:[%s4034_s10 + $0x480] sm:$0xff] }
  0xcf   : > { %v1235_v25 = vadd.f32 %v1234_v5, %v835_v39  ;;  %v1241_v29 = vadd.f32 %v1240_v11, %v840_v51  ;;  %v1252_v34 = vadd.f32 %v849_v21, %v848_v15  ;;  %v854_v37 = vmul.f32 %v4062_v16, %v438_v20  ;;  %v448_v39 = vld [vmem:[%s4034_s10 + $0x440] sm:$0xff]  ;;  %v457_v20 = vld [vmem:[%s4034_s10 + $0x488] sm:$0xff]  ;;  %v458_v5 = vld [vmem:[%s4034_s10 + $0x490] sm:$0xff] }
  0xd0   : > { %v1247_v36 = vadd.f32 %v1246_v14, %v845_v3  ;;  %v855_v42 = vmul.f32 %v4064_v17, %v439_v26  ;;  %v856_v44 = vmul.f32 %v4066_v18, %v440_v27  ;;  %v857_v45 = vmul.f32 %v4068_v19, %v441_v13  ;;  %v459_v26 = vld [vmem:[%s4034_s10 + $0x498] sm:$0xff]  ;;  %v460_v27 = vld [vmem:[%s4034_s10 + $0x4a0] sm:$0xff]  ;;  %v461_v13 = vld [vmem:[%s4034_s10 + $0x4a8] sm:$0xff] }
  0xd1   : > { %1236 = vadd.xlane.f32.xlu1 %v1235_v25  ;;  %v1242_v43 = vadd.f32 %v1241_v29, %v841_v54  ;;  %v1253_v38 = vadd.f32 %v1252_v34, %v850_v24  ;;  %v858_v49 = vmul.f32 %v4072_v22, %v442_v32  ;;  %v859_v51 = vmul.f32 %v4074_v23, %v443_v33  ;;  %v462_v33 = vld [vmem:[%s4034_s10 + $0x4b0] sm:$0xff] }
  0xd2   : > { %v1248_v52 = vadd.f32 %v1247_v36, %v846_v4  ;;  %v1259_v48 = vadd.f32 %v855_v42, %v854_v37  ;;  %v860_v53 = vmul.f32 %v4062_v16, %v444_v40  ;;  %v861_v55 = vmul.f32 %v4064_v17, %v445_v41  ;;  %v463_v40 = vld [vmem:[%s4034_s10 + $0x4b8] sm:$0xff]  ;;  %v464_v41 = vld [vmem:[%s4034_s10 + $0x4c0] sm:$0xff]  ;;  %v465_v36 = vld [vmem:[%s4034_s10 + $0x4c8] sm:$0xff] }
  0xd3   : > { %1243 = vadd.xlane.f32.xlu0 %v1242_v43  ;;  %v1254_v54 = vadd.f32 %v1253_v38, %v851_v28  ;;  %v862_v50 = vmul.f32 %v4066_v18, %v446_v46  ;;  %v863_v62 = vmul.f32 %v4068_v19, %v447_v35  ;;  %v864_v0 = vmul.f32 %v4072_v22, %v448_v39  ;;  %v466_v46 = vld [vmem:[%s4034_s10 + $0x4d0] sm:$0xff]  ;;  %v467_v35 = vld [vmem:[%s4034_s10 + $0x4d8] sm:$0xff] }
  0xd4   : > { %v1249_v60 = vadd.f32 %v1248_v52, %v847_v10  ;;  %v1260_v61 = vadd.f32 %v1259_v48, %v856_v44  ;;  %v865_v3 = vmul.f32 %v4074_v23, %v449_v47  ;;  %v1266_v4 = vadd.f32 %v861_v55, %v860_v53  ;;  %v468_v47 = vld [vmem:[%s4034_s10 + $0x4e0] sm:$0xff]  ;;  %v469_v52 = vld [vmem:[%s4034_s10 + $0x4e8] sm:$0xff] }
  0xd5   : > { %v1255_v9 = vadd.f32 %v1254_v54, %v852_v30  ;;  %v866_v63 = vmul.f32 %v4062_v16, %v450_v57  ;;  %v867_v12 = vmul.f32 %v4064_v17, %v451_v58  ;;  %v868_v15 = vmul.f32 %v4066_v18, %v452_v59  ;;  %v470_v58 = vld [vmem:[%s4034_s10 + $0x4f0] sm:$0xff]  ;;  %v471_v59 = vld [vmem:[%s4034_s10 + $0x4f8] sm:$0xff] }
  0xd6   : > { %1250 = vadd.xlane.f32.xlu1 %v1249_v60  ;;  %v1261_v10 = vadd.f32 %v1260_v61, %v857_v45  ;;  %v1267_v11 = vadd.f32 %v1266_v4, %v862_v50  ;;  %v869_v21 = vmul.f32 %v4068_v19, %v453_v1  ;;  %v870_v24 = vmul.f32 %v4072_v22, %v454_v56  ;;  %v473_v1 = vld [vmem:[%s4034_s10 + $0x508] sm:$0xff] }
  0xd7   : > { %v1256_v14 = vadd.f32 %v1255_v9, %v853_v31  ;;  %v871_v28 = vmul.f32 %v4074_v23, %v455_v7  ;;  %v1273_v30 = vadd.f32 %v867_v12, %v866_v63  ;;  %v872_v32 = vmul.f32 %v4062_v16, %v456_v8  ;;  %v474_v7 = vld [vmem:[%s4034_s10 + $0x510] sm:$0xff]  ;;  %v475_v8 = vld [vmem:[%s4034_s10 + $0x518] sm:$0xff]  ;;  %v476_v9 = vld [vmem:[%s4034_s10 + $0x520] sm:$0xff] }
  0xd8   : > { %v1262_v25 = vadd.f32 %v1261_v10, %v858_v49  ;;  %v1268_v29 = vadd.f32 %v1267_v11, %v863_v62  ;;  %v873_v34 = vmul.f32 %v4064_v17, %v457_v20  ;;  %v874_v37 = vmul.f32 %v4066_v18, %v458_v5  ;;  %v477_v20 = vld [vmem:[%s4034_s10 + $0x528] sm:$0xff]  ;;  %v478_v5 = vld [vmem:[%s4034_s10 + $0x530] sm:$0xff] }
  0xd9   : > { %1257 = vadd.xlane.f32.xlu0 %v1256_v14  ;;  %v1274_v31 = vadd.f32 %v1273_v30, %v868_v15  ;;  %v875_v42 = vmul.f32 %v4068_v19, %v459_v26  ;;  %v876_v44 = vmul.f32 %v4072_v22, %v460_v27  ;;  %v877_v45 = vmul.f32 %v4074_v23, %v461_v13  ;;  %v479_v26 = vld [vmem:[%s4034_s10 + $0x538] sm:$0xff]  ;;  %v480_v27 = vld [vmem:[%s4034_s10 + $0x540] sm:$0xff] }
  0xda   : > { %v1263_v39 = vadd.f32 %v1262_v25, %v859_v51  ;;  %v1269_v43 = vadd.f32 %v1268_v29, %v864_v0  ;;  %v1280_v38 = vadd.f32 %v873_v34, %v872_v32  ;;  %v878_v49 = vmul.f32 %v4062_v16, %v462_v33  ;;  %v472_v51 = vld [vmem:[%s4034_s10 + $0x500] sm:$0xff]  ;;  %v481_v33 = vld [vmem:[%s4034_s10 + $0x548] sm:$0xff]  ;;  %v482_v25 = vld [vmem:[%s4034_s10 + $0x550] sm:$0xff] }
  0xdb   : > { %v1275_v48 = vadd.f32 %v1274_v31, %v869_v21  ;;  %v879_v53 = vmul.f32 %v4064_v17, %v463_v40  ;;  %v880_v55 = vmul.f32 %v4066_v18, %v464_v41  ;;  %v881_v57 = vmul.f32 %v4068_v19, %v465_v36  ;;  %v483_v40 = vld [vmem:[%s4034_s10 + $0x558] sm:$0xff]  ;;  %v484_v41 = vld [vmem:[%s4034_s10 + $0x560] sm:$0xff]  ;;  %v485_v36 = vld [vmem:[%s4034_s10 + $0x568] sm:$0xff] }
  0xdc   : > { %1264 = vadd.xlane.f32.xlu1 %v1263_v39  ;;  %v1270_v54 = vadd.f32 %v1269_v43, %v865_v3  ;;  %v1281_v50 = vadd.f32 %v1280_v38, %v874_v37  ;;  %v882_v62 = vmul.f32 %v4072_v22, %v466_v46  ;;  %v883_v0 = vmul.f32 %v4074_v23, %v467_v35  ;;  %v486_v35 = vld [vmem:[%s4034_s10 + $0x570] sm:$0xff] }
  0xdd   : > { %v1276_v56 = vadd.f32 %v1275_v48, %v870_v24  ;;  %v1287_v60 = vadd.f32 %v879_v53, %v878_v49  ;;  %v884_v61 = vmul.f32 %v4062_v16, %v468_v47  ;;  %v885_v4 = vmul.f32 %v4064_v17, %v469_v52  ;;  %v487_v47 = vld [vmem:[%s4034_s10 + $0x578] sm:$0xff]  ;;  %v488_v52 = vld [vmem:[%s4034_s10 + $0x580] sm:$0xff]  ;;  %v489_v48 = vld [vmem:[%s4034_s10 + $0x588] sm:$0xff] }
  0xde   : > { %1271 = vadd.xlane.f32.xlu0 %v1270_v54  ;;  %v1282_v3 = vadd.f32 %v1281_v50, %v875_v42  ;;  %v886_v63 = vmul.f32 %v4066_v18, %v470_v58  ;;  %v887_v12 = vmul.f32 %v4068_v19, %v471_v59  ;;  %v888_v15 = vmul.f32 %v4072_v22, %v472_v51  ;;  %v490_v58 = vld [vmem:[%s4034_s10 + $0x590] sm:$0xff]  ;;  %v491_v59 = vld [vmem:[%s4034_s10 + $0x598] sm:$0xff] }
  0xdf   : > { %v1277_v10 = vadd.f32 %v1276_v56, %v871_v28  ;;  %v1288_v11 = vadd.f32 %v1287_v60, %v880_v55  ;;  %v889_v21 = vmul.f32 %v4074_v23, %v473_v1  ;;  %v1294_v24 = vadd.f32 %v885_v4, %v884_v61  ;;  %v492_v1 = vld [vmem:[%s4034_s10 + $0x5a0] sm:$0xff]  ;;  %v493_v56 = vld [vmem:[%s4034_s10 + $0x5a8] sm:$0xff] }
  0xe0   : > { %v1283_v13 = vadd.f32 %v1282_v3, %v876_v44  ;;  %v890_v14 = vmul.f32 %v4062_v16, %v474_v7  ;;  %v891_v30 = vmul.f32 %v4064_v17, %v475_v8  ;;  %v892_v32 = vmul.f32 %v4066_v18, %v476_v9  ;;  %v494_v8 = vld [vmem:[%s4034_s10 + $0x5b0] sm:$0xff]  ;;  %v495_v9 = vld [vmem:[%s4034_s10 + $0x5b8] sm:$0xff] }
  0xe1   : > { %1278 = vadd.xlane.f32.xlu1 %v1277_v10  ;;  %v1289_v28 = vadd.f32 %v1288_v11, %v881_v57  ;;  %v1295_v29 = vadd.f32 %v1294_v24, %v886_v63  ;;  %v893_v34 = vmul.f32 %v4068_v19, %v477_v20  ;;  %v894_v37 = vmul.f32 %v4072_v22, %v478_v5  ;;  %v497_v20 = vld [vmem:[%s4034_s10 + $0x5c8] sm:$0xff] }
  0xe2   : > { %v1284_v31 = vadd.f32 %v1283_v13, %v877_v45  ;;  %v895_v42 = vmul.f32 %v4074_v23, %v479_v26  ;;  %v1301_v44 = vadd.f32 %v891_v30, %v890_v14  ;;  %v896_v46 = vmul.f32 %v4062_v16, %v480_v27  ;;  %v498_v26 = vld [vmem:[%s4034_s10 + $0x5d0] sm:$0xff]  ;;  %v499_v27 = vld [vmem:[%s4034_s10 + $0x5d8] sm:$0xff]  ;;  %v500_v13 = vld [vmem:[%s4034_s10 + $0x5e0] sm:$0xff] }
  0xe3   : > { %v1290_v39 = vadd.f32 %v1289_v28, %v882_v62  ;;  %v1296_v43 = vadd.f32 %v1295_v29, %v887_v12  ;;  %v897_v38 = vmul.f32 %v4064_v17, %v481_v33  ;;  %v898_v49 = vmul.f32 %v4066_v18, %v482_v25  ;;  %v501_v33 = vld [vmem:[%s4034_s10 + $0x5e8] sm:$0xff]  ;;  %v502_v25 = vld [vmem:[%s4034_s10 + $0x5f0] sm:$0xff] }
  0xe4   : > { %1285 = vadd.xlane.f32.xlu0 %v1284_v31  ;;  %v1302_v45 = vadd.f32 %v1301_v44, %v892_v32  ;;  %v899_v53 = vmul.f32 %v4068_v19, %v483_v40  ;;  %v900_v55 = vmul.f32 %v4072_v22, %v484_v41  ;;  %v901_v57 = vmul.f32 %v4074_v23, %v485_v36  ;;  %v503_v40 = vld [vmem:[%s4034_s10 + $0x5f8] sm:$0xff]  ;;  %v504_v41 = vld [vmem:[%s4034_s10 + $0x600] sm:$0xff] }
  0xe5   : > { %v1291_v51 = vadd.f32 %v1290_v39, %v883_v0  ;;  %v1297_v54 = vadd.f32 %v1296_v43, %v888_v15  ;;  %v1308_v50 = vadd.f32 %v897_v38, %v896_v46  ;;  %v902_v62 = vmul.f32 %v4062_v16, %v486_v35  ;;  %v496_v0 = vld [vmem:[%s4034_s10 + $0x5c0] sm:$0xff]  ;;  %v505_v35 = vld [vmem:[%s4034_s10 + $0x608] sm:$0xff]  ;;  %v506_v39 = vld [vmem:[%s4034_s10 + $0x610] sm:$0xff] }
  0xe6   : > { %v1303_v60 = vadd.f32 %v1302_v45, %v893_v34  ;;  %v903_v61 = vmul.f32 %v4064_v17, %v487_v47  ;;  %v904_v4 = vmul.f32 %v4066_v18, %v488_v52  ;;  %v905_v7 = vmul.f32 %v4068_v19, %v489_v48  ;;  %v507_v47 = vld [vmem:[%s4034_s10 + $0x618] sm:$0xff]  ;;  %v508_v52 = vld [vmem:[%s4034_s10 + $0x620] sm:$0xff]  ;;  %v509_v48 = vld [vmem:[%s4034_s10 + $0x628] sm:$0xff] }
  0xe7   : > { %1292 = vadd.xlane.f32.xlu1 %v1291_v51  ;;  %v1298_v3 = vadd.f32 %v1297_v54, %v889_v21  ;;  %v1309_v63 = vadd.f32 %v1308_v50, %v898_v49  ;;  %v906_v12 = vmul.f32 %v4072_v22, %v490_v58  ;;  %v907_v15 = vmul.f32 %v4074_v23, %v491_v59  ;;  %v510_v59 = vld [vmem:[%s4034_s10 + $0x630] sm:$0xff] }
  0xe8   : > { %v1304_v5 = vadd.f32 %v1303_v60, %v894_v37  ;;  %v1315_v10 = vadd.f32 %v903_v61, %v902_v62  ;;  %v908_v11 = vmul.f32 %v4062_v16, %v492_v1  ;;  %v909_v24 = vmul.f32 %v4064_v17, %v493_v56  ;;  %v511_v1 = vld [vmem:[%s4034_s10 + $0x638] sm:$0xff]  ;;  %v512_v56 = vld [vmem:[%s4034_s10 + $0x640] sm:$0xff]  ;;  %v513_v60 = vld [vmem:[%s4034_s10 + $0x648] sm:$0xff] }
  0xe9   : > { %1299 = vadd.xlane.f32.xlu0 %v1298_v3  ;;  %v1310_v21 = vadd.f32 %v1309_v63, %v899_v53  ;;  %v910_v14 = vmul.f32 %v4066_v18, %v494_v8  ;;  %v911_v30 = vmul.f32 %v4068_v19, %v495_v9  ;;  %v912_v32 = vmul.f32 %v4072_v22, %v496_v0  ;;  %v514_v8 = vld [vmem:[%s4034_s10 + $0x650] sm:$0xff]  ;;  %v515_v9 = vld [vmem:[%s4034_s10 + $0x658] sm:$0xff] }
  0xea   : > { %v1305_v28 = vadd.f32 %v1304_v5, %v895_v42  ;;  %v1316_v29 = vadd.f32 %v1315_v10, %v904_v4  ;;  %v913_v34 = vmul.f32 %v4074_v23, %v497_v20  ;;  %v1322_v37 = vadd.f32 %v909_v24, %v908_v11  ;;  %v516_v20 = vld [vmem:[%s4034_s10 + $0x660] sm:$0xff]  ;;  %v517_v5 = vld [vmem:[%s4034_s10 + $0x668] sm:$0xff] }
  0xeb   : > { %v1311_v36 = vadd.f32 %v1310_v21, %v900_v55  ;;  %v914_v31 = vmul.f32 %v4062_v16, %v498_v26  ;;  %v915_v44 = vmul.f32 %v4064_v17, %v499_v27  ;;  %v916_v46 = vmul.f32 %v4066_v18, %v500_v13  ;;  %v518_v27 = vld [vmem:[%s4034_s10 + $0x670] sm:$0xff]  ;;  %v519_v13 = vld [vmem:[%s4034_s10 + $0x678] sm:$0xff] }
  0xec   : > { %1306 = vadd.xlane.f32.xlu1 %v1305_v28  ;;  %v1317_v42 = vadd.f32 %v1316_v29, %v905_v7  ;;  %v1323_v43 = vadd.f32 %v1322_v37, %v910_v14  ;;  %v917_v38 = vmul.f32 %v4068_v19, %v501_v33  ;;  %v918_v49 = vmul.f32 %v4072_v22, %v502_v25  ;;  %v521_v33 = vld [vmem:[%s4034_s10 + $0x688] sm:$0xff] }
  0xed   : > { %v1312_v45 = vadd.f32 %v1311_v36, %v901_v57  ;;  %v919_v53 = vmul.f32 %v4074_v23, %v503_v40  ;;  %v1329_v55 = vadd.f32 %v915_v44, %v914_v31  ;;  %v920_v58 = vmul.f32 %v4062_v16, %v504_v41  ;;  %v522_v40 = vld [vmem:[%s4034_s10 + $0x690] sm:$0xff]  ;;  %v523_v41 = vld [vmem:[%s4034_s10 + $0x698] sm:$0xff]  ;;  %v524_v36 = vld [vmem:[%s4034_s10 + $0x6a0] sm:$0xff] }
  0xee   : > { %v1318_v51 = vadd.f32 %v1317_v42, %v906_v12  ;;  %v1324_v54 = vadd.f32 %v1323_v43, %v911_v30  ;;  %v921_v50 = vmul.f32 %v4064_v17, %v505_v35  ;;  %v922_v62 = vmul.f32 %v4066_v18, %v506_v39  ;;  %v525_v35 = vld [vmem:[%s4034_s10 + $0x6a8] sm:$0xff]  ;;  %v526_v39 = vld [vmem:[%s4034_s10 + $0x6b0] sm:$0xff] }
  0xef   : > { %1313 = vadd.xlane.f32.xlu0 %v1312_v45  ;;  %v1330_v57 = vadd.f32 %v1329_v55, %v916_v46  ;;  %v923_v61 = vmul.f32 %v4068_v19, %v507_v47  ;;  %v924_v4 = vmul.f32 %v4072_v22, %v508_v52  ;;  %v925_v7 = vmul.f32 %v4074_v23, %v509_v48  ;;  %v527_v47 = vld [vmem:[%s4034_s10 + $0x6b8] sm:$0xff]  ;;  %v528_v52 = vld [vmem:[%s4034_s10 + $0x6c0] sm:$0xff] }
  0xf0   : > { %v1319_v0 = vadd.f32 %v1318_v51, %v907_v15  ;;  %v1325_v3 = vadd.f32 %v1324_v54, %v912_v32  ;;  %v1336_v63 = vadd.f32 %v921_v50, %v920_v58  ;;  %v926_v12 = vmul.f32 %v4062_v16, %v510_v59  ;;  %v520_v15 = vld [vmem:[%s4034_s10 + $0x680] sm:$0xff]  ;;  %v529_v59 = vld [vmem:[%s4034_s10 + $0x6c8] sm:$0xff]  ;;  %v530_v51 = vld [vmem:[%s4034_s10 + $0x6d0] sm:$0xff] }
  0xf1   : > { %v1331_v10 = vadd.f32 %v1330_v57, %v917_v38  ;;  %v927_v11 = vmul.f32 %v4064_v17, %v511_v1  ;;  %v928_v24 = vmul.f32 %v4066_v18, %v512_v56  ;;  %v929_v26 = vmul.f32 %v4068_v19, %v513_v60  ;;  %v531_v1 = vld [vmem:[%s4034_s10 + $0x6d8] sm:$0xff]  ;;  %v532_v56 = vld [vmem:[%s4034_s10 + $0x6e0] sm:$0xff]  ;;  %v533_v60 = vld [vmem:[%s4034_s10 + $0x6e8] sm:$0xff] }
  0xf2   : > { %1320 = vadd.xlane.f32.xlu1 %v1319_v0  ;;  %v1326_v21 = vadd.f32 %v1325_v3, %v913_v34  ;;  %v1337_v14 = vadd.f32 %v1336_v63, %v922_v62  ;;  %v930_v30 = vmul.f32 %v4072_v22, %v514_v8  ;;  %v931_v32 = vmul.f32 %v4074_v23, %v515_v9  ;;  %v534_v9 = vld [vmem:[%s4034_s10 + $0x6f0] sm:$0xff] }
  0xf3   : > { %v1332_v25 = vadd.f32 %v1331_v10, %v918_v49  ;;  %v1343_v28 = vadd.f32 %v927_v11, %v926_v12  ;;  %v932_v29 = vmul.f32 %v4062_v16, %v516_v20  ;;  %v933_v37 = vmul.f32 %v4064_v17, %v517_v5  ;;  %v535_v20 = vld [vmem:[%s4034_s10 + $0x6f8] sm:$0xff]  ;;  %v536_v5 = vld [vmem:[%s4034_s10 + $0x700] sm:$0xff]  ;;  %v537_v10 = vld [vmem:[%s4034_s10 + $0x708] sm:$0xff] }
  0xf4   : > { %1327 = vadd.xlane.f32.xlu0 %v1326_v21  ;;  %v1338_v34 = vadd.f32 %v1337_v14, %v923_v61  ;;  %v934_v31 = vmul.f32 %v4066_v18, %v518_v27  ;;  %v935_v44 = vmul.f32 %v4068_v19, %v519_v13  ;;  %v936_v46 = vmul.f32 %v4072_v22, %v520_v15  ;;  %v538_v27 = vld [vmem:[%s4034_s10 + $0x710] sm:$0xff]  ;;  %v539_v13 = vld [vmem:[%s4034_s10 + $0x718] sm:$0xff] }
  0xf5   : > { %v1333_v42 = vadd.f32 %v1332_v25, %v919_v53  ;;  %v1344_v43 = vadd.f32 %v1343_v28, %v928_v24  ;;  %v937_v38 = vmul.f32 %v4074_v23, %v521_v33  ;;  %v1350_v49 = vadd.f32 %v933_v37, %v932_v29  ;;  %v540_v33 = vld [vmem:[%s4034_s10 + $0x720] sm:$0xff]  ;;  %v541_v25 = vld [vmem:[%s4034_s10 + $0x728] sm:$0xff] }
  0xf6   : > { %v1339_v48 = vadd.f32 %v1338_v34, %v924_v4  ;;  %v938_v45 = vmul.f32 %v4062_v16, %v522_v40  ;;  %v939_v55 = vmul.f32 %v4064_v17, %v523_v41  ;;  %v940_v58 = vmul.f32 %v4066_v18, %v524_v36  ;;  %v542_v41 = vld [vmem:[%s4034_s10 + $0x730] sm:$0xff]  ;;  %v543_v36 = vld [vmem:[%s4034_s10 + $0x738] sm:$0xff] }
  0xf7   : > { %1334 = vadd.xlane.f32.xlu1 %v1333_v42  ;;  %v1345_v53 = vadd.f32 %v1344_v43, %v929_v26  ;;  %v1351_v54 = vadd.f32 %v1350_v49, %v934_v31  ;;  %v941_v50 = vmul.f32 %v4068_v19, %v525_v35  ;;  %v942_v62 = vmul.f32 %v4072_v22, %v526_v39  ;;  %v545_v35 = vld [vmem:[%s4034_s10 + $0x748] sm:$0xff] }
  0xf8   : > { %v1340_v57 = vadd.f32 %v1339_v48, %v925_v7  ;;  %v943_v61 = vmul.f32 %v4074_v23, %v527_v47  ;;  %v1357_v4 = vadd.f32 %v939_v55, %v938_v45  ;;  %v944_v8 = vmul.f32 %v4062_v16, %v528_v52  ;;  %v546_v47 = vld [vmem:[%s4034_s10 + $0x750] sm:$0xff]  ;;  %v547_v52 = vld [vmem:[%s4034_s10 + $0x758] sm:$0xff]  ;;  %v548_v48 = vld [vmem:[%s4034_s10 + $0x760] sm:$0xff] }
  0xf9   : > { %v1346_v0 = vadd.f32 %v1345_v53, %v930_v30  ;;  %v1352_v3 = vadd.f32 %v1351_v54, %v935_v44  ;;  %v945_v63 = vmul.f32 %v4064_v17, %v529_v59  ;;  %v946_v12 = vmul.f32 %v4066_v18, %v530_v51  ;;  %v549_v59 = vld [vmem:[%s4034_s10 + $0x768] sm:$0xff]  ;;  %v550_v51 = vld [vmem:[%s4034_s10 + $0x770] sm:$0xff] }
  0xfa   : > { %1341 = vadd.xlane.f32.xlu0 %v1340_v57  ;;  %v1358_v7 = vadd.f32 %v1357_v4, %v940_v58  ;;  %v947_v11 = vmul.f32 %v4068_v19, %v531_v1  ;;  %v948_v24 = vmul.f32 %v4072_v22, %v532_v56  ;;  %v949_v26 = vmul.f32 %v4074_v23, %v533_v60  ;;  %v551_v1 = vld [vmem:[%s4034_s10 + $0x778] sm:$0xff]  ;;  %v552_v56 = vld [vmem:[%s4034_s10 + $0x780] sm:$0xff] }
  0xfb   : > { %v1347_v15 = vadd.f32 %v1346_v0, %v931_v32  ;;  %v1353_v21 = vadd.f32 %v1352_v3, %v936_v46  ;;  %v1364_v14 = vadd.f32 %v945_v63, %v944_v8  ;;  %v950_v30 = vmul.f32 %v4062_v16, %v534_v9  ;;  %v544_v32 = vld [vmem:[%s4034_s10 + $0x740] sm:$0xff]  ;;  %v553_v9 = vld [vmem:[%s4034_s10 + $0x788] sm:$0xff]  ;;  %v554_v0 = vld [vmem:[%s4034_s10 + $0x790] sm:$0xff] }
  0xfc   : > { %v1359_v28 = vadd.f32 %v1358_v7, %v941_v50  ;;  %v951_v29 = vmul.f32 %v4064_v17, %v535_v20  ;;  %v952_v37 = vmul.f32 %v4066_v18, %v536_v5  ;;  %v953_v40 = vmul.f32 %v4068_v19, %v537_v10  ;;  %v555_v20 = vld [vmem:[%s4034_s10 + $0x798] sm:$0xff]  ;;  %v556_v5 = vld [vmem:[%s4034_s10 + $0x7a0] sm:$0xff]  ;;  %v557_v10 = vld [vmem:[%s4034_s10 + $0x7a8] sm:$0xff] }
  0xfd   : > { %1348 = vadd.xlane.f32.xlu1 %v1347_v15  ;;  %v1354_v34 = vadd.f32 %v1353_v21, %v937_v38  ;;  %v1365_v31 = vadd.f32 %v1364_v14, %v946_v12  ;;  %v954_v44 = vmul.f32 %v4072_v22, %v538_v27  ;;  %v955_v46 = vmul.f32 %v4074_v23, %v539_v13  ;;  %v558_v13 = vld [vmem:[%s4034_s10 + $0x7b0] sm:$0xff] }
  0xfe   : > { %v1360_v39 = vadd.f32 %v1359_v28, %v942_v62  ;;  %v1371_v42 = vadd.f32 %v951_v29, %v950_v30  ;;  %v956_v43 = vmul.f32 %v4062_v16, %v540_v33  ;;  %v957_v49 = vmul.f32 %v4064_v17, %v541_v25  ;;  %v559_v33 = vld [vmem:[%s4034_s10 + $0x7b8] sm:$0xff]  ;;  %v560_v25 = vld [vmem:[%s4034_s10 + $0x7c0] sm:$0xff]  ;;  %v561_v28 = vld [vmem:[%s4034_s10 + $0x7c8] sm:$0xff] }
  0xff   : > { %1355 = vadd.xlane.f32.xlu0 %v1354_v34  ;;  %v1366_v38 = vadd.f32 %v1365_v31, %v947_v11  ;;  %v958_v45 = vmul.f32 %v4066_v18, %v542_v41  ;;  %v959_v55 = vmul.f32 %v4068_v19, %v543_v36  ;;  %v960_v58 = vmul.f32 %v4072_v22, %v544_v32  ;;  %v562_v41 = vld [vmem:[%s4034_s10 + $0x7d0] sm:$0xff]  ;;  %v563_v36 = vld [vmem:[%s4034_s10 + $0x7d8] sm:$0xff] }
 0x100   : > { %v1361_v53 = vadd.f32 %v1360_v39, %v943_v61  ;;  %v1372_v54 = vadd.f32 %v1371_v42, %v952_v37  ;;  %v961_v50 = vmul.f32 %v4074_v23, %v545_v35  ;;  %v1378_v62 = vadd.f32 %v957_v49, %v956_v43  ;;  %v564_v35 = vld [vmem:[%s4034_s10 + $0x7e0] sm:$0xff]  ;;  %v565_v39 = vld [vmem:[%s4034_s10 + $0x7e8] sm:$0xff] }
 0x101   : > { %v1367_v60 = vadd.f32 %v1366_v38, %v948_v24  ;;  %v962_v57 = vmul.f32 %v4062_v16, %v546_v47  ;;  %v963_v4 = vmul.f32 %v4064_v17, %v547_v52  ;;  %v964_v8 = vmul.f32 %v4066_v18, %v548_v48  ;;  %v566_v52 = vld [vmem:[%s4034_s10 + $0x7f0] sm:$0xff]  ;;  %v567_v48 = vld [vmem:[%s4034_s10 + $0x7f8] sm:$0xff] }
 0x102   : > { %1362 = vadd.xlane.f32.xlu1 %v1361_v53  ;;  %v1373_v61 = vadd.f32 %v1372_v54, %v953_v40  ;;  %v1379_v3 = vadd.f32 %v1378_v62, %v958_v45  ;;  %v965_v63 = vmul.f32 %v4068_v19, %v549_v59  ;;  %v966_v12 = vmul.f32 %v4072_v22, %v550_v51  ;;  %v569_v59 = vld [vmem:[%s4034_s10 + $0x808] sm:$0xff] }
 0x103   : > { %v1368_v7 = vadd.f32 %v1367_v60, %v949_v26  ;;  %v967_v11 = vmul.f32 %v4074_v23, %v551_v1  ;;  %v1385_v24 = vadd.f32 %v963_v4, %v962_v57  ;;  %v968_v27 = vmul.f32 %v4062_v16, %v552_v56  ;;  %v570_v1 = vld [vmem:[%s4034_s10 + $0x810] sm:$0xff]  ;;  %v571_v56 = vld [vmem:[%s4034_s10 + $0x818] sm:$0xff]  ;;  %v572_v60 = vld [vmem:[%s4034_s10 + $0x820] sm:$0xff] }
 0x104   : > { %v1374_v15 = vadd.f32 %v1373_v61, %v954_v44  ;;  %v1380_v21 = vadd.f32 %v1379_v3, %v959_v55  ;;  %v969_v14 = vmul.f32 %v4064_v17, %v553_v9  ;;  %v970_v30 = vmul.f32 %v4066_v18, %v554_v0  ;;  %v573_v9 = vld [vmem:[%s4034_s10 + $0x828] sm:$0xff]  ;;  %v574_v0 = vld [vmem:[%s4034_s10 + $0x830] sm:$0xff] }
 0x105   : > { %1369 = vadd.xlane.f32.xlu0 %v1368_v7  ;;  %v1386_v26 = vadd.f32 %v1385_v24, %v964_v8  ;;  %v971_v29 = vmul.f32 %v4068_v19, %v555_v20  ;;  %v972_v37 = vmul.f32 %v4072_v22, %v556_v5  ;;  %v973_v40 = vmul.f32 %v4074_v23, %v557_v10  ;;  %v575_v20 = vld [vmem:[%s4034_s10 + $0x838] sm:$0xff]  ;;  %v576_v5 = vld [vmem:[%s4034_s10 + $0x840] sm:$0xff] }
 0x106   : > { %v1375_v32 = vadd.f32 %v1374_v15, %v955_v46  ;;  %v1381_v34 = vadd.f32 %v1380_v21, %v960_v58  ;;  %v1392_v31 = vadd.f32 %v969_v14, %v968_v27  ;;  %v974_v44 = vmul.f32 %v4062_v16, %v558_v13  ;;  %v568_v46 = vld [vmem:[%s4034_s10 + $0x800] sm:$0xff]  ;;  %v577_v13 = vld [vmem:[%s4034_s10 + $0x848] sm:$0xff]  ;;  %v578_v15 = vld [vmem:[%s4034_s10 + $0x850] sm:$0xff] }
 0x107   : > { %v1387_v42 = vadd.f32 %v1386_v26, %v965_v63  ;;  %v975_v43 = vmul.f32 %v4064_v17, %v559_v33  ;;  %v976_v49 = vmul.f32 %v4066_v18, %v560_v25  ;;  %v977_v47 = vmul.f32 %v4068_v19, %v561_v28  ;;  %v579_v33 = vld [vmem:[%s4034_s10 + $0x858] sm:$0xff]  ;;  %v580_v25 = vld [vmem:[%s4034_s10 + $0x860] sm:$0xff]  ;;  %v581_v28 = vld [vmem:[%s4034_s10 + $0x868] sm:$0xff] }
 0x108   : > { %1376 = vadd.xlane.f32.xlu1 %v1375_v32  ;;  %v1382_v38 = vadd.f32 %v1381_v34, %v961_v50  ;;  %v1393_v45 = vadd.f32 %v1392_v31, %v970_v30  ;;  %v978_v55 = vmul.f32 %v4072_v22, %v562_v41  ;;  %v979_v58 = vmul.f32 %v4074_v23, %v563_v36  ;;  %v582_v36 = vld [vmem:[%s4034_s10 + $0x870] sm:$0xff] }
 0x109   : > { %v1388_v51 = vadd.f32 %v1387_v42, %v966_v12  ;;  %v1399_v53 = vadd.f32 %v975_v43, %v974_v44  ;;  %v980_v54 = vmul.f32 %v4062_v16, %v564_v35  ;;  %v981_v62 = vmul.f32 %v4064_v17, %v565_v39  ;;  %v583_v35 = vld [vmem:[%s4034_s10 + $0x878] sm:$0xff]  ;;  %v584_v39 = vld [vmem:[%s4034_s10 + $0x880] sm:$0xff]  ;;  %v585_v42 = vld [vmem:[%s4034_s10 + $0x888] sm:$0xff] }
 0x10a   : > { %1383 = vadd.xlane.f32.xlu0 %v1382_v38  ;;  %v1394_v50 = vadd.f32 %v1393_v45, %v971_v29  ;;  %v982_v57 = vmul.f32 %v4066_v18, %v566_v52  ;;  %v983_v4 = vmul.f32 %v4068_v19, %v567_v48  ;;  %v984_v8 = vmul.f32 %v4072_v22, %v568_v46  ;;  %v586_v52 = vld [vmem:[%s4034_s10 + $0x890] sm:$0xff]  ;;  %v587_v48 = vld [vmem:[%s4034_s10 + $0x898] sm:$0xff] }
 0x10b   : > { %v1389_v61 = vadd.f32 %v1388_v51, %v967_v11  ;;  %v1400_v3 = vadd.f32 %v1399_v53, %v976_v49  ;;  %v985_v63 = vmul.f32 %v4074_v23, %v569_v59  ;;  %v1406_v12 = vadd.f32 %v981_v62, %v980_v54  ;;  %v588_v59 = vld [vmem:[%s4034_s10 + $0x8a0] sm:$0xff]  ;;  %v589_v51 = vld [vmem:[%s4034_s10 + $0x8a8] sm:$0xff] }
 0x10c   : > { %v1395_v10 = vadd.f32 %v1394_v50, %v972_v37  ;;  %v986_v7 = vmul.f32 %v4062_v16, %v570_v1  ;;  %v987_v24 = vmul.f32 %v4064_v17, %v571_v56  ;;  %v988_v27 = vmul.f32 %v4066_v18, %v572_v60  ;;  %v590_v56 = vld [vmem:[%s4034_s10 + $0x8b0] sm:$0xff]  ;;  %v591_v60 = vld [vmem:[%s4034_s10 + $0x8b8] sm:$0xff] }
 0x10d   : > { %1390 = vadd.xlane.f32.xlu1 %v1389_v61  ;;  %v1401_v11 = vadd.f32 %v1400_v3, %v977_v47  ;;  %v1407_v21 = vadd.f32 %v1406_v12, %v982_v57  ;;  %v989_v14 = vmul.f32 %v4068_v19, %v573_v9  ;;  %v990_v30 = vmul.f32 %v4072_v22, %v574_v0  ;;  %v593_v9 = vld [vmem:[%s4034_s10 + $0x8c8] sm:$0xff] }
 0x10e   : > { %v1396_v26 = vadd.f32 %v1395_v10, %v973_v40  ;;  %v991_v29 = vmul.f32 %v4074_v23, %v575_v20  ;;  %v1413_v37 = vadd.f32 %v987_v24, %v986_v7  ;;  %v992_v41 = vmul.f32 %v4062_v16, %v576_v5  ;;  %v594_v20 = vld [vmem:[%s4034_s10 + $0x8d0] sm:$0xff]  ;;  %v595_v5 = vld [vmem:[%s4034_s10 + $0x8d8] sm:$0xff]  ;;  %v596_v10 = vld [vmem:[%s4034_s10 + $0x8e0] sm:$0xff] }
 0x10f   : > { %v1402_v32 = vadd.f32 %v1401_v11, %v978_v55  ;;  %v1408_v34 = vadd.f32 %v1407_v21, %v983_v4  ;;  %v993_v31 = vmul.f32 %v4064_v17, %v577_v13  ;;  %v994_v44 = vmul.f32 %v4066_v18, %v578_v15  ;;  %v597_v13 = vld [vmem:[%s4034_s10 + $0x8e8] sm:$0xff]  ;;  %v598_v15 = vld [vmem:[%s4034_s10 + $0x8f0] sm:$0xff] }
 0x110   : > { %1397 = vadd.xlane.f32.xlu0 %v1396_v26  ;;  %v1414_v40 = vadd.f32 %v1413_v37, %v988_v27  ;;  %v995_v43 = vmul.f32 %v4068_v19, %v579_v33  ;;  %v996_v49 = vmul.f32 %v4072_v22, %v580_v25  ;;  %v997_v47 = vmul.f32 %v4074_v23, %v581_v28  ;;  %v599_v33 = vld [vmem:[%s4034_s10 + $0x8f8] sm:$0xff]  ;;  %v600_v25 = vld [vmem:[%s4034_s10 + $0x900] sm:$0xff] }
 0x111   : > { %v1403_v46 = vadd.f32 %v1402_v32, %v979_v58  ;;  %v1409_v38 = vadd.f32 %v1408_v34, %v984_v8  ;;  %v1420_v45 = vadd.f32 %v993_v31, %v992_v41  ;;  %v998_v55 = vmul.f32 %v4062_v16, %v582_v36  ;;  %v592_v58 = vld [vmem:[%s4034_s10 + $0x8c0] sm:$0xff]  ;;  %v601_v36 = vld [vmem:[%s4034_s10 + $0x908] sm:$0xff]  ;;  %v602_v32 = vld [vmem:[%s4034_s10 + $0x910] sm:$0xff] }
 0x112   : > { %v1415_v53 = vadd.f32 %v1414_v40, %v989_v14  ;;  %v999_v54 = vmul.f32 %v4064_v17, %v583_v35  ;;  %v1000_v62 = vmul.f32 %v4066_v18, %v584_v39  ;;  %v1001_v1 = vmul.f32 %v4068_v19, %v585_v42  ;;  %v603_v35 = vld [vmem:[%s4034_s10 + $0x918] sm:$0xff]  ;;  %v604_v39 = vld [vmem:[%s4034_s10 + $0x920] sm:$0xff]  ;;  %v605_v42 = vld [vmem:[%s4034_s10 + $0x928] sm:$0xff] }
 0x113   : > { %1404 = vadd.xlane.f32.xlu1 %v1403_v46  ;;  %v1410_v50 = vadd.f32 %v1409_v38, %v985_v63  ;;  %v1421_v57 = vadd.f32 %v1420_v45, %v994_v44  ;;  %v1002_v4 = vmul.f32 %v4072_v22, %v586_v52  ;;  %v1003_v8 = vmul.f32 %v4074_v23, %v587_v48  ;;  %v606_v48 = vld [vmem:[%s4034_s10 + $0x930] sm:$0xff] }
 0x114   : > { %v1416_v0 = vadd.f32 %v1415_v53, %v990_v30  ;;  %v1427_v61 = vadd.f32 %v999_v54, %v998_v55  ;;  %v1004_v3 = vmul.f32 %v4062_v16, %v588_v59  ;;  %v1005_v12 = vmul.f32 %v4064_v17, %v589_v51  ;;  %v607_v59 = vld [vmem:[%s4034_s10 + $0x938] sm:$0xff]  ;;  %v608_v51 = vld [vmem:[%s4034_s10 + $0x940] sm:$0xff]  ;;  %v609_v53 = vld [vmem:[%s4034_s10 + $0x948] sm:$0xff] }
 0x115   : > { %1411 = vadd.xlane.f32.xlu0 %v1410_v50  ;;  %v1422_v63 = vadd.f32 %v1421_v57, %v995_v43  ;;  %v1006_v7 = vmul.f32 %v4066_v18, %v590_v56  ;;  %v1007_v24 = vmul.f32 %v4068_v19, %v591_v60  ;;  %v1008_v27 = vmul.f32 %v4072_v22, %v592_v58  ;;  %v610_v56 = vld [vmem:[%s4034_s10 + $0x950] sm:$0xff]  ;;  %v611_v60 = vld [vmem:[%s4034_s10 + $0x958] sm:$0xff] }
 0x116   : > { %v1417_v11 = vadd.f32 %v1416_v0, %v991_v29  ;;  %v1428_v21 = vadd.f32 %v1427_v61, %v1000_v62  ;;  %v1009_v14 = vmul.f32 %v4074_v23, %v593_v9  ;;  %v1434_v30 = vadd.f32 %v1005_v12, %v1004_v3  ;;  %v612_v9 = vld [vmem:[%s4034_s10 + $0x960] sm:$0xff]  ;;  %v613_v0 = vld [vmem:[%s4034_s10 + $0x968] sm:$0xff] }
 0x117   : > { %v1423_v28 = vadd.f32 %v1422_v63, %v996_v49  ;;  %v1010_v26 = vmul.f32 %v4062_v16, %v594_v20  ;;  %v1011_v37 = vmul.f32 %v4064_v17, %v595_v5  ;;  %v1012_v41 = vmul.f32 %v4066_v18, %v596_v10  ;;  %v614_v5 = vld [vmem:[%s4034_s10 + $0x970] sm:$0xff]  ;;  %v615_v10 = vld [vmem:[%s4034_s10 + $0x978] sm:$0xff] }
 0x118   : > { %1418 = vadd.xlane.f32.xlu1 %v1417_v11  ;;  %v1429_v29 = vadd.f32 %v1428_v21, %v1001_v1  ;;  %v1435_v34 = vadd.f32 %v1434_v30, %v1006_v7  ;;  %v1013_v31 = vmul.f32 %v4068_v19, %v597_v13  ;;  %v1014_v44 = vmul.f32 %v4072_v22, %v598_v15  ;;  %v617_v13 = vld [vmem:[%s4034_s10 + $0x988] sm:$0xff] }
 0x119   : > { %v1424_v40 = vadd.f32 %v1423_v28, %v997_v47  ;;  %v1015_v43 = vmul.f32 %v4074_v23, %v599_v33  ;;  %v1441_v49 = vadd.f32 %v1011_v37, %v1010_v26  ;;  %v1016_v52 = vmul.f32 %v4062_v16, %v600_v25  ;;  %v618_v33 = vld [vmem:[%s4034_s10 + $0x990] sm:$0xff]  ;;  %v619_v25 = vld [vmem:[%s4034_s10 + $0x998] sm:$0xff]  ;;  %v620_v28 = vld [vmem:[%s4034_s10 + $0x9a0] sm:$0xff] }
 0x11a   : > { %v1430_v46 = vadd.f32 %v1429_v29, %v1002_v4  ;;  %v1436_v38 = vadd.f32 %v1435_v34, %v1007_v24  ;;  %v1017_v45 = vmul.f32 %v4064_v17, %v601_v36  ;;  %v1018_v55 = vmul.f32 %v4066_v18, %v602_v32  ;;  %v621_v36 = vld [vmem:[%s4034_s10 + $0x9a8] sm:$0xff]  ;;  %v622_v32 = vld [vmem:[%s4034_s10 + $0x9b0] sm:$0xff] }
 0x11b   : > { %1425 = vadd.xlane.f32.xlu0 %v1424_v40  ;;  %v1442_v47 = vadd.f32 %v1441_v49, %v1012_v41  ;;  %v1019_v54 = vmul.f32 %v4068_v19, %v603_v35  ;;  %v1020_v62 = vmul.f32 %v4072_v22, %v604_v39  ;;  %v1021_v1 = vmul.f32 %v4074_v23, %v605_v42  ;;  %v623_v35 = vld [vmem:[%s4034_s10 + $0x9b8] sm:$0xff]  ;;  %v624_v39 = vld [vmem:[%s4034_s10 + $0x9c0] sm:$0xff] }
 0x11c   : > { %v1431_v58 = vadd.f32 %v1430_v46, %v1003_v8  ;;  %v1437_v50 = vadd.f32 %v1436_v38, %v1008_v27  ;;  %v1448_v57 = vadd.f32 %v1017_v45, %v1016_v52  ;;  %v1022_v4 = vmul.f32 %v4062_v16, %v606_v48  ;;  %v616_v8 = vld [vmem:[%s4034_s10 + $0x980] sm:$0xff]  ;;  %v625_v48 = vld [vmem:[%s4034_s10 + $0x9c8] sm:$0xff]  ;;  %v626_v46 = vld [vmem:[%s4034_s10 + $0x9d0] sm:$0xff] }
 0x11d   : > { %v1443_v61 = vadd.f32 %v1442_v47, %v1013_v31  ;;  %v1023_v3 = vmul.f32 %v4064_v17, %v607_v59  ;;  %v1024_v12 = vmul.f32 %v4066_v18, %v608_v51  ;;  %v1025_v20 = vmul.f32 %v4068_v19, %v609_v53  ;;  %v627_v59 = vld [vmem:[%s4034_s10 + $0x9d8] sm:$0xff]  ;;  %v628_v51 = vld [vmem:[%s4034_s10 + $0x9e0] sm:$0xff]  ;;  %v629_v53 = vld [vmem:[%s4034_s10 + $0x9e8] sm:$0xff] }
 0x11e   : > { %1432 = vadd.xlane.f32.xlu1 %v1431_v58  ;;  %v1438_v63 = vadd.f32 %v1437_v50, %v1009_v14  ;;  %v1449_v7 = vadd.f32 %v1448_v57, %v1018_v55  ;;  %v1026_v24 = vmul.f32 %v4072_v22, %v610_v56  ;;  %v1027_v27 = vmul.f32 %v4074_v23, %v611_v60  ;;  %v630_v60 = vld [vmem:[%s4034_s10 + $0x9f0] sm:$0xff] }
 0x11f   : > { %v1444_v15 = vadd.f32 %v1443_v61, %v1014_v44  ;;  %v1455_v11 = vadd.f32 %v1023_v3, %v1022_v4  ;;  %v1028_v21 = vmul.f32 %v4062_v16, %v612_v9  ;;  %v1029_v30 = vmul.f32 %v4064_v17, %v613_v0  ;;  %v631_v9 = vld [vmem:[%s4034_s10 + $0x9f8] sm:$0xff]  ;;  %v632_v0 = vld [vmem:[%s4034_s10 + $0xa00] sm:$0xff]  ;;  %v633_v61 = vld [vmem:[%s4034_s10 + $0xa08] sm:$0xff] }
 0x120   : > { %1439 = vadd.xlane.f32.xlu0 %v1438_v63  ;;  %v1450_v14 = vadd.f32 %v1449_v7, %v1019_v54  ;;  %v1030_v26 = vmul.f32 %v4066_v18, %v614_v5  ;;  %v1031_v37 = vmul.f32 %v4068_v19, %v615_v10  ;;  %v1032_v41 = vmul.f32 %v4072_v22, %v616_v8  ;;  %v634_v5 = vld [vmem:[%s4034_s10 + $0xa10] sm:$0xff]  ;;  %v635_v10 = vld [vmem:[%s4034_s10 + $0xa18] sm:$0xff] }
 0x121   : > { %v1445_v29 = vadd.f32 %v1444_v15, %v1015_v43  ;;  %v1456_v34 = vadd.f32 %v1455_v11, %v1024_v12  ;;  %v1033_v31 = vmul.f32 %v4074_v23, %v617_v13  ;;  %v1462_v44 = vadd.f32 %v1029_v30, %v1028_v21  ;;  %v636_v13 = vld [vmem:[%s4034_s10 + $0xa20] sm:$0xff]  ;;  %v637_v15 = vld [vmem:[%s4034_s10 + $0xa28] sm:$0xff] }
 0x122   : > { %v1451_v42 = vadd.f32 %v1450_v14, %v1020_v62  ;;  %v1034_v40 = vmul.f32 %v4062_v16, %v618_v33  ;;  %v1035_v49 = vmul.f32 %v4064_v17, %v619_v25  ;;  %v1036_v52 = vmul.f32 %v4066_v18, %v620_v28  ;;  %v638_v25 = vld [vmem:[%s4034_s10 + $0xa30] sm:$0xff]  ;;  %v639_v28 = vld [vmem:[%s4034_s10 + $0xa38] sm:$0xff] }
 0x123   : > { %1446 = vadd.xlane.f32.xlu1 %v1445_v29  ;;  %v1457_v43 = vadd.f32 %v1456_v34, %v1025_v20  ;;  %v1463_v38 = vadd.f32 %v1462_v44, %v1030_v26  ;;  %v1037_v45 = vmul.f32 %v4068_v19, %v621_v36  ;;  %v1038_v55 = vmul.f32 %v4072_v22, %v622_v32  ;;  %v641_v36 = vld [vmem:[%s4034_s10 + $0xa48] sm:$0xff] }
 0x124   : > { %v1452_v47 = vadd.f32 %v1451_v42, %v1021_v1  ;;  %v1039_v54 = vmul.f32 %v4074_v23, %v623_v35  ;;  %v1469_v62 = vadd.f32 %v1035_v49, %v1034_v40  ;;  %v1040_v56 = vmul.f32 %v4062_v16, %v624_v39  ;;  %v642_v35 = vld [vmem:[%s4034_s10 + $0xa50] sm:$0xff]  ;;  %v643_v39 = vld [vmem:[%s4034_s10 + $0xa58] sm:$0xff]  ;;  %v644_v42 = vld [vmem:[%s4034_s10 + $0xa60] sm:$0xff] }
 0x125   : > { %v1458_v58 = vadd.f32 %v1457_v43, %v1026_v24  ;;  %v1464_v50 = vadd.f32 %v1463_v38, %v1031_v37  ;;  %v1041_v57 = vmul.f32 %v4064_v17, %v625_v48  ;;  %v1042_v4 = vmul.f32 %v4066_v18, %v626_v46  ;;  %v645_v48 = vld [vmem:[%s4034_s10 + $0xa68] sm:$0xff]  ;;  %v646_v46 = vld [vmem:[%s4034_s10 + $0xa70] sm:$0xff] }
 0x126   : > { %1453 = vadd.xlane.f32.xlu0 %v1452_v47  ;;  %v1470_v1 = vadd.f32 %v1469_v62, %v1036_v52  ;;  %v1043_v3 = vmul.f32 %v4068_v19, %v627_v59  ;;  %v1044_v12 = vmul.f32 %v4072_v22, %v628_v51  ;;  %v1045_v20 = vmul.f32 %v4074_v23, %v629_v53  ;;  %v647_v59 = vld [vmem:[%s4034_s10 + $0xa78] sm:$0xff]  ;;  %v648_v51 = vld [vmem:[%s4034_s10 + $0xa80] sm:$0xff] }
 0x127   : > { %v1459_v8 = vadd.f32 %v1458_v58, %v1027_v27  ;;  %v1465_v63 = vadd.f32 %v1464_v50, %v1032_v41  ;;  %v1476_v7 = vadd.f32 %v1041_v57, %v1040_v56  ;;  %v1046_v24 = vmul.f32 %v4062_v16, %v630_v60  ;;  %v640_v27 = vld [vmem:[%s4034_s10 + $0xa40] sm:$0xff]  ;;  %v649_v60 = vld [vmem:[%s4034_s10 + $0xa88] sm:$0xff]  ;;  %v650_v58 = vld [vmem:[%s4034_s10 + $0xa90] sm:$0xff] }
 0x128   : > { %v1471_v11 = vadd.f32 %v1470_v1, %v1037_v45  ;;  %v1047_v21 = vmul.f32 %v4064_v17, %v631_v9  ;;  %v1048_v30 = vmul.f32 %v4066_v18, %v632_v0  ;;  %v1049_v33 = vmul.f32 %v4068_v19, %v633_v61  ;;  %v651_v9 = vld [vmem:[%s4034_s10 + $0xa98] sm:$0xff]  ;;  %v652_v0 = vld [vmem:[%s4034_s10 + $0xaa0] sm:$0xff]  ;;  %v653_v61 = vld [vmem:[%s4034_s10 + $0xaa8] sm:$0xff] }
 0x129   : > { %1460 = vadd.xlane.f32.xlu1 %v1459_v8  ;;  %v1466_v14 = vadd.f32 %v1465_v63, %v1033_v31  ;;  %v1477_v26 = vadd.f32 %v1476_v7, %v1042_v4  ;;  %v1050_v37 = vmul.f32 %v4072_v22, %v634_v5  ;;  %v1051_v41 = vmul.f32 %v4074_v23, %v635_v10  ;;  %v654_v10 = vld [vmem:[%s4034_s10 + $0xab0] sm:$0xff] }
 0x12a   : > { %v1472_v32 = vadd.f32 %v1471_v11, %v1038_v55  ;;  %v1483_v29 = vadd.f32 %v1047_v21, %v1046_v24  ;;  %v1052_v34 = vmul.f32 %v4062_v16, %v636_v13  ;;  %v1053_v44 = vmul.f32 %v4064_v17, %v637_v15  ;;  %v655_v13 = vld [vmem:[%s4034_s10 + $0xab8] sm:$0xff]  ;;  %v656_v15 = vld [vmem:[%s4034_s10 + $0xac0] sm:$0xff]  ;;  %v657_v11 = vld [vmem:[%s4034_s10 + $0xac8] sm:$0xff] }
 0x12b   : > { %1467 = vadd.xlane.f32.xlu0 %v1466_v14  ;;  %v1478_v31 = vadd.f32 %v1477_v26, %v1043_v3  ;;  %v1054_v40 = vmul.f32 %v4066_v18, %v638_v25  ;;  %v1055_v49 = vmul.f32 %v4068_v19, %v639_v28  ;;  %v1056_v52 = vmul.f32 %v4072_v22, %v640_v27  ;;  %v658_v25 = vld [vmem:[%s4034_s10 + $0xad0] sm:$0xff]  ;;  %v659_v28 = vld [vmem:[%s4034_s10 + $0xad8] sm:$0xff] }
 0x12c   : > { %v1473_v43 = vadd.f32 %v1472_v32, %v1039_v54  ;;  %v1484_v38 = vadd.f32 %v1483_v29, %v1048_v30  ;;  %v1057_v45 = vmul.f32 %v4074_v23, %v641_v36  ;;  %v1490_v55 = vadd.f32 %v1053_v44, %v1052_v34  ;;  %v660_v36 = vld [vmem:[%s4034_s10 + $0xae0] sm:$0xff]  ;;  %v661_v32 = vld [vmem:[%s4034_s10 + $0xae8] sm:$0xff] }
 0x12d   : > { %v1479_v53 = vadd.f32 %v1478_v31, %v1044_v12  ;;  %v1058_v47 = vmul.f32 %v4062_v16, %v642_v35  ;;  %v1059_v62 = vmul.f32 %v4064_v17, %v643_v39  ;;  %v1060_v56 = vmul.f32 %v4066_v18, %v644_v42  ;;  %v662_v39 = vld [vmem:[%s4034_s10 + $0xaf0] sm:$0xff]  ;;  %v663_v42 = vld [vmem:[%s4034_s10 + $0xaf8] sm:$0xff] }
 0x12e   : > { %1474 = vadd.xlane.f32.xlu1 %v1473_v43  ;;  %v1485_v54 = vadd.f32 %v1484_v38, %v1049_v33  ;;  %v1491_v50 = vadd.f32 %v1490_v55, %v1054_v40  ;;  %v1061_v57 = vmul.f32 %v4068_v19, %v645_v48  ;;  %v1062_v4 = vmul.f32 %v4072_v22, %v646_v46  ;;  %v665_v48 = vld [vmem:[%s4034_s10 + $0xb08] sm:$0xff] }
 0x12f   : > { %v1480_v1 = vadd.f32 %v1479_v53, %v1045_v20  ;;  %v1063_v3 = vmul.f32 %v4074_v23, %v647_v59  ;;  %v1497_v12 = vadd.f32 %v1059_v62, %v1058_v47  ;;  %v1064_v5 = vmul.f32 %v4062_v16, %v648_v51  ;;  %v666_v59 = vld [vmem:[%s4034_s10 + $0xb10] sm:$0xff]  ;;  %v667_v51 = vld [vmem:[%s4034_s10 + $0xb18] sm:$0xff]  ;;  %v668_v53 = vld [vmem:[%s4034_s10 + $0xb20] sm:$0xff] }
 0x130   : > { %v1486_v8 = vadd.f32 %v1485_v54, %v1050_v37  ;;  %v1492_v63 = vadd.f32 %v1491_v50, %v1055_v49  ;;  %v1065_v7 = vmul.f32 %v4064_v17, %v649_v60  ;;  %v1066_v24 = vmul.f32 %v4066_v18, %v650_v58  ;;  %v669_v60 = vld [vmem:[%s4034_s10 + $0xb28] sm:$0xff]  ;;  %v670_v58 = vld [vmem:[%s4034_s10 + $0xb30] sm:$0xff] }
 0x131   : > { %1481 = vadd.xlane.f32.xlu0 %v1480_v1  ;;  %v1498_v20 = vadd.f32 %v1497_v12, %v1060_v56  ;;  %v1067_v21 = vmul.f32 %v4068_v19, %v651_v9  ;;  %v1068_v30 = vmul.f32 %v4072_v22, %v652_v0  ;;  %v1069_v33 = vmul.f32 %v4074_v23, %v653_v61  ;;  %v671_v9 = vld [vmem:[%s4034_s10 + $0xb38] sm:$0xff]  ;;  %v672_v0 = vld [vmem:[%s4034_s10 + $0xb40] sm:$0xff] }
 0x132   : > { %v1487_v27 = vadd.f32 %v1486_v8, %v1051_v41  ;;  %v1493_v14 = vadd.f32 %v1492_v63, %v1056_v52  ;;  %v1504_v26 = vadd.f32 %v1065_v7, %v1064_v5  ;;  %v1070_v37 = vmul.f32 %v4062_v16, %v654_v10  ;;  %v664_v41 = vld [vmem:[%s4034_s10 + $0xb00] sm:$0xff]  ;;  %v673_v10 = vld [vmem:[%s4034_s10 + $0xb48] sm:$0xff]  ;;  %v674_v8 = vld [vmem:[%s4034_s10 + $0xb50] sm:$0xff] }
 0x133   : > { %v1499_v29 = vadd.f32 %v1498_v20, %v1061_v57  ;;  %v1071_v34 = vmul.f32 %v4064_v17, %v655_v13  ;;  %v1072_v44 = vmul.f32 %v4066_v18, %v656_v15  ;;  %v1073_v35 = vmul.f32 %v4068_v19, %v657_v11  ;;  %v675_v13 = vld [vmem:[%s4034_s10 + $0xb58] sm:$0xff]  ;;  %v676_v15 = vld [vmem:[%s4034_s10 + $0xb60] sm:$0xff]  ;;  %v677_v11 = vld [vmem:[%s4034_s10 + $0xb68] sm:$0xff] }
 0x134   : > { %1488 = vadd.xlane.f32.xlu1 %v1487_v27  ;;  %v1494_v31 = vadd.f32 %v1493_v14, %v1057_v45  ;;  %v1505_v40 = vadd.f32 %v1504_v26, %v1066_v24  ;;  %v1074_v49 = vmul.f32 %v4072_v22, %v658_v25  ;;  %v1075_v52 = vmul.f32 %v4074_v23, %v659_v28  ;;  %v678_v28 = vld [vmem:[%s4034_s10 + $0xb70] sm:$0xff] }
 0x135   : > { %v1500_v46 = vadd.f32 %v1499_v29, %v1062_v4  ;;  %v1511_v43 = vadd.f32 %v1071_v34, %v1070_v37  ;;  %v1076_v38 = vmul.f32 %v4062_v16, %v660_v36  ;;  %v1077_v55 = vmul.f32 %v4064_v17, %v661_v32  ;;  %v679_v36 = vld [vmem:[%s4034_s10 + $0xb78] sm:$0xff]  ;;  %v680_v32 = vld [vmem:[%s4034_s10 + $0xb80] sm:$0xff]  ;;  %v681_v29 = vld [vmem:[%s4034_s10 + $0xb88] sm:$0xff] }
 0x136   : > { %1495 = vadd.xlane.f32.xlu0 %v1494_v31  ;;  %v1506_v45 = vadd.f32 %v1505_v40, %v1067_v21  ;;  %v1078_v47 = vmul.f32 %v4066_v18, %v662_v39  ;;  %v1079_v62 = vmul.f32 %v4068_v19, %v663_v42  ;;  %v1080_v56 = vmul.f32 %v4072_v22, %v664_v41  ;;  %v682_v39 = vld [vmem:[%s4034_s10 + $0xb90] sm:$0xff]  ;;  %v683_v42 = vld [vmem:[%s4034_s10 + $0xb98] sm:$0xff] }
 0x137   : > { %v1501_v54 = vadd.f32 %v1500_v46, %v1063_v3  ;;  %v1512_v50 = vadd.f32 %v1511_v43, %v1072_v44  ;;  %v1081_v57 = vmul.f32 %v4074_v23, %v665_v48  ;;  %v1518_v4 = vadd.f32 %v1077_v55, %v1076_v38  ;;  %v684_v48 = vld [vmem:[%s4034_s10 + $0xba0] sm:$0xff]  ;;  %v685_v46 = vld [vmem:[%s4034_s10 + $0xba8] sm:$0xff] }
 0x138   : > { %v1507_v61 = vadd.f32 %v1506_v45, %v1068_v30  ;;  %v1082_v1 = vmul.f32 %v4062_v16, %v666_v59  ;;  %v1083_v12 = vmul.f32 %v4064_v17, %v667_v51  ;;  %v1084_v5 = vmul.f32 %v4066_v18, %v668_v53  ;;  %v686_v51 = vld [vmem:[%s4034_s10 + $0xbb0] sm:$0xff]  ;;  %v687_v53 = vld [vmem:[%s4034_s10 + $0xbb8] sm:$0xff] }
 0x139   : > { %1502 = vadd.xlane.f32.xlu1 %v1501_v54  ;;  %v1513_v3 = vadd.f32 %v1512_v50, %v1073_v35  ;;  %v1519_v63 = vadd.f32 %v1518_v4, %v1078_v47  ;;  %v1085_v7 = vmul.f32 %v4068_v19, %v669_v60  ;;  %v1086_v24 = vmul.f32 %v4072_v22, %v670_v58  ;;  %v689_v60 = vld [vmem:[%s4034_s10 + $0xbc8] sm:$0xff] }
 0x13a   : > { %v1508_v20 = vadd.f32 %v1507_v61, %v1069_v33  ;;  %v1087_v21 = vmul.f32 %v4074_v23, %v671_v9  ;;  %v1525_v30 = vadd.f32 %v1083_v12, %v1082_v1  ;;  %v1088_v25 = vmul.f32 %v4062_v16, %v672_v0  ;;  %v690_v9 = vld [vmem:[%s4034_s10 + $0xbd0] sm:$0xff]  ;;  %v691_v0 = vld [vmem:[%s4034_s10 + $0xbd8] sm:$0xff]  ;;  %v692_v61 = vld [vmem:[%s4034_s10 + $0xbe0] sm:$0xff] }
 0x13b   : > { %v1514_v27 = vadd.f32 %v1513_v3, %v1074_v49  ;;  %v1520_v14 = vadd.f32 %v1519_v63, %v1079_v62  ;;  %v1089_v26 = vmul.f32 %v4064_v17, %v673_v10  ;;  %v1090_v37 = vmul.f32 %v4066_v18, %v674_v8  ;;  %v693_v10 = vld [vmem:[%s4034_s10 + $0xbe8] sm:$0xff]  ;;  %v694_v8 = vld [vmem:[%s4034_s10 + $0xbf0] sm:$0xff] }
 0x13c   : > { %1509 = vadd.xlane.f32.xlu0 %v1508_v20  ;;  %v1526_v33 = vadd.f32 %v1525_v30, %v1084_v5  ;;  %v1091_v34 = vmul.f32 %v4068_v19, %v675_v13  ;;  %v1092_v44 = vmul.f32 %v4072_v22, %v676_v15  ;;  %v1093_v35 = vmul.f32 %v4074_v23, %v677_v11  ;;  %v695_v13 = vld [vmem:[%s4034_s10 + $0xbf8] sm:$0xff] }
 0x13d   : > { %v1515_v41 = vadd.f32 %v1514_v27, %v1075_v52  ;;  %v1521_v31 = vadd.f32 %v1520_v14, %v1080_v56  ;;  %v1532_v40 = vadd.f32 %v1089_v26, %v1088_v25  ;;  %v1094_v49 = vmul.f32 %v4062_v16, %v678_v28  ;;  %v688_v52 = vld [vmem:[%s4034_s10 + $0xbc0] sm:$0xff]  ;;  %v1560_v25 = vld [vmem:[#allocation4] sm:$0xff] }
 0x13e   : > { %v1527_v43 = vadd.f32 %v1526_v33, %v1085_v7  ;;  %v1095_v38 = vmul.f32 %v4064_v17, %v679_v36  ;;  %v1096_v55 = vmul.f32 %v4066_v18, %v680_v32  ;;  %v1097_v59 = vmul.f32 %v4068_v19, %v681_v29 }
 0x13f   : > { %1516 = vadd.xlane.f32.xlu1 %v1515_v41  ;;  %v1522_v45 = vadd.f32 %v1521_v31, %v1081_v57  ;;  %v1533_v47 = vadd.f32 %v1532_v40, %v1090_v37  ;;  %v1098_v62 = vmul.f32 %v4072_v22, %v682_v39  ;;  %v1099_v56 = vmul.f32 %v4074_v23, %v683_v42 }
 0x140   : > { %v1528_v58 = vadd.f32 %v1527_v43, %v1086_v24  ;;  %v1539_v54 = vadd.f32 %v1095_v38, %v1094_v49  ;;  %v1100_v50 = vmul.f32 %v4062_v16, %v684_v48  ;;  %v1101_v4 = vmul.f32 %v4064_v17, %v685_v46 }
 0x141   : > { %1523 = vadd.xlane.f32.xlu0 %v1522_v45  ;;  %v1534_v57 = vadd.f32 %v1533_v47, %v1091_v34  ;;  %v1102_v1 = vmul.f32 %v4066_v18, %v686_v51  ;;  %v1103_v12 = vmul.f32 %v4068_v19, %v687_v53  ;;  %v1104_v5 = vmul.f32 %v4072_v22, %v688_v52 }
 0x142   : > { %v1529_v3 = vadd.f32 %v1528_v58, %v1087_v21  ;;  %v1540_v63 = vadd.f32 %v1539_v54, %v1096_v55  ;;  %v1105_v7 = vmul.f32 %v4074_v23, %v689_v60  ;;  %v1546_v24 = vadd.f32 %v1101_v4, %v1100_v50 }
 0x143   : > { %v1535_v15 = vadd.f32 %v1534_v57, %v1092_v44  ;;  %v1106_v11 = vmul.f32 %v4062_v16, %v690_v9  ;;  %v1107_v20 = vmul.f32 %v4064_v17, %v691_v0  ;;  %v1108_v30 = vmul.f32 %v4066_v18, %v692_v61 }
 0x144   : > { %1530 = vadd.xlane.f32.xlu1 %v1529_v3  ;;  %v1541_v28 = vadd.f32 %v1540_v63, %v1097_v59  ;;  %v1547_v27 = vadd.f32 %v1546_v24, %v1102_v1  ;;  %v1109_v14 = vmul.f32 %v4068_v19, %v693_v10  ;;  %v1110_v21 = vmul.f32 %v4072_v22, %v694_v8 }
 0x145   : > { %v1536_v26 = vadd.f32 %v1535_v15, %v1093_v35  ;;  %v1111_v37 = vmul.f32 %v4074_v23, %v695_v13  ;;  %v1553_v36 = vadd.f32 %v1107_v20, %v1106_v11  ;;  %v4837_v32 = vstv %s3516_s4 }
 0x146   : > { %v1542_v29 = vadd.f32 %v1541_v28, %v1098_v62  ;;  %v1548_v16 = vadd.f32 %v1547_v27, %v1103_v12  ;;  %v4841_v17 = vadd.s32 %v4837_v32, %v4045_v2  ;;  %v1692_v18 = vcombine.high %v1560_v25, %v1560_v25 }
 0x147   : > { %1537 = vadd.xlane.f32.xlu0 %v1536_v26  ;;  %v1554_v33 = vadd.f32 %v1553_v36, %v1108_v30  ;;  %v1565_v34 = vadd.s32 16, %v4045_v2  ;;  %v1564_v19 = vadd.s32 8, %v4045_v2  ;;  %v3807_v35 = vmov 1966171168   ;;  %v1118_v36 = vpop.xlane.xlu0 %1117 }
 0x148   : > { %v1543_v22 = vadd.f32 %v1542_v29, %v1099_v56  ;;  %v1549_v44 = vadd.f32 %v1548_v16, %v1104_v5  ;;  %v1694_v23 = vunpack.c.l.s4 %v3807_v35  ;;  %v1566_v39 = vadd.s32 24, %v4045_v2 }
 0x149   : > { %v1555_v42 = vadd.f32 %v1554_v33, %v1109_v14  ;;  %v4847_v41 = vadd.s32 %v4837_v32, %v1565_v34  ;;  %v4850_v31 = vadd.s32 %v4837_v32, %v1564_v19  ;;  %v1567_v40 = vadd.s32 32, %v4045_v2 }
 0x14a   : > { %1544 = vadd.xlane.f32.xlu1 %v1543_v22  ;;  %v1550_v49 = vadd.f32 %v1549_v44, %v1105_v7  ;;  %v1695_v48 = vunpack.c.0.s8 %v1694_v23  ;;  %v4854_v46 = vadd.s32 %v4837_v32, %v1566_v39  ;;  %v1568_v43 = vadd.s32 40, %v4045_v2 }
 0x14b   : > { %v1556_v38 = vadd.f32 %v1555_v42, %v1110_v21  ;;  %v4858_v55 = vadd.s32 %v4837_v32, %v1567_v40  ;;  %v1569_v59 = vadd.s32 48, %v4045_v2  ;;  %v1570_v51 = vadd.s32 56, %v4045_v2  ;;  %v1132_v42 = vpop.xlane.xlu1 %1131 }
 0x14c   : > { %1551 = vadd.xlane.f32.xlu0 %v1550_v49  ;;  %v1698_v53 = vsub.s32 %v1695_v48, %v4045_v2  ;;  %v4864_v52 = vadd.s32 %v4837_v32, %v1568_v43  ;;  %v1571_v45 = vadd.s32 64, %v4045_v2  ;;  %v1572_v47 = vadd.s32 72, %v4045_v2 }
 0x14d   : > { %v1557_v62 = vadd.f32 %v1556_v38, %v1111_v37  ;;  %v4869_v56 = vadd.s32 %v4837_v32, %v1569_v59  ;;  %v4872_v60 = vadd.s32 %v4837_v32, %v1570_v51  ;;  %v1573_v58 = vadd.s32 80, %v4045_v2 }
 0x14e   : > { %v1699_v54 = vrot.slane %v1560_v25, %v1698_v53  ;;  %v1706_v50 = vrot.slane %v1692_v18, %v1698_v53  ;;  %v4876_v4 = vadd.s32 %v4837_v32, %v1571_v45  ;;  %v4879_v9 = vadd.s32 %v4837_v32, %v1572_v47 }
 0x14f   : > { %1558 = vadd.xlane.f32.xlu1 %v1557_v62  ;;  %v4882_v0 = vadd.s32 %v4837_v32, %v1573_v58  ;;  %v1574_v61 = vadd.s32 88, %v4045_v2  ;;  %v1575_v57 = vadd.s32 96, %v4045_v2  ;;  %v1576_v1 = vadd.s32 104, %v4045_v2 }
 0x150   : > { %v1707_v12 = vcombine.high %v1699_v54, %v1699_v54  ;;  %v1708_v5 = vcombine.high %v1706_v50, %v1706_v50  ;;  %v1715_v10 = vrot.slane %v1699_v54, %v1698_v53  ;;  %v1722_v8 = vrot.slane %v1706_v50, %v1698_v53 }
 0x151   : > { %v4888_v3 = vadd.s32 %v4837_v32, %v1574_v61  ;;  %v4891_v63 = vadd.s32 %v4837_v32, %v1575_v57  ;;  %v4894_v7 = vadd.s32 %v4837_v32, %v1576_v1  ;;  %v1577_v24 = vadd.s32 112, %v4045_v2 }
 0x152   : > { %v1729_v13 = vrot.slane %v1707_v12, %v1698_v53  ;;  %v1736_v15 = vrot.slane %v1708_v5, %v1698_v53  ;;  %v1737_v11 = vcombine.high %v1715_v10, %v1715_v10  ;;  %v1738_v20 = vcombine.high %v1722_v8, %v1722_v8  ;;  %v1125_v53 = vpop.xlane.xlu0 %1124 }
 0x153   : > { %v4898_v30 = vrot.slane %v1715_v10, %v4050_v6  ;;  %v4901_v25 = vrot.slane %v1722_v8, %v4050_v6  ;;  %v4904_v28 = vadd.s32 %v4837_v32, %v1577_v24  ;;  %v4907_v27 = vadd.s32 120, %v4045_v2  ;;  %v1139_v2 = vpop.xlane.xlu1 %1138 }
 0x154   : > { %v1739_v14 = vcombine.high %v1729_v13, %v1729_v13  ;;  %v1740_v21 = vcombine.high %v1736_v15, %v1736_v15  ;;  %v4910_v26 = vrot.slane %v1729_v13, %v4050_v6  ;;  %v4913_v37 = vrot.slane %v1737_v11, %v4050_v6 }
 0x155   : > { %v4916_v29 = vrot.slane %v1736_v15, %v4050_v6  ;;  %v4919_v16 = vrot.slane %v1738_v20, %v4050_v6  ;;  %vm1773_vm0 = vcmp.eq.s32.totalorder %v4898_v30, %v4841_v17  ;;  %vm2029_vm1 = vcmp.eq.s32.totalorder %v4901_v25, %v4841_v17 }
 0x156   : > { %v4926_v18 = vrot.slane %v1739_v14, %v4050_v6  ;;  %v4929_v33 = vrot.slane %v1740_v21, %v4050_v6  ;;  %vm1837_vm2 = vcmp.eq.s32.totalorder %v4910_v26, %v4841_v17  ;;  %vm1901_vm3 = vcmp.eq.s32.totalorder %v4913_v37, %v4841_v17 }
 0x157   : > { %vm2093_vm4 = vcmp.eq.s32.totalorder %v4916_v29, %v4841_v17  ;;  %vm2157_vm5 = vcmp.eq.s32.totalorder %v4919_v16, %v4841_v17  ;;  %v2285_v34 = vsel %vm1773_vm0, %v1118_v36, 0.0  ;;  %v2349_v19 = vsel %vm1837_vm2, %v1118_v36, 0.0 }
 0x158   : > { %vm1965_vm6 = vcmp.eq.s32.totalorder %v4926_v18, %v4841_v17  ;;  %vm2221_vm7 = vcmp.eq.s32.totalorder %v4929_v33, %v4841_v17  ;;  %v2413_v6 = vsel %vm1901_vm3, %v1118_v36, 0.0  ;;  %v2541_v22 = vsel %vm2029_vm1, %v1118_v36, 0.0 }
 0x159   : > { %v2477_v44 = vsel %vm1965_vm6, %v1118_v36, 0.0  ;;  %v2605_v35 = vsel %vm2093_vm4, %v1118_v36, 0.0  ;;  %v2669_v23 = vsel %vm2157_vm5, %v1118_v36, 0.0  ;;  %v2733_v39 = vsel %vm2221_vm7, %v1118_v36, 0.0 }
 0x15a   : > { %vm1775_vm8 = vcmp.eq.s32.totalorder %v4898_v30, %v4847_v41  ;;  %vm1839_vm9 = vcmp.eq.s32.totalorder %v4910_v26, %v4847_v41  ;;  %vm1903_vm10 = vcmp.eq.s32.totalorder %v4913_v37, %v4847_v41  ;;  %vm1967_vm11 = vcmp.eq.s32.totalorder %v4926_v18, %v4847_v41 }
 0x15b   : > { %vm2031_vm12 = vcmp.eq.s32.totalorder %v4901_v25, %v4847_v41  ;;  %vm2095_vm13 = vcmp.eq.s32.totalorder %v4916_v29, %v4847_v41  ;;  %vm2159_vm14 = vcmp.eq.s32.totalorder %v4919_v16, %v4847_v41  ;;  %vm2223_vm15 = vcmp.eq.s32.totalorder %v4929_v33, %v4847_v41 }
 0x15c   : > { %v2287_v17 = vsel %vm1775_vm8, %v1132_v42, 0.0  ;;  %v2351_v40 = vsel %vm1839_vm9, %v1132_v42, 0.0  ;;  %v2415_v49 = vsel %vm1903_vm10, %v1132_v42, 0.0  ;;  %v2479_v48 = vsel %vm1967_vm11, %v1132_v42, 0.0 }
 0x15d   : > { %v2543_v43 = vsel %vm2031_vm12, %v1132_v42, 0.0  ;;  %v2607_v38 = vsel %vm2095_vm13, %v1132_v42, 0.0  ;;  %v2671_v59 = vsel %vm2159_vm14, %v1132_v42, 0.0  ;;  %v2735_v51 = vsel %vm2223_vm15, %v1132_v42, 0.0 }
 0x15e   : > { %vm1774_vm0 = vcmp.eq.s32.totalorder %v4898_v30, %v4850_v31  ;;  %vm1838_vm1 = vcmp.eq.s32.totalorder %v4910_v26, %v4850_v31  ;;  %vm1902_vm2 = vcmp.eq.s32.totalorder %v4913_v37, %v4850_v31  ;;  %vm1966_vm3 = vcmp.eq.s32.totalorder %v4926_v18, %v4850_v31 }
 0x15f   : > { %vm2030_vm4 = vcmp.eq.s32.totalorder %v4901_v25, %v4850_v31  ;;  %vm2094_vm5 = vcmp.eq.s32.totalorder %v4916_v29, %v4850_v31  ;;  %vm2158_vm6 = vcmp.eq.s32.totalorder %v4919_v16, %v4850_v31  ;;  %vm2222_vm7 = vcmp.eq.s32.totalorder %v4929_v33, %v4850_v31 }
 0x160   : > { %v2286_v41 = vsel %vm1774_vm0, %v1125_v53, 0.0  ;;  %v2350_v45 = vsel %vm1838_vm1, %v1125_v53, 0.0  ;;  %v2414_v47 = vsel %vm1902_vm2, %v1125_v53, 0.0  ;;  %v2478_v62 = vsel %vm1966_vm3, %v1125_v53, 0.0 }
 0x161   : > { %v2542_v58 = vsel %vm2030_vm4, %v1125_v53, 0.0  ;;  %v2606_v54 = vsel %vm2094_vm5, %v1125_v53, 0.0  ;;  %v2670_v50 = vsel %vm2158_vm6, %v1125_v53, 0.0  ;;  %v2734_v61 = vsel %vm2222_vm7, %v1125_v53, 0.0  ;;  %v1146_v53 = vpop.xlane.xlu0 %1145 }
 0x162   : > { %v2798_v57 = vadd.f32 %v2286_v41, %v2285_v34  ;;  %v2867_v1 = vadd.f32 %v2350_v45, %v2349_v19  ;;  %v2936_v12 = vadd.f32 %v2414_v47, %v2413_v6  ;;  %v3005_v5 = vadd.f32 %v2478_v62, %v2477_v44 }
 0x163   : > { %v3074_v10 = vadd.f32 %v2542_v58, %v2541_v22  ;;  %v3143_v8 = vadd.f32 %v2606_v54, %v2605_v35  ;;  %v3212_v24 = vadd.f32 %v2670_v50, %v2669_v23  ;;  %v3281_v13 = vadd.f32 %v2734_v61, %v2733_v39 }
 0x164   : > { %v2799_v15 = vadd.f32 %v2798_v57, %v2287_v17  ;;  %v2868_v11 = vadd.f32 %v2867_v1, %v2351_v40  ;;  %v2937_v20 = vadd.f32 %v2936_v12, %v2415_v49  ;;  %v3006_v31 = vadd.f32 %v3005_v5, %v2479_v48 }
 0x165   : > { %v3075_v14 = vadd.f32 %v3074_v10, %v2543_v43  ;;  %v3144_v21 = vadd.f32 %v3143_v8, %v2607_v38  ;;  %v3213_v36 = vadd.f32 %v3212_v24, %v2671_v59  ;;  %v3282_v42 = vadd.f32 %v3281_v13, %v2735_v51  ;;  %v1153_v24 = vpop.xlane.xlu1 %1152 }
 0x166   : > { %vm1776_vm8 = vcmp.eq.s32.totalorder %v4898_v30, %v4854_v46  ;;  %vm1840_vm9 = vcmp.eq.s32.totalorder %v4910_v26, %v4854_v46  ;;  %vm1904_vm10 = vcmp.eq.s32.totalorder %v4913_v37, %v4854_v46  ;;  %vm1968_vm11 = vcmp.eq.s32.totalorder %v4926_v18, %v4854_v46 }
 0x167   : > { %vm2032_vm12 = vcmp.eq.s32.totalorder %v4901_v25, %v4854_v46  ;;  %vm2096_vm13 = vcmp.eq.s32.totalorder %v4916_v29, %v4854_v46  ;;  %vm2160_vm14 = vcmp.eq.s32.totalorder %v4919_v16, %v4854_v46  ;;  %vm2224_vm15 = vcmp.eq.s32.totalorder %v4929_v33, %v4854_v46 }
 0x168   : > { %v2288_v34 = vsel %vm1776_vm8, %v1139_v2, 0.0  ;;  %v2352_v19 = vsel %vm1840_vm9, %v1139_v2, 0.0  ;;  %v2416_v6 = vsel %vm1904_vm10, %v1139_v2, 0.0  ;;  %v2480_v22 = vsel %vm1968_vm11, %v1139_v2, 0.0 }
 0x169   : > { %v2544_v44 = vsel %vm2032_vm12, %v1139_v2, 0.0  ;;  %v2608_v35 = vsel %vm2096_vm13, %v1139_v2, 0.0  ;;  %v2672_v23 = vsel %vm2160_vm14, %v1139_v2, 0.0  ;;  %v2736_v39 = vsel %vm2224_vm15, %v1139_v2, 0.0 }
 0x16a   : > { %v2800_v17 = vadd.f32 %v2799_v15, %v2288_v34  ;;  %v2869_v40 = vadd.f32 %v2868_v11, %v2352_v19  ;;  %v2938_v49 = vadd.f32 %v2937_v20, %v2416_v6  ;;  %v3007_v48 = vadd.f32 %v3006_v31, %v2480_v22 }
 0x16b   : > { %v3076_v43 = vadd.f32 %v3075_v14, %v2544_v44  ;;  %v3145_v38 = vadd.f32 %v3144_v21, %v2608_v35  ;;  %v3214_v59 = vadd.f32 %v3213_v36, %v2672_v23  ;;  %v3283_v51 = vadd.f32 %v3282_v42, %v2736_v39  ;;  %v1160_v23 = vpop.xlane.xlu0 %1159 }
 0x16c   : > { %vm1777_vm0 = vcmp.eq.s32.totalorder %v4898_v30, %v4858_v55  ;;  %vm1841_vm1 = vcmp.eq.s32.totalorder %v4910_v26, %v4858_v55  ;;  %vm1905_vm2 = vcmp.eq.s32.totalorder %v4913_v37, %v4858_v55  ;;  %vm1969_vm3 = vcmp.eq.s32.totalorder %v4926_v18, %v4858_v55 }
 0x16d   : > { %vm2033_vm4 = vcmp.eq.s32.totalorder %v4901_v25, %v4858_v55  ;;  %vm2097_vm5 = vcmp.eq.s32.totalorder %v4916_v29, %v4858_v55  ;;  %vm2161_vm6 = vcmp.eq.s32.totalorder %v4919_v16, %v4858_v55  ;;  %vm2225_vm7 = vcmp.eq.s32.totalorder %v4929_v33, %v4858_v55 }
 0x16e   : > { %v2289_v2 = vsel %vm1777_vm0, %v1146_v53, 0.0  ;;  %v2353_v46 = vsel %vm1841_vm1, %v1146_v53, 0.0  ;;  %v2417_v41 = vsel %vm1905_vm2, %v1146_v53, 0.0  ;;  %v2481_v45 = vsel %vm1969_vm3, %v1146_v53, 0.0 }
 0x16f   : > { %v2545_v47 = vsel %vm2033_vm4, %v1146_v53, 0.0  ;;  %v2609_v62 = vsel %vm2097_vm5, %v1146_v53, 0.0  ;;  %v2673_v58 = vsel %vm2161_vm6, %v1146_v53, 0.0  ;;  %v2737_v54 = vsel %vm2225_vm7, %v1146_v53, 0.0 }
 0x170   : > { %v2801_v50 = vadd.f32 %v2800_v17, %v2289_v2  ;;  %v2870_v61 = vadd.f32 %v2869_v40, %v2353_v46  ;;  %v2939_v57 = vadd.f32 %v2938_v49, %v2417_v41  ;;  %v3008_v1 = vadd.f32 %v3007_v48, %v2481_v45 }
 0x171   : > { %v3077_v12 = vadd.f32 %v3076_v43, %v2545_v47  ;;  %v3146_v5 = vadd.f32 %v3145_v38, %v2609_v62  ;;  %v3215_v10 = vadd.f32 %v3214_v59, %v2673_v58  ;;  %v3284_v8 = vadd.f32 %v3283_v51, %v2737_v54  ;;  %v1167_v62 = vpop.xlane.xlu1 %1166 }
 0x172   : > { %vm1778_vm8 = vcmp.eq.s32.totalorder %v4898_v30, %v4864_v52  ;;  %vm1842_vm9 = vcmp.eq.s32.totalorder %v4910_v26, %v4864_v52  ;;  %vm1906_vm10 = vcmp.eq.s32.totalorder %v4913_v37, %v4864_v52  ;;  %vm1970_vm11 = vcmp.eq.s32.totalorder %v4926_v18, %v4864_v52 }
 0x173   : > { %vm2034_vm12 = vcmp.eq.s32.totalorder %v4901_v25, %v4864_v52  ;;  %vm2098_vm13 = vcmp.eq.s32.totalorder %v4916_v29, %v4864_v52  ;;  %vm2162_vm14 = vcmp.eq.s32.totalorder %v4919_v16, %v4864_v52  ;;  %vm2226_vm15 = vcmp.eq.s32.totalorder %v4929_v33, %v4864_v52 }
 0x174   : > { %v2290_v55 = vsel %vm1778_vm8, %v1153_v24, 0.0  ;;  %v2354_v13 = vsel %vm1842_vm9, %v1153_v24, 0.0  ;;  %v2418_v15 = vsel %vm1906_vm10, %v1153_v24, 0.0  ;;  %v2482_v11 = vsel %vm1970_vm11, %v1153_v24, 0.0 }
 0x175   : > { %v2546_v20 = vsel %vm2034_vm12, %v1153_v24, 0.0  ;;  %v2610_v31 = vsel %vm2098_vm13, %v1153_v24, 0.0  ;;  %v2674_v14 = vsel %vm2162_vm14, %v1153_v24, 0.0  ;;  %v2738_v21 = vsel %vm2226_vm15, %v1153_v24, 0.0 }
 0x176   : > { %v2802_v36 = vadd.f32 %v2801_v50, %v2290_v55  ;;  %v2871_v42 = vadd.f32 %v2870_v61, %v2354_v13  ;;  %v2940_v34 = vadd.f32 %v2939_v57, %v2418_v15  ;;  %v3009_v19 = vadd.f32 %v3008_v1, %v2482_v11 }
 0x177   : > { %v3078_v6 = vadd.f32 %v3077_v12, %v2546_v20  ;;  %v3147_v22 = vadd.f32 %v3146_v5, %v2610_v31  ;;  %v3216_v44 = vadd.f32 %v3215_v10, %v2674_v14  ;;  %v3285_v35 = vadd.f32 %v3284_v8, %v2738_v21  ;;  %v1174_v20 = vpop.xlane.xlu0 %1173 }
 0x178   : > { %vm1779_vm0 = vcmp.eq.s32.totalorder %v4898_v30, %v4869_v56  ;;  %vm1843_vm1 = vcmp.eq.s32.totalorder %v4910_v26, %v4869_v56  ;;  %vm1907_vm2 = vcmp.eq.s32.totalorder %v4913_v37, %v4869_v56  ;;  %vm1971_vm3 = vcmp.eq.s32.totalorder %v4926_v18, %v4869_v56 }
 0x179   : > { %vm2035_vm4 = vcmp.eq.s32.totalorder %v4901_v25, %v4869_v56  ;;  %vm2099_vm5 = vcmp.eq.s32.totalorder %v4916_v29, %v4869_v56  ;;  %vm2163_vm6 = vcmp.eq.s32.totalorder %v4919_v16, %v4869_v56  ;;  %vm2227_vm7 = vcmp.eq.s32.totalorder %v4929_v33, %v4869_v56 }
 0x17a   : > { %v2291_v52 = vsel %vm1779_vm0, %v1160_v23, 0.0  ;;  %v2355_v39 = vsel %vm1843_vm1, %v1160_v23, 0.0  ;;  %v2419_v17 = vsel %vm1907_vm2, %v1160_v23, 0.0  ;;  %v2483_v40 = vsel %vm1971_vm3, %v1160_v23, 0.0 }
 0x17b   : > { %v2547_v49 = vsel %vm2035_vm4, %v1160_v23, 0.0  ;;  %v2611_v48 = vsel %vm2099_vm5, %v1160_v23, 0.0  ;;  %v2675_v43 = vsel %vm2163_vm6, %v1160_v23, 0.0  ;;  %v2739_v38 = vsel %vm2227_vm7, %v1160_v23, 0.0 }
 0x17c   : > { %v2803_v59 = vadd.f32 %v2802_v36, %v2291_v52  ;;  %v2872_v51 = vadd.f32 %v2871_v42, %v2355_v39  ;;  %v2941_v53 = vadd.f32 %v2940_v34, %v2419_v17  ;;  %v3010_v2 = vadd.f32 %v3009_v19, %v2483_v40  ;;  %v1181_v40 = vpop.xlane.xlu1 %1180 }
 0x17d   : > { %v3079_v46 = vadd.f32 %v3078_v6, %v2547_v49  ;;  %v3148_v41 = vadd.f32 %v3147_v22, %v2611_v48  ;;  %v3217_v45 = vadd.f32 %v3216_v44, %v2675_v43  ;;  %v3286_v47 = vadd.f32 %v3285_v35, %v2739_v38 }
 0x17e   : > { %vm1780_vm8 = vcmp.eq.s32.totalorder %v4898_v30, %v4872_v60  ;;  %vm1844_vm9 = vcmp.eq.s32.totalorder %v4910_v26, %v4872_v60  ;;  %vm1908_vm10 = vcmp.eq.s32.totalorder %v4913_v37, %v4872_v60  ;;  %vm1972_vm11 = vcmp.eq.s32.totalorder %v4926_v18, %v4872_v60 }
 0x17f   : > { %vm2036_vm12 = vcmp.eq.s32.totalorder %v4901_v25, %v4872_v60  ;;  %vm2100_vm13 = vcmp.eq.s32.totalorder %v4916_v29, %v4872_v60  ;;  %vm2164_vm14 = vcmp.eq.s32.totalorder %v4919_v16, %v4872_v60  ;;  %vm2228_vm15 = vcmp.eq.s32.totalorder %v4929_v33, %v4872_v60 }
 0x180   : > { %v2292_v56 = vsel %vm1780_vm8, %v1167_v62, 0.0  ;;  %v2356_v58 = vsel %vm1844_vm9, %v1167_v62, 0.0  ;;  %v2420_v54 = vsel %vm1908_vm10, %v1167_v62, 0.0  ;;  %v2484_v50 = vsel %vm1972_vm11, %v1167_v62, 0.0 }
 0x181   : > { %v2548_v61 = vsel %vm2036_vm12, %v1167_v62, 0.0  ;;  %v2612_v57 = vsel %vm2100_vm13, %v1167_v62, 0.0  ;;  %v2676_v1 = vsel %vm2164_vm14, %v1167_v62, 0.0  ;;  %v2740_v12 = vsel %vm2228_vm15, %v1167_v62, 0.0 }
 0x182   : > { %v2804_v5 = vadd.f32 %v2803_v59, %v2292_v56  ;;  %v2873_v10 = vadd.f32 %v2872_v51, %v2356_v58  ;;  %v2942_v8 = vadd.f32 %v2941_v53, %v2420_v54  ;;  %v3011_v24 = vadd.f32 %v3010_v2, %v2484_v50  ;;  %v1188_v54 = vpop.xlane.xlu0 %1187 }
 0x183   : > { %v3080_v55 = vadd.f32 %v3079_v46, %v2548_v61  ;;  %v3149_v13 = vadd.f32 %v3148_v41, %v2612_v57  ;;  %v3218_v15 = vadd.f32 %v3217_v45, %v2676_v1  ;;  %v3287_v11 = vadd.f32 %v3286_v47, %v2740_v12 }
 0x184   : > { %vm1781_vm0 = vcmp.eq.s32.totalorder %v4898_v30, %v4876_v4  ;;  %vm1845_vm1 = vcmp.eq.s32.totalorder %v4910_v26, %v4876_v4  ;;  %vm1909_vm2 = vcmp.eq.s32.totalorder %v4913_v37, %v4876_v4  ;;  %vm1973_vm3 = vcmp.eq.s32.totalorder %v4926_v18, %v4876_v4 }
 0x185   : > { %vm2037_vm4 = vcmp.eq.s32.totalorder %v4901_v25, %v4876_v4  ;;  %vm2101_vm5 = vcmp.eq.s32.totalorder %v4916_v29, %v4876_v4  ;;  %vm2165_vm6 = vcmp.eq.s32.totalorder %v4919_v16, %v4876_v4  ;;  %vm2229_vm7 = vcmp.eq.s32.totalorder %v4929_v33, %v4876_v4 }
 0x186   : > { %v2293_v60 = vsel %vm1781_vm0, %v1174_v20, 0.0  ;;  %v2357_v31 = vsel %vm1845_vm1, %v1174_v20, 0.0  ;;  %v2421_v14 = vsel %vm1909_vm2, %v1174_v20, 0.0  ;;  %v2485_v21 = vsel %vm1973_vm3, %v1174_v20, 0.0 }
 0x187   : > { %v2549_v36 = vsel %vm2037_vm4, %v1174_v20, 0.0  ;;  %v2613_v42 = vsel %vm2101_vm5, %v1174_v20, 0.0  ;;  %v2677_v34 = vsel %vm2165_vm6, %v1174_v20, 0.0  ;;  %v2741_v19 = vsel %vm2229_vm7, %v1174_v20, 0.0 }
 0x188   : > { %v2805_v6 = vadd.f32 %v2804_v5, %v2293_v60  ;;  %v2874_v22 = vadd.f32 %v2873_v10, %v2357_v31  ;;  %v2943_v44 = vadd.f32 %v2942_v8, %v2421_v14  ;;  %v3012_v35 = vadd.f32 %v3011_v24, %v2485_v21  ;;  %v1195_v31 = vpop.xlane.xlu1 %1194 }
 0x189   : > { %v3081_v23 = vadd.f32 %v3080_v55, %v2549_v36  ;;  %v3150_v52 = vadd.f32 %v3149_v13, %v2613_v42  ;;  %v3219_v39 = vadd.f32 %v3218_v15, %v2677_v34  ;;  %v3288_v17 = vadd.f32 %v3287_v11, %v2741_v19 }
 0x18a   : > { %vm1782_vm8 = vcmp.eq.s32.totalorder %v4898_v30, %v4879_v9  ;;  %vm1846_vm9 = vcmp.eq.s32.totalorder %v4910_v26, %v4879_v9  ;;  %vm1910_vm10 = vcmp.eq.s32.totalorder %v4913_v37, %v4879_v9  ;;  %vm1974_vm11 = vcmp.eq.s32.totalorder %v4926_v18, %v4879_v9 }
 0x18b   : > { %vm2038_vm12 = vcmp.eq.s32.totalorder %v4901_v25, %v4879_v9  ;;  %vm2102_vm13 = vcmp.eq.s32.totalorder %v4916_v29, %v4879_v9  ;;  %vm2166_vm14 = vcmp.eq.s32.totalorder %v4919_v16, %v4879_v9  ;;  %vm2230_vm15 = vcmp.eq.s32.totalorder %v4929_v33, %v4879_v9 }
 0x18c   : > { %v2294_v4 = vsel %vm1782_vm8, %v1181_v40, 0.0  ;;  %v2358_v49 = vsel %vm1846_vm9, %v1181_v40, 0.0  ;;  %v2422_v48 = vsel %vm1910_vm10, %v1181_v40, 0.0  ;;  %v2486_v43 = vsel %vm1974_vm11, %v1181_v40, 0.0 }
 0x18d   : > { %v2550_v38 = vsel %vm2038_vm12, %v1181_v40, 0.0  ;;  %v2614_v59 = vsel %vm2102_vm13, %v1181_v40, 0.0  ;;  %v2678_v51 = vsel %vm2166_vm14, %v1181_v40, 0.0  ;;  %v2742_v53 = vsel %vm2230_vm15, %v1181_v40, 0.0 }
 0x18e   : > { %v2806_v2 = vadd.f32 %v2805_v6, %v2294_v4  ;;  %v2875_v46 = vadd.f32 %v2874_v22, %v2358_v49  ;;  %v2944_v41 = vadd.f32 %v2943_v44, %v2422_v48  ;;  %v3013_v45 = vadd.f32 %v3012_v35, %v2486_v43  ;;  %v1202_v4 = vpop.xlane.xlu0 %1201 }
 0x18f   : > { %v3082_v47 = vadd.f32 %v3081_v23, %v2550_v38  ;;  %v3151_v62 = vadd.f32 %v3150_v52, %v2614_v59  ;;  %v3220_v56 = vadd.f32 %v3219_v39, %v2678_v51  ;;  %v3289_v58 = vadd.f32 %v3288_v17, %v2742_v53 }
 0x190   : > { %vm1783_vm0 = vcmp.eq.s32.totalorder %v4898_v30, %v4882_v0  ;;  %vm1847_vm1 = vcmp.eq.s32.totalorder %v4910_v26, %v4882_v0  ;;  %vm1911_vm2 = vcmp.eq.s32.totalorder %v4913_v37, %v4882_v0  ;;  %vm1975_vm3 = vcmp.eq.s32.totalorder %v4926_v18, %v4882_v0 }
 0x191   : > { %vm2039_vm4 = vcmp.eq.s32.totalorder %v4901_v25, %v4882_v0  ;;  %vm2103_vm5 = vcmp.eq.s32.totalorder %v4916_v29, %v4882_v0  ;;  %vm2167_vm6 = vcmp.eq.s32.totalorder %v4919_v16, %v4882_v0  ;;  %vm2231_vm7 = vcmp.eq.s32.totalorder %v4929_v33, %v4882_v0 }
 0x192   : > { %v2295_v9 = vsel %vm1783_vm0, %v1188_v54, 0.0  ;;  %v2359_v50 = vsel %vm1847_vm1, %v1188_v54, 0.0  ;;  %v2423_v61 = vsel %vm1911_vm2, %v1188_v54, 0.0  ;;  %v2487_v57 = vsel %vm1975_vm3, %v1188_v54, 0.0 }
 0x193   : > { %v2551_v1 = vsel %vm2039_vm4, %v1188_v54, 0.0  ;;  %v2615_v12 = vsel %vm2103_vm5, %v1188_v54, 0.0  ;;  %v2679_v5 = vsel %vm2167_vm6, %v1188_v54, 0.0  ;;  %v2743_v10 = vsel %vm2231_vm7, %v1188_v54, 0.0  ;;  %v1209_v54 = vpop.xlane.xlu1 %1208 }
 0x194   : > { %v2807_v8 = vadd.f32 %v2806_v2, %v2295_v9  ;;  %v2876_v24 = vadd.f32 %v2875_v46, %v2359_v50  ;;  %v2945_v55 = vadd.f32 %v2944_v41, %v2423_v61  ;;  %v3014_v13 = vadd.f32 %v3013_v45, %v2487_v57 }
 0x195   : > { %v3083_v15 = vadd.f32 %v3082_v47, %v2551_v1  ;;  %v3152_v11 = vadd.f32 %v3151_v62, %v2615_v12  ;;  %v3221_v20 = vadd.f32 %v3220_v56, %v2679_v5  ;;  %v3290_v60 = vadd.f32 %v3289_v58, %v2743_v10 }
 0x196   : > { %vm1784_vm8 = vcmp.eq.s32.totalorder %v4898_v30, %v4888_v3  ;;  %vm1848_vm9 = vcmp.eq.s32.totalorder %v4910_v26, %v4888_v3  ;;  %vm1912_vm10 = vcmp.eq.s32.totalorder %v4913_v37, %v4888_v3  ;;  %vm1976_vm11 = vcmp.eq.s32.totalorder %v4926_v18, %v4888_v3 }
 0x197   : > { %vm2040_vm12 = vcmp.eq.s32.totalorder %v4901_v25, %v4888_v3  ;;  %vm2104_vm13 = vcmp.eq.s32.totalorder %v4916_v29, %v4888_v3  ;;  %vm2168_vm14 = vcmp.eq.s32.totalorder %v4919_v16, %v4888_v3  ;;  %vm2232_vm15 = vcmp.eq.s32.totalorder %v4929_v33, %v4888_v3 }
 0x198   : > { %v2296_v0 = vsel %vm1784_vm8, %v1195_v31, 0.0  ;;  %v2360_v14 = vsel %vm1848_vm9, %v1195_v31, 0.0  ;;  %v2424_v21 = vsel %vm1912_vm10, %v1195_v31, 0.0  ;;  %v2488_v36 = vsel %vm1976_vm11, %v1195_v31, 0.0 }
 0x199   : > { %v2552_v42 = vsel %vm2040_vm12, %v1195_v31, 0.0  ;;  %v2616_v34 = vsel %vm2104_vm13, %v1195_v31, 0.0  ;;  %v2680_v19 = vsel %vm2168_vm14, %v1195_v31, 0.0  ;;  %v2744_v6 = vsel %vm2232_vm15, %v1195_v31, 0.0 }
 0x19a   : > { %v2808_v22 = vadd.f32 %v2807_v8, %v2296_v0  ;;  %v2877_v44 = vadd.f32 %v2876_v24, %v2360_v14  ;;  %v2946_v35 = vadd.f32 %v2945_v55, %v2424_v21  ;;  %v3015_v23 = vadd.f32 %v3014_v13, %v2488_v36 }
 0x19b   : > { %v3084_v52 = vadd.f32 %v3083_v15, %v2552_v42  ;;  %v3153_v39 = vadd.f32 %v3152_v11, %v2616_v34  ;;  %v3222_v17 = vadd.f32 %v3221_v20, %v2680_v19  ;;  %v3291_v40 = vadd.f32 %v3290_v60, %v2744_v6  ;;  %v1216_v60 = vpop.xlane.xlu0 %1215 }
 0x19c   : > { %vm1785_vm0 = vcmp.eq.s32.totalorder %v4898_v30, %v4891_v63  ;;  %vm1849_vm1 = vcmp.eq.s32.totalorder %v4910_v26, %v4891_v63  ;;  %vm1913_vm2 = vcmp.eq.s32.totalorder %v4913_v37, %v4891_v63  ;;  %vm1977_vm3 = vcmp.eq.s32.totalorder %v4926_v18, %v4891_v63 }
 0x19d   : > { %vm2041_vm4 = vcmp.eq.s32.totalorder %v4901_v25, %v4891_v63  ;;  %vm2105_vm5 = vcmp.eq.s32.totalorder %v4916_v29, %v4891_v63  ;;  %vm2169_vm6 = vcmp.eq.s32.totalorder %v4919_v16, %v4891_v63  ;;  %vm2233_vm7 = vcmp.eq.s32.totalorder %v4929_v33, %v4891_v63 }
 0x19e   : > { %v2297_v3 = vsel %vm1785_vm0, %v1202_v4, 0.0  ;;  %v2361_v49 = vsel %vm1849_vm1, %v1202_v4, 0.0  ;;  %v2425_v48 = vsel %vm1913_vm2, %v1202_v4, 0.0  ;;  %v2489_v43 = vsel %vm1977_vm3, %v1202_v4, 0.0 }
 0x19f   : > { %v2553_v38 = vsel %vm2041_vm4, %v1202_v4, 0.0  ;;  %v2617_v59 = vsel %vm2105_vm5, %v1202_v4, 0.0  ;;  %v2681_v51 = vsel %vm2169_vm6, %v1202_v4, 0.0  ;;  %v2745_v53 = vsel %vm2233_vm7, %v1202_v4, 0.0 }
 0x1a0   : > { %v2809_v2 = vadd.f32 %v2808_v22, %v2297_v3  ;;  %v2878_v46 = vadd.f32 %v2877_v44, %v2361_v49  ;;  %v2947_v41 = vadd.f32 %v2946_v35, %v2425_v48  ;;  %v3016_v45 = vadd.f32 %v3015_v23, %v2489_v43  ;;  %v1223_v49 = vpop.xlane.xlu1 %1222 }
 0x1a1   : > { %v3085_v47 = vadd.f32 %v3084_v52, %v2553_v38  ;;  %v3154_v62 = vadd.f32 %v3153_v39, %v2617_v59  ;;  %v3223_v56 = vadd.f32 %v3222_v17, %v2681_v51  ;;  %v3292_v58 = vadd.f32 %v3291_v40, %v2745_v53 }
 0x1a2   : > { %vm1786_vm8 = vcmp.eq.s32.totalorder %v4898_v30, %v4894_v7  ;;  %vm1850_vm9 = vcmp.eq.s32.totalorder %v4910_v26, %v4894_v7  ;;  %vm1914_vm10 = vcmp.eq.s32.totalorder %v4913_v37, %v4894_v7  ;;  %vm1978_vm11 = vcmp.eq.s32.totalorder %v4926_v18, %v4894_v7 }
 0x1a3   : > { %vm2042_vm12 = vcmp.eq.s32.totalorder %v4901_v25, %v4894_v7  ;;  %vm2106_vm13 = vcmp.eq.s32.totalorder %v4916_v29, %v4894_v7  ;;  %vm2170_vm14 = vcmp.eq.s32.totalorder %v4919_v16, %v4894_v7  ;;  %vm2234_vm15 = vcmp.eq.s32.totalorder %v4929_v33, %v4894_v7 }
 0x1a4   : > { %v2298_v63 = vsel %vm1786_vm8, %v1209_v54, 0.0  ;;  %v2362_v9 = vsel %vm1850_vm9, %v1209_v54, 0.0  ;;  %v2426_v50 = vsel %vm1914_vm10, %v1209_v54, 0.0  ;;  %v2490_v61 = vsel %vm1978_vm11, %v1209_v54, 0.0 }
 0x1a5   : > { %v2554_v57 = vsel %vm2042_vm12, %v1209_v54, 0.0  ;;  %v2618_v1 = vsel %vm2106_vm13, %v1209_v54, 0.0  ;;  %v2682_v12 = vsel %vm2170_vm14, %v1209_v54, 0.0  ;;  %v2746_v5 = vsel %vm2234_vm15, %v1209_v54, 0.0 }
 0x1a6   : > { %v2810_v10 = vadd.f32 %v2809_v2, %v2298_v63  ;;  %v2879_v8 = vadd.f32 %v2878_v46, %v2362_v9  ;;  %v2948_v24 = vadd.f32 %v2947_v41, %v2426_v50  ;;  %v3017_v55 = vadd.f32 %v3016_v45, %v2490_v61 }
 0x1a7   : > { %v3086_v13 = vadd.f32 %v3085_v47, %v2554_v57  ;;  %v3155_v15 = vadd.f32 %v3154_v62, %v2618_v1  ;;  %v3224_v11 = vadd.f32 %v3223_v56, %v2682_v12  ;;  %v3293_v20 = vadd.f32 %v3292_v58, %v2746_v5 }
 0x1a8   : > { %vm1787_vm0 = vcmp.eq.s32.totalorder %v4898_v30, %v4904_v28  ;;  %vm1851_vm1 = vcmp.eq.s32.totalorder %v4910_v26, %v4904_v28  ;;  %vm1915_vm2 = vcmp.eq.s32.totalorder %v4913_v37, %v4904_v28  ;;  %vm1979_vm3 = vcmp.eq.s32.totalorder %v4926_v18, %v4904_v28 }
 0x1a9   : > { %vm2043_vm4 = vcmp.eq.s32.totalorder %v4901_v25, %v4904_v28  ;;  %vm2107_vm5 = vcmp.eq.s32.totalorder %v4916_v29, %v4904_v28  ;;  %vm2171_vm6 = vcmp.eq.s32.totalorder %v4919_v16, %v4904_v28  ;;  %vm2235_vm7 = vcmp.eq.s32.totalorder %v4929_v33, %v4904_v28  ;;  %v6048_v28 = vld [vmem:[#allocation14_spill] sm:$0xff] }
 0x1aa   : > { %v2299_v7 = vsel %vm1787_vm0, %v1216_v60, 0.0  ;;  %v2363_v31 = vsel %vm1851_vm1, %v1216_v60, 0.0  ;;  %v2427_v0 = vsel %vm1915_vm2, %v1216_v60, 0.0  ;;  %v2491_v14 = vsel %vm1979_vm3, %v1216_v60, 0.0 }
 0x1ab   : > { %v2555_v21 = vsel %vm2043_vm4, %v1216_v60, 0.0  ;;  %v2619_v36 = vsel %vm2107_vm5, %v1216_v60, 0.0  ;;  %v2683_v42 = vsel %vm2171_vm6, %v1216_v60, 0.0  ;;  %v2747_v34 = vsel %vm2235_vm7, %v1216_v60, 0.0 }
 0x1ac   : > { %v2811_v19 = vadd.f32 %v2810_v10, %v2299_v7  ;;  %v2880_v6 = vadd.f32 %v2879_v8, %v2363_v31  ;;  %v2949_v22 = vadd.f32 %v2948_v24, %v2427_v0  ;;  %v3018_v44 = vadd.f32 %v3017_v55, %v2491_v14  ;;  %v1230_v10 = vpop.xlane.xlu0 %1229 }
 0x1ad   : > { %v3087_v35 = vadd.f32 %v3086_v13, %v2555_v21  ;;  %v3156_v23 = vadd.f32 %v3155_v15, %v2619_v36  ;;  %v3225_v52 = vadd.f32 %v3224_v11, %v2683_v42  ;;  %v3294_v39 = vadd.f32 %v3293_v20, %v2747_v34 }
 0x1ae   : > { %v1643_v17 = vadd.s32 %v4837_v32, %v4907_v27  ;;  %v1579_v40 = vadd.s32 128, %v6048_v28  ;;  %v1580_v4 = vadd.s32 136, %v6048_v28  ;;  %v1581_v3 = vadd.s32 144, %v6048_v28 }
 0x1af   : > { %v1582_v48 = vadd.s32 152, %v6048_v28  ;;  %v1583_v43 = vadd.s32 160, %v6048_v28  ;;  %v1584_v38 = vadd.s32 168, %v6048_v28  ;;  %v1585_v59 = vadd.s32 176, %v6048_v28 }
 0x1b0   : > { %vm1788_vm8 = vcmp.eq.s32.totalorder %v4898_v30, %v1643_v17  ;;  %vm1852_vm9 = vcmp.eq.s32.totalorder %v4910_v26, %v1643_v17  ;;  %vm1916_vm10 = vcmp.eq.s32.totalorder %v4913_v37, %v1643_v17  ;;  %vm1980_vm11 = vcmp.eq.s32.totalorder %v4926_v18, %v1643_v17 }
 0x1b1   : > { %vm2044_vm12 = vcmp.eq.s32.totalorder %v4901_v25, %v1643_v17  ;;  %vm2108_vm13 = vcmp.eq.s32.totalorder %v4916_v29, %v1643_v17  ;;  %vm2172_vm14 = vcmp.eq.s32.totalorder %v4919_v16, %v1643_v17  ;;  %vm2236_vm15 = vcmp.eq.s32.totalorder %v4929_v33, %v1643_v17 }
 0x1b2   : > { %v2300_v27 = vsel %vm1788_vm8, %v1223_v49, 0.0  ;;  %v2364_v51 = vsel %vm1852_vm9, %v1223_v49, 0.0  ;;  %v2428_v53 = vsel %vm1916_vm10, %v1223_v49, 0.0  ;;  %v2492_v2 = vsel %vm1980_vm11, %v1223_v49, 0.0 }
 0x1b3   : > { %v2556_v46 = vsel %vm2044_vm12, %v1223_v49, 0.0  ;;  %v2620_v41 = vsel %vm2108_vm13, %v1223_v49, 0.0  ;;  %v2684_v45 = vsel %vm2172_vm14, %v1223_v49, 0.0  ;;  %v2748_v47 = vsel %vm2236_vm15, %v1223_v49, 0.0 }
 0x1b4   : > { %v2812_v62 = vadd.f32 %v2811_v19, %v2300_v27  ;;  %v2881_v56 = vadd.f32 %v2880_v6, %v2364_v51  ;;  %v2950_v58 = vadd.f32 %v2949_v22, %v2428_v53  ;;  %v3019_v54 = vadd.f32 %v3018_v44, %v2492_v2 }
 0x1b5   : > { %v3088_v63 = vadd.f32 %v3087_v35, %v2556_v46  ;;  %v3157_v9 = vadd.f32 %v3156_v23, %v2620_v41  ;;  %v3226_v50 = vadd.f32 %v3225_v52, %v2684_v45  ;;  %v3295_v61 = vadd.f32 %v3294_v39, %v2748_v47  ;;  %v1237_v35 = vpop.xlane.xlu1 %1236  ;;  %v1244_v46 = vpop.xlane.xlu0 %1243 }
 0x1b6   : > { %v1644_v57 = vadd.s32 %v4837_v32, %v1579_v40  ;;  %v1645_v1 = vadd.s32 %v4837_v32, %v1580_v4  ;;  %v5187_v12 = vadd.s32 %v4837_v32, %v1581_v3  ;;  %v5190_v5 = vadd.s32 %v4837_v32, %v1582_v48 }
 0x1b7   : > { %v5193_v8 = vadd.s32 %v4837_v32, %v1583_v43  ;;  %v5196_v24 = vadd.s32 %v4837_v32, %v1584_v38  ;;  %v5199_v55 = vadd.s32 %v4837_v32, %v1585_v59  ;;  %v5202_v13 = vadd.s32 184, %v6048_v28 }
 0x1b8   : > { %vm1789_vm0 = vcmp.eq.s32.totalorder %v4898_v30, %v1644_v57  ;;  %vm1853_vm1 = vcmp.eq.s32.totalorder %v4910_v26, %v1644_v57  ;;  %vm1917_vm2 = vcmp.eq.s32.totalorder %v4913_v37, %v1644_v57  ;;  %vm1981_vm3 = vcmp.eq.s32.totalorder %v4926_v18, %v1644_v57 }
 0x1b9   : > { %vm2045_vm4 = vcmp.eq.s32.totalorder %v4901_v25, %v1644_v57  ;;  %vm2109_vm5 = vcmp.eq.s32.totalorder %v4916_v29, %v1644_v57  ;;  %vm2173_vm6 = vcmp.eq.s32.totalorder %v4919_v16, %v1644_v57  ;;  %vm2237_vm7 = vcmp.eq.s32.totalorder %v4929_v33, %v1644_v57 }
 0x1ba   : > { %v2301_v15 = vsel %vm1789_vm0, %v1230_v10, 0.0  ;;  %v2365_v11 = vsel %vm1853_vm1, %v1230_v10, 0.0  ;;  %v2429_v20 = vsel %vm1917_vm2, %v1230_v10, 0.0  ;;  %v2493_v60 = vsel %vm1981_vm3, %v1230_v10, 0.0 }
 0x1bb   : > { %v2557_v7 = vsel %vm2045_vm4, %v1230_v10, 0.0  ;;  %v2621_v31 = vsel %vm2109_vm5, %v1230_v10, 0.0  ;;  %v2685_v0 = vsel %vm2173_vm6, %v1230_v10, 0.0  ;;  %v2749_v14 = vsel %vm2237_vm7, %v1230_v10, 0.0 }
 0x1bc   : > { %v2813_v21 = vadd.f32 %v2812_v62, %v2301_v15  ;;  %v2882_v36 = vadd.f32 %v2881_v56, %v2365_v11  ;;  %v2951_v42 = vadd.f32 %v2950_v58, %v2429_v20  ;;  %v3020_v34 = vadd.f32 %v3019_v54, %v2493_v60  ;;  %v1251_v20 = vpop.xlane.xlu1 %1250 }
 0x1bd   : > { %v3089_v19 = vadd.f32 %v3088_v63, %v2557_v7  ;;  %v3158_v6 = vadd.f32 %v3157_v9, %v2621_v31  ;;  %v3227_v22 = vadd.f32 %v3226_v50, %v2685_v0  ;;  %v3296_v44 = vadd.f32 %v3295_v61, %v2749_v14 }
 0x1be   : > { %vm1790_vm8 = vcmp.eq.s32.totalorder %v4898_v30, %v1645_v1  ;;  %vm1854_vm9 = vcmp.eq.s32.totalorder %v4910_v26, %v1645_v1  ;;  %vm1918_vm10 = vcmp.eq.s32.totalorder %v4913_v37, %v1645_v1  ;;  %vm1982_vm11 = vcmp.eq.s32.totalorder %v4926_v18, %v1645_v1 }
 0x1bf   : > { %vm2046_vm12 = vcmp.eq.s32.totalorder %v4901_v25, %v1645_v1  ;;  %vm2110_vm13 = vcmp.eq.s32.totalorder %v4916_v29, %v1645_v1  ;;  %vm2174_vm14 = vcmp.eq.s32.totalorder %v4919_v16, %v1645_v1  ;;  %vm2238_vm15 = vcmp.eq.s32.totalorder %v4929_v33, %v1645_v1 }
 0x1c0   : > { %v2302_v23 = vsel %vm1790_vm8, %v1237_v35, 0.0  ;;  %v2366_v52 = vsel %vm1854_vm9, %v1237_v35, 0.0  ;;  %v2430_v39 = vsel %vm1918_vm10, %v1237_v35, 0.0  ;;  %v2494_v17 = vsel %vm1982_vm11, %v1237_v35, 0.0 }
 0x1c1   : > { %v2558_v40 = vsel %vm2046_vm12, %v1237_v35, 0.0  ;;  %v2622_v4 = vsel %vm2110_vm13, %v1237_v35, 0.0  ;;  %v2686_v3 = vsel %vm2174_vm14, %v1237_v35, 0.0  ;;  %v2750_v49 = vsel %vm2238_vm15, %v1237_v35, 0.0 }
 0x1c2   : > { %v2814_v48 = vadd.f32 %v2813_v21, %v2302_v23  ;;  %v2883_v43 = vadd.f32 %v2882_v36, %v2366_v52  ;;  %v2952_v38 = vadd.f32 %v2951_v42, %v2430_v39  ;;  %v3021_v59 = vadd.f32 %v3020_v34, %v2494_v17  ;;  %v1258_v52 = vpop.xlane.xlu0 %1257 }
 0x1c3   : > { %v3090_v27 = vadd.f32 %v3089_v19, %v2558_v40  ;;  %v3159_v51 = vadd.f32 %v3158_v6, %v2622_v4  ;;  %v3228_v53 = vadd.f32 %v3227_v22, %v2686_v3  ;;  %v3297_v2 = vadd.f32 %v3296_v44, %v2750_v49 }
 0x1c4   : > { %vm1791_vm0 = vcmp.eq.s32.totalorder %v4898_v30, %v5187_v12  ;;  %vm1855_vm1 = vcmp.eq.s32.totalorder %v4910_v26, %v5187_v12  ;;  %vm1919_vm2 = vcmp.eq.s32.totalorder %v4913_v37, %v5187_v12  ;;  %vm1983_vm3 = vcmp.eq.s32.totalorder %v4926_v18, %v5187_v12 }
 0x1c5   : > { %vm2047_vm4 = vcmp.eq.s32.totalorder %v4901_v25, %v5187_v12  ;;  %vm2111_vm5 = vcmp.eq.s32.totalorder %v4916_v29, %v5187_v12  ;;  %vm2175_vm6 = vcmp.eq.s32.totalorder %v4919_v16, %v5187_v12  ;;  %vm2239_vm7 = vcmp.eq.s32.totalorder %v4929_v33, %v5187_v12 }
 0x1c6   : > { %v2303_v41 = vsel %vm1791_vm0, %v1244_v46, 0.0  ;;  %v2367_v45 = vsel %vm1855_vm1, %v1244_v46, 0.0  ;;  %v2431_v47 = vsel %vm1919_vm2, %v1244_v46, 0.0  ;;  %v2495_v62 = vsel %vm1983_vm3, %v1244_v46, 0.0 }
 0x1c7   : > { %v2559_v56 = vsel %vm2047_vm4, %v1244_v46, 0.0  ;;  %v2623_v58 = vsel %vm2111_vm5, %v1244_v46, 0.0  ;;  %v2687_v54 = vsel %vm2175_vm6, %v1244_v46, 0.0  ;;  %v2751_v63 = vsel %vm2239_vm7, %v1244_v46, 0.0 }
 0x1c8   : > { %v2815_v9 = vadd.f32 %v2814_v48, %v2303_v41  ;;  %v2884_v50 = vadd.f32 %v2883_v43, %v2367_v45  ;;  %v2953_v61 = vadd.f32 %v2952_v38, %v2431_v47  ;;  %v3022_v57 = vadd.f32 %v3021_v59, %v2495_v62  ;;  %v1265_v41 = vpop.xlane.xlu1 %1264 }
 0x1c9   : > { %v3091_v1 = vadd.f32 %v3090_v27, %v2559_v56  ;;  %v3160_v10 = vadd.f32 %v3159_v51, %v2623_v58  ;;  %v3229_v15 = vadd.f32 %v3228_v53, %v2687_v54  ;;  %v3298_v11 = vadd.f32 %v3297_v2, %v2751_v63 }
 0x1ca   : > { %vm1792_vm8 = vcmp.eq.s32.totalorder %v4898_v30, %v5190_v5  ;;  %vm1856_vm9 = vcmp.eq.s32.totalorder %v4910_v26, %v5190_v5  ;;  %vm1920_vm10 = vcmp.eq.s32.totalorder %v4913_v37, %v5190_v5  ;;  %vm1984_vm11 = vcmp.eq.s32.totalorder %v4926_v18, %v5190_v5 }
 0x1cb   : > { %vm2048_vm12 = vcmp.eq.s32.totalorder %v4901_v25, %v5190_v5  ;;  %vm2112_vm13 = vcmp.eq.s32.totalorder %v4916_v29, %v5190_v5  ;;  %vm2176_vm14 = vcmp.eq.s32.totalorder %v4919_v16, %v5190_v5  ;;  %vm2240_vm15 = vcmp.eq.s32.totalorder %v4929_v33, %v5190_v5 }
 0x1cc   : > { %v2304_v12 = vsel %vm1792_vm8, %v1251_v20, 0.0  ;;  %v2368_v60 = vsel %vm1856_vm9, %v1251_v20, 0.0  ;;  %v2432_v7 = vsel %vm1920_vm10, %v1251_v20, 0.0  ;;  %v2496_v31 = vsel %vm1984_vm11, %v1251_v20, 0.0 }
 0x1cd   : > { %v2560_v0 = vsel %vm2048_vm12, %v1251_v20, 0.0  ;;  %v2624_v14 = vsel %vm2112_vm13, %v1251_v20, 0.0  ;;  %v2688_v21 = vsel %vm2176_vm14, %v1251_v20, 0.0  ;;  %v2752_v36 = vsel %vm2240_vm15, %v1251_v20, 0.0  ;;  %v1272_v20 = vpop.xlane.xlu0 %1271 }
 0x1ce   : > { %v2816_v42 = vadd.f32 %v2815_v9, %v2304_v12  ;;  %v2885_v34 = vadd.f32 %v2884_v50, %v2368_v60  ;;  %v2954_v19 = vadd.f32 %v2953_v61, %v2432_v7  ;;  %v3023_v6 = vadd.f32 %v3022_v57, %v2496_v31 }
 0x1cf   : > { %v3092_v22 = vadd.f32 %v3091_v1, %v2560_v0  ;;  %v3161_v44 = vadd.f32 %v3160_v10, %v2624_v14  ;;  %v3230_v35 = vadd.f32 %v3229_v15, %v2688_v21  ;;  %v3299_v23 = vadd.f32 %v3298_v11, %v2752_v36 }
 0x1d0   : > { %vm1793_vm0 = vcmp.eq.s32.totalorder %v4898_v30, %v5193_v8  ;;  %vm1857_vm1 = vcmp.eq.s32.totalorder %v4910_v26, %v5193_v8  ;;  %vm1921_vm2 = vcmp.eq.s32.totalorder %v4913_v37, %v5193_v8  ;;  %vm1985_vm3 = vcmp.eq.s32.totalorder %v4926_v18, %v5193_v8 }
 0x1d1   : > { %vm2049_vm4 = vcmp.eq.s32.totalorder %v4901_v25, %v5193_v8  ;;  %vm2113_vm5 = vcmp.eq.s32.totalorder %v4916_v29, %v5193_v8  ;;  %vm2177_vm6 = vcmp.eq.s32.totalorder %v4919_v16, %v5193_v8  ;;  %vm2241_vm7 = vcmp.eq.s32.totalorder %v4929_v33, %v5193_v8 }
 0x1d2   : > { %v2305_v5 = vsel %vm1793_vm0, %v1258_v52, 0.0  ;;  %v2369_v39 = vsel %vm1857_vm1, %v1258_v52, 0.0  ;;  %v2433_v17 = vsel %vm1921_vm2, %v1258_v52, 0.0  ;;  %v2497_v40 = vsel %vm1985_vm3, %v1258_v52, 0.0 }
 0x1d3   : > { %v2561_v4 = vsel %vm2049_vm4, %v1258_v52, 0.0  ;;  %v2625_v3 = vsel %vm2113_vm5, %v1258_v52, 0.0  ;;  %v2689_v49 = vsel %vm2177_vm6, %v1258_v52, 0.0  ;;  %v2753_v48 = vsel %vm2241_vm7, %v1258_v52, 0.0 }
 0x1d4   : > { %v2817_v43 = vadd.f32 %v2816_v42, %v2305_v5  ;;  %v2886_v38 = vadd.f32 %v2885_v34, %v2369_v39  ;;  %v2955_v59 = vadd.f32 %v2954_v19, %v2433_v17  ;;  %v3024_v27 = vadd.f32 %v3023_v6, %v2497_v40  ;;  %v1279_v39 = vpop.xlane.xlu1 %1278 }
 0x1d5   : > { %v3093_v51 = vadd.f32 %v3092_v22, %v2561_v4  ;;  %v3162_v53 = vadd.f32 %v3161_v44, %v2625_v3  ;;  %v3231_v2 = vadd.f32 %v3230_v35, %v2689_v49  ;;  %v3300_v46 = vadd.f32 %v3299_v23, %v2753_v48 }
 0x1d6   : > { %vm1794_vm8 = vcmp.eq.s32.totalorder %v4898_v30, %v5196_v24  ;;  %vm1858_vm9 = vcmp.eq.s32.totalorder %v4910_v26, %v5196_v24  ;;  %vm1922_vm10 = vcmp.eq.s32.totalorder %v4913_v37, %v5196_v24  ;;  %vm1986_vm11 = vcmp.eq.s32.totalorder %v4926_v18, %v5196_v24 }
 0x1d7   : > { %vm2050_vm12 = vcmp.eq.s32.totalorder %v4901_v25, %v5196_v24  ;;  %vm2114_vm13 = vcmp.eq.s32.totalorder %v4916_v29, %v5196_v24  ;;  %vm2178_vm14 = vcmp.eq.s32.totalorder %v4919_v16, %v5196_v24  ;;  %vm2242_vm15 = vcmp.eq.s32.totalorder %v4929_v33, %v5196_v24 }
 0x1d8   : > { %v2306_v8 = vsel %vm1794_vm8, %v1265_v41, 0.0  ;;  %v2370_v45 = vsel %vm1858_vm9, %v1265_v41, 0.0  ;;  %v2434_v47 = vsel %vm1922_vm10, %v1265_v41, 0.0  ;;  %v2498_v62 = vsel %vm1986_vm11, %v1265_v41, 0.0 }
 0x1d9   : > { %v2562_v56 = vsel %vm2050_vm12, %v1265_v41, 0.0  ;;  %v2626_v58 = vsel %vm2114_vm13, %v1265_v41, 0.0  ;;  %v2690_v54 = vsel %vm2178_vm14, %v1265_v41, 0.0  ;;  %v2754_v63 = vsel %vm2242_vm15, %v1265_v41, 0.0 }
 0x1da   : > { %v2818_v9 = vadd.f32 %v2817_v43, %v2306_v8  ;;  %v2887_v50 = vadd.f32 %v2886_v38, %v2370_v45  ;;  %v2956_v61 = vadd.f32 %v2955_v59, %v2434_v47  ;;  %v3025_v57 = vadd.f32 %v3024_v27, %v2498_v62 }
 0x1db   : > { %v3094_v1 = vadd.f32 %v3093_v51, %v2562_v56  ;;  %v3163_v10 = vadd.f32 %v3162_v53, %v2626_v58  ;;  %v3232_v15 = vadd.f32 %v3231_v2, %v2690_v54  ;;  %v3301_v11 = vadd.f32 %v3300_v46, %v2754_v63 }
 0x1dc   : > { %vm1795_vm0 = vcmp.eq.s32.totalorder %v4898_v30, %v5199_v55  ;;  %vm1859_vm1 = vcmp.eq.s32.totalorder %v4910_v26, %v5199_v55  ;;  %vm1923_vm2 = vcmp.eq.s32.totalorder %v4913_v37, %v5199_v55  ;;  %vm1987_vm3 = vcmp.eq.s32.totalorder %v4926_v18, %v5199_v55 }
 0x1dd   : > { %vm2051_vm4 = vcmp.eq.s32.totalorder %v4901_v25, %v5199_v55  ;;  %vm2115_vm5 = vcmp.eq.s32.totalorder %v4916_v29, %v5199_v55  ;;  %vm2179_vm6 = vcmp.eq.s32.totalorder %v4919_v16, %v5199_v55  ;;  %vm2243_vm7 = vcmp.eq.s32.totalorder %v4929_v33, %v5199_v55 }
 0x1de   : > { %v2307_v24 = vsel %vm1795_vm0, %v1272_v20, 0.0  ;;  %v2371_v12 = vsel %vm1859_vm1, %v1272_v20, 0.0  ;;  %v2435_v60 = vsel %vm1923_vm2, %v1272_v20, 0.0  ;;  %v2499_v7 = vsel %vm1987_vm3, %v1272_v20, 0.0 }
 0x1df   : > { %v2563_v31 = vsel %vm2051_vm4, %v1272_v20, 0.0  ;;  %v2627_v0 = vsel %vm2115_vm5, %v1272_v20, 0.0  ;;  %v2691_v14 = vsel %vm2179_vm6, %v1272_v20, 0.0  ;;  %v2755_v21 = vsel %vm2243_vm7, %v1272_v20, 0.0 }
 0x1e0   : > { %v2819_v36 = vadd.f32 %v2818_v9, %v2307_v24  ;;  %v2888_v42 = vadd.f32 %v2887_v50, %v2371_v12  ;;  %v2957_v34 = vadd.f32 %v2956_v61, %v2435_v60  ;;  %v3026_v19 = vadd.f32 %v3025_v57, %v2499_v7  ;;  %v1286_v9 = vpop.xlane.xlu0 %1285 }
 0x1e1   : > { %v3095_v6 = vadd.f32 %v3094_v1, %v2563_v31  ;;  %v3164_v22 = vadd.f32 %v3163_v10, %v2627_v0  ;;  %v3233_v44 = vadd.f32 %v3232_v15, %v2691_v14  ;;  %v3302_v35 = vadd.f32 %v3301_v11, %v2755_v21 }
 0x1e2   : > { %v1651_v23 = vadd.s32 %v4837_v32, %v5202_v13  ;;  %v1587_v55 = vadd.s32 192, %v6048_v28  ;;  %v1588_v52 = vadd.s32 200, %v6048_v28  ;;  %v1589_v5 = vadd.s32 208, %v6048_v28 }
 0x1e3   : > { %v1590_v17 = vadd.s32 216, %v6048_v28  ;;  %v1591_v40 = vadd.s32 224, %v6048_v28  ;;  %v1592_v4 = vadd.s32 232, %v6048_v28  ;;  %v1593_v3 = vadd.s32 240, %v6048_v28 }
 0x1e4   : > { %vm1796_vm8 = vcmp.eq.s32.totalorder %v4898_v30, %v1651_v23  ;;  %vm1860_vm9 = vcmp.eq.s32.totalorder %v4910_v26, %v1651_v23  ;;  %vm1924_vm10 = vcmp.eq.s32.totalorder %v4913_v37, %v1651_v23  ;;  %vm1988_vm11 = vcmp.eq.s32.totalorder %v4926_v18, %v1651_v23 }
 0x1e5   : > { %vm2052_vm12 = vcmp.eq.s32.totalorder %v4901_v25, %v1651_v23  ;;  %vm2116_vm13 = vcmp.eq.s32.totalorder %v4916_v29, %v1651_v23  ;;  %vm2180_vm14 = vcmp.eq.s32.totalorder %v4919_v16, %v1651_v23  ;;  %vm2244_vm15 = vcmp.eq.s32.totalorder %v4929_v33, %v1651_v23 }
 0x1e6   : > { %v2308_v13 = vsel %vm1796_vm8, %v1279_v39, 0.0  ;;  %v2372_v49 = vsel %vm1860_vm9, %v1279_v39, 0.0  ;;  %v2436_v48 = vsel %vm1924_vm10, %v1279_v39, 0.0  ;;  %v2500_v43 = vsel %vm1988_vm11, %v1279_v39, 0.0 }
 0x1e7   : > { %v2564_v38 = vsel %vm2052_vm12, %v1279_v39, 0.0  ;;  %v2628_v59 = vsel %vm2116_vm13, %v1279_v39, 0.0  ;;  %v2692_v27 = vsel %vm2180_vm14, %v1279_v39, 0.0  ;;  %v2756_v51 = vsel %vm2244_vm15, %v1279_v39, 0.0 }
 0x1e8   : > { %v2820_v53 = vadd.f32 %v2819_v36, %v2308_v13  ;;  %v2889_v2 = vadd.f32 %v2888_v42, %v2372_v49  ;;  %v2958_v46 = vadd.f32 %v2957_v34, %v2436_v48  ;;  %v3027_v41 = vadd.f32 %v3026_v19, %v2500_v43 }
 0x1e9   : > { %v3096_v8 = vadd.f32 %v3095_v6, %v2564_v38  ;;  %v3165_v45 = vadd.f32 %v3164_v22, %v2628_v59  ;;  %v3234_v47 = vadd.f32 %v3233_v44, %v2692_v27  ;;  %v3303_v62 = vadd.f32 %v3302_v35, %v2756_v51  ;;  %v1293_v6 = vpop.xlane.xlu1 %1292  ;;  %v1300_v38 = vpop.xlane.xlu0 %1299 }
 0x1ea   : > { %v1652_v56 = vadd.s32 %v4837_v32, %v1587_v55  ;;  %v1653_v58 = vadd.s32 %v4837_v32, %v1588_v52  ;;  %v5320_v54 = vadd.s32 %v4837_v32, %v1589_v5  ;;  %v5323_v63 = vadd.s32 %v4837_v32, %v1590_v17 }
 0x1eb   : > { %v5326_v50 = vadd.s32 %v4837_v32, %v1591_v40  ;;  %v5329_v61 = vadd.s32 %v4837_v32, %v1592_v4  ;;  %v5332_v57 = vadd.s32 %v4837_v32, %v1593_v3  ;;  %v5335_v1 = vadd.s32 248, %v6048_v28 }
 0x1ec   : > { %vm1797_vm0 = vcmp.eq.s32.totalorder %v4898_v30, %v1652_v56  ;;  %vm1861_vm1 = vcmp.eq.s32.totalorder %v4910_v26, %v1652_v56  ;;  %vm1925_vm2 = vcmp.eq.s32.totalorder %v4913_v37, %v1652_v56  ;;  %vm1989_vm3 = vcmp.eq.s32.totalorder %v4926_v18, %v1652_v56 }
 0x1ed   : > { %vm2053_vm4 = vcmp.eq.s32.totalorder %v4901_v25, %v1652_v56  ;;  %vm2117_vm5 = vcmp.eq.s32.totalorder %v4916_v29, %v1652_v56  ;;  %vm2181_vm6 = vcmp.eq.s32.totalorder %v4919_v16, %v1652_v56  ;;  %vm2245_vm7 = vcmp.eq.s32.totalorder %v4929_v33, %v1652_v56 }
 0x1ee   : > { %v2309_v10 = vsel %vm1797_vm0, %v1286_v9, 0.0  ;;  %v2373_v15 = vsel %vm1861_vm1, %v1286_v9, 0.0  ;;  %v2437_v11 = vsel %vm1925_vm2, %v1286_v9, 0.0  ;;  %v2501_v20 = vsel %vm1989_vm3, %v1286_v9, 0.0 }
 0x1ef   : > { %v2565_v24 = vsel %vm2053_vm4, %v1286_v9, 0.0  ;;  %v2629_v12 = vsel %vm2117_vm5, %v1286_v9, 0.0  ;;  %v2693_v60 = vsel %vm2181_vm6, %v1286_v9, 0.0  ;;  %v2757_v7 = vsel %vm2245_vm7, %v1286_v9, 0.0 }
 0x1f0   : > { %v2821_v31 = vadd.f32 %v2820_v53, %v2309_v10  ;;  %v2890_v0 = vadd.f32 %v2889_v2, %v2373_v15  ;;  %v2959_v14 = vadd.f32 %v2958_v46, %v2437_v11  ;;  %v3028_v21 = vadd.f32 %v3027_v41, %v2501_v20  ;;  %v1307_v11 = vpop.xlane.xlu1 %1306 }
 0x1f1   : > { %v3097_v36 = vadd.f32 %v3096_v8, %v2565_v24  ;;  %v3166_v42 = vadd.f32 %v3165_v45, %v2629_v12  ;;  %v3235_v34 = vadd.f32 %v3234_v47, %v2693_v60  ;;  %v3304_v19 = vadd.f32 %v3303_v62, %v2757_v7 }
 0x1f2   : > { %vm1798_vm8 = vcmp.eq.s32.totalorder %v4898_v30, %v1653_v58  ;;  %vm1862_vm9 = vcmp.eq.s32.totalorder %v4910_v26, %v1653_v58  ;;  %vm1926_vm10 = vcmp.eq.s32.totalorder %v4913_v37, %v1653_v58  ;;  %vm1990_vm11 = vcmp.eq.s32.totalorder %v4926_v18, %v1653_v58 }
 0x1f3   : > { %vm2054_vm12 = vcmp.eq.s32.totalorder %v4901_v25, %v1653_v58  ;;  %vm2118_vm13 = vcmp.eq.s32.totalorder %v4916_v29, %v1653_v58  ;;  %vm2182_vm14 = vcmp.eq.s32.totalorder %v4919_v16, %v1653_v58  ;;  %vm2246_vm15 = vcmp.eq.s32.totalorder %v4929_v33, %v1653_v58 }
 0x1f4   : > { %v2310_v22 = vsel %vm1798_vm8, %v1293_v6, 0.0  ;;  %v2374_v44 = vsel %vm1862_vm9, %v1293_v6, 0.0  ;;  %v2438_v35 = vsel %vm1926_vm10, %v1293_v6, 0.0  ;;  %v2502_v23 = vsel %vm1990_vm11, %v1293_v6, 0.0 }
 0x1f5   : > { %v2566_v55 = vsel %vm2054_vm12, %v1293_v6, 0.0  ;;  %v2630_v52 = vsel %vm2118_vm13, %v1293_v6, 0.0  ;;  %v2694_v5 = vsel %vm2182_vm14, %v1293_v6, 0.0  ;;  %v2758_v39 = vsel %vm2246_vm15, %v1293_v6, 0.0 }
 0x1f6   : > { %v2822_v17 = vadd.f32 %v2821_v31, %v2310_v22  ;;  %v2891_v40 = vadd.f32 %v2890_v0, %v2374_v44  ;;  %v2960_v4 = vadd.f32 %v2959_v14, %v2438_v35  ;;  %v3029_v3 = vadd.f32 %v3028_v21, %v2502_v23  ;;  %v1314_v44 = vpop.xlane.xlu0 %1313 }
 0x1f7   : > { %v3098_v13 = vadd.f32 %v3097_v36, %v2566_v55  ;;  %v3167_v49 = vadd.f32 %v3166_v42, %v2630_v52  ;;  %v3236_v48 = vadd.f32 %v3235_v34, %v2694_v5  ;;  %v3305_v43 = vadd.f32 %v3304_v19, %v2758_v39 }
 0x1f8   : > { %vm1799_vm0 = vcmp.eq.s32.totalorder %v4898_v30, %v5320_v54  ;;  %vm1863_vm1 = vcmp.eq.s32.totalorder %v4910_v26, %v5320_v54  ;;  %vm1927_vm2 = vcmp.eq.s32.totalorder %v4913_v37, %v5320_v54  ;;  %vm1991_vm3 = vcmp.eq.s32.totalorder %v4926_v18, %v5320_v54 }
 0x1f9   : > { %vm2055_vm4 = vcmp.eq.s32.totalorder %v4901_v25, %v5320_v54  ;;  %vm2119_vm5 = vcmp.eq.s32.totalorder %v4916_v29, %v5320_v54  ;;  %vm2183_vm6 = vcmp.eq.s32.totalorder %v4919_v16, %v5320_v54  ;;  %vm2247_vm7 = vcmp.eq.s32.totalorder %v4929_v33, %v5320_v54 }
 0x1fa   : > { %v2311_v59 = vsel %vm1799_vm0, %v1300_v38, 0.0  ;;  %v2375_v27 = vsel %vm1863_vm1, %v1300_v38, 0.0  ;;  %v2439_v51 = vsel %vm1927_vm2, %v1300_v38, 0.0  ;;  %v2503_v53 = vsel %vm1991_vm3, %v1300_v38, 0.0 }
 0x1fb   : > { %v2567_v2 = vsel %vm2055_vm4, %v1300_v38, 0.0  ;;  %v2631_v46 = vsel %vm2119_vm5, %v1300_v38, 0.0  ;;  %v2695_v41 = vsel %vm2183_vm6, %v1300_v38, 0.0  ;;  %v2759_v8 = vsel %vm2247_vm7, %v1300_v38, 0.0 }
 0x1fc   : > { %v2823_v45 = vadd.f32 %v2822_v17, %v2311_v59  ;;  %v2892_v47 = vadd.f32 %v2891_v40, %v2375_v27  ;;  %v2961_v62 = vadd.f32 %v2960_v4, %v2439_v51  ;;  %v3030_v56 = vadd.f32 %v3029_v3, %v2503_v53  ;;  %v1321_v59 = vpop.xlane.xlu1 %1320 }
 0x1fd   : > { %v3099_v58 = vadd.f32 %v3098_v13, %v2567_v2  ;;  %v3168_v9 = vadd.f32 %v3167_v49, %v2631_v46  ;;  %v3237_v10 = vadd.f32 %v3236_v48, %v2695_v41  ;;  %v3306_v15 = vadd.f32 %v3305_v43, %v2759_v8 }
 0x1fe   : > { %vm1800_vm8 = vcmp.eq.s32.totalorder %v4898_v30, %v5323_v63  ;;  %vm1864_vm9 = vcmp.eq.s32.totalorder %v4910_v26, %v5323_v63  ;;  %vm1928_vm10 = vcmp.eq.s32.totalorder %v4913_v37, %v5323_v63  ;;  %vm1992_vm11 = vcmp.eq.s32.totalorder %v4926_v18, %v5323_v63 }
 0x1ff   : > { %vm2056_vm12 = vcmp.eq.s32.totalorder %v4901_v25, %v5323_v63  ;;  %vm2120_vm13 = vcmp.eq.s32.totalorder %v4916_v29, %v5323_v63  ;;  %vm2184_vm14 = vcmp.eq.s32.totalorder %v4919_v16, %v5323_v63  ;;  %vm2248_vm15 = vcmp.eq.s32.totalorder %v4929_v33, %v5323_v63 }
 0x200   : > { %v2312_v54 = vsel %vm1800_vm8, %v1307_v11, 0.0  ;;  %v2376_v20 = vsel %vm1864_vm9, %v1307_v11, 0.0  ;;  %v2440_v24 = vsel %vm1928_vm10, %v1307_v11, 0.0  ;;  %v2504_v12 = vsel %vm1992_vm11, %v1307_v11, 0.0 }
 0x201   : > { %v2568_v60 = vsel %vm2056_vm12, %v1307_v11, 0.0  ;;  %v2632_v7 = vsel %vm2120_vm13, %v1307_v11, 0.0  ;;  %v2696_v31 = vsel %vm2184_vm14, %v1307_v11, 0.0  ;;  %v2760_v0 = vsel %vm2248_vm15, %v1307_v11, 0.0  ;;  %v1328_v11 = vpop.xlane.xlu0 %1327 }
 0x202   : > { %v2824_v14 = vadd.f32 %v2823_v45, %v2312_v54  ;;  %v2893_v21 = vadd.f32 %v2892_v47, %v2376_v20  ;;  %v2962_v36 = vadd.f32 %v2961_v62, %v2440_v24  ;;  %v3031_v42 = vadd.f32 %v3030_v56, %v2504_v12 }
 0x203   : > { %v3100_v34 = vadd.f32 %v3099_v58, %v2568_v60  ;;  %v3169_v19 = vadd.f32 %v3168_v9, %v2632_v7  ;;  %v3238_v6 = vadd.f32 %v3237_v10, %v2696_v31  ;;  %v3307_v22 = vadd.f32 %v3306_v15, %v2760_v0 }
 0x204   : > { %vm1801_vm0 = vcmp.eq.s32.totalorder %v4898_v30, %v5326_v50  ;;  %vm1865_vm1 = vcmp.eq.s32.totalorder %v4910_v26, %v5326_v50  ;;  %vm1929_vm2 = vcmp.eq.s32.totalorder %v4913_v37, %v5326_v50  ;;  %vm1993_vm3 = vcmp.eq.s32.totalorder %v4926_v18, %v5326_v50 }
 0x205   : > { %vm2057_vm4 = vcmp.eq.s32.totalorder %v4901_v25, %v5326_v50  ;;  %vm2121_vm5 = vcmp.eq.s32.totalorder %v4916_v29, %v5326_v50  ;;  %vm2185_vm6 = vcmp.eq.s32.totalorder %v4919_v16, %v5326_v50  ;;  %vm2249_vm7 = vcmp.eq.s32.totalorder %v4929_v33, %v5326_v50 }
 0x206   : > { %v2313_v63 = vsel %vm1801_vm0, %v1314_v44, 0.0  ;;  %v2377_v35 = vsel %vm1865_vm1, %v1314_v44, 0.0  ;;  %v2441_v23 = vsel %vm1929_vm2, %v1314_v44, 0.0  ;;  %v2505_v55 = vsel %vm1993_vm3, %v1314_v44, 0.0 }
 0x207   : > { %v2569_v52 = vsel %vm2057_vm4, %v1314_v44, 0.0  ;;  %v2633_v5 = vsel %vm2121_vm5, %v1314_v44, 0.0  ;;  %v2697_v39 = vsel %vm2185_vm6, %v1314_v44, 0.0  ;;  %v2761_v17 = vsel %vm2249_vm7, %v1314_v44, 0.0 }
 0x208   : > { %v2825_v40 = vadd.f32 %v2824_v14, %v2313_v63  ;;  %v2894_v4 = vadd.f32 %v2893_v21, %v2377_v35  ;;  %v2963_v3 = vadd.f32 %v2962_v36, %v2441_v23  ;;  %v3032_v13 = vadd.f32 %v3031_v42, %v2505_v55  ;;  %v1335_v35 = vpop.xlane.xlu1 %1334 }
 0x209   : > { %v3101_v49 = vadd.f32 %v3100_v34, %v2569_v52  ;;  %v3170_v48 = vadd.f32 %v3169_v19, %v2633_v5  ;;  %v3239_v43 = vadd.f32 %v3238_v6, %v2697_v39  ;;  %v3308_v38 = vadd.f32 %v3307_v22, %v2761_v17 }
 0x20a   : > { %vm1802_vm8 = vcmp.eq.s32.totalorder %v4898_v30, %v5329_v61  ;;  %vm1866_vm9 = vcmp.eq.s32.totalorder %v4910_v26, %v5329_v61  ;;  %vm1930_vm10 = vcmp.eq.s32.totalorder %v4913_v37, %v5329_v61  ;;  %vm1994_vm11 = vcmp.eq.s32.totalorder %v4926_v18, %v5329_v61 }
 0x20b   : > { %vm2058_vm12 = vcmp.eq.s32.totalorder %v4901_v25, %v5329_v61  ;;  %vm2122_vm13 = vcmp.eq.s32.totalorder %v4916_v29, %v5329_v61  ;;  %vm2186_vm14 = vcmp.eq.s32.totalorder %v4919_v16, %v5329_v61  ;;  %vm2250_vm15 = vcmp.eq.s32.totalorder %v4929_v33, %v5329_v61 }
 0x20c   : > { %v2314_v50 = vsel %vm1802_vm8, %v1321_v59, 0.0  ;;  %v2378_v27 = vsel %vm1866_vm9, %v1321_v59, 0.0  ;;  %v2442_v51 = vsel %vm1930_vm10, %v1321_v59, 0.0  ;;  %v2506_v53 = vsel %vm1994_vm11, %v1321_v59, 0.0 }
 0x20d   : > { %v2570_v2 = vsel %vm2058_vm12, %v1321_v59, 0.0  ;;  %v2634_v46 = vsel %vm2122_vm13, %v1321_v59, 0.0  ;;  %v2698_v41 = vsel %vm2186_vm14, %v1321_v59, 0.0  ;;  %v2762_v8 = vsel %vm2250_vm15, %v1321_v59, 0.0 }
 0x20e   : > { %v2826_v45 = vadd.f32 %v2825_v40, %v2314_v50  ;;  %v2895_v47 = vadd.f32 %v2894_v4, %v2378_v27  ;;  %v2964_v62 = vadd.f32 %v2963_v3, %v2442_v51  ;;  %v3033_v56 = vadd.f32 %v3032_v13, %v2506_v53 }
 0x20f   : > { %v3102_v58 = vadd.f32 %v3101_v49, %v2570_v2  ;;  %v3171_v9 = vadd.f32 %v3170_v48, %v2634_v46  ;;  %v3240_v10 = vadd.f32 %v3239_v43, %v2698_v41  ;;  %v3309_v15 = vadd.f32 %v3308_v38, %v2762_v8 }
 0x210   : > { %vm1803_vm0 = vcmp.eq.s32.totalorder %v4898_v30, %v5332_v57  ;;  %vm1867_vm1 = vcmp.eq.s32.totalorder %v4910_v26, %v5332_v57  ;;  %vm1931_vm2 = vcmp.eq.s32.totalorder %v4913_v37, %v5332_v57  ;;  %vm1995_vm3 = vcmp.eq.s32.totalorder %v4926_v18, %v5332_v57 }
 0x211   : > { %vm2059_vm4 = vcmp.eq.s32.totalorder %v4901_v25, %v5332_v57  ;;  %vm2123_vm5 = vcmp.eq.s32.totalorder %v4916_v29, %v5332_v57  ;;  %vm2187_vm6 = vcmp.eq.s32.totalorder %v4919_v16, %v5332_v57  ;;  %vm2251_vm7 = vcmp.eq.s32.totalorder %v4929_v33, %v5332_v57 }
 0x212   : > { %v2315_v61 = vsel %vm1803_vm0, %v1328_v11, 0.0  ;;  %v2379_v54 = vsel %vm1867_vm1, %v1328_v11, 0.0  ;;  %v2443_v20 = vsel %vm1931_vm2, %v1328_v11, 0.0  ;;  %v2507_v24 = vsel %vm1995_vm3, %v1328_v11, 0.0 }
 0x213   : > { %v2571_v12 = vsel %vm2059_vm4, %v1328_v11, 0.0  ;;  %v2635_v60 = vsel %vm2123_vm5, %v1328_v11, 0.0  ;;  %v2699_v7 = vsel %vm2187_vm6, %v1328_v11, 0.0  ;;  %v2763_v31 = vsel %vm2251_vm7, %v1328_v11, 0.0 }
 0x214   : > { %v2827_v0 = vadd.f32 %v2826_v45, %v2315_v61  ;;  %v2896_v14 = vadd.f32 %v2895_v47, %v2379_v54  ;;  %v2965_v21 = vadd.f32 %v2964_v62, %v2443_v20  ;;  %v3034_v36 = vadd.f32 %v3033_v56, %v2507_v24  ;;  %v1342_v45 = vpop.xlane.xlu0 %1341 }
 0x215   : > { %v3103_v42 = vadd.f32 %v3102_v58, %v2571_v12  ;;  %v3172_v34 = vadd.f32 %v3171_v9, %v2635_v60  ;;  %v3241_v19 = vadd.f32 %v3240_v10, %v2699_v7  ;;  %v3310_v6 = vadd.f32 %v3309_v15, %v2763_v31 }
 0x216   : > { %v1659_v22 = vadd.s32 %v4837_v32, %v5335_v1  ;;  %v1595_v57 = vadd.s32 256, %v6048_v28  ;;  %v1596_v44 = vadd.s32 264, %v6048_v28  ;;  %v1597_v63 = vadd.s32 272, %v6048_v28 }
 0x217   : > { %v1598_v23 = vadd.s32 280, %v6048_v28  ;;  %v1599_v55 = vadd.s32 288, %v6048_v28  ;;  %v1600_v52 = vadd.s32 296, %v6048_v28  ;;  %v1601_v5 = vadd.s32 304, %v6048_v28 }
 0x218   : > { %vm1804_vm8 = vcmp.eq.s32.totalorder %v4898_v30, %v1659_v22  ;;  %vm1868_vm9 = vcmp.eq.s32.totalorder %v4910_v26, %v1659_v22  ;;  %vm1932_vm10 = vcmp.eq.s32.totalorder %v4913_v37, %v1659_v22  ;;  %vm1996_vm11 = vcmp.eq.s32.totalorder %v4926_v18, %v1659_v22 }
 0x219   : > { %vm2060_vm12 = vcmp.eq.s32.totalorder %v4901_v25, %v1659_v22  ;;  %vm2124_vm13 = vcmp.eq.s32.totalorder %v4916_v29, %v1659_v22  ;;  %vm2188_vm14 = vcmp.eq.s32.totalorder %v4919_v16, %v1659_v22  ;;  %vm2252_vm15 = vcmp.eq.s32.totalorder %v4929_v33, %v1659_v22 }
 0x21a   : > { %v2316_v1 = vsel %vm1804_vm8, %v1335_v35, 0.0  ;;  %v2380_v39 = vsel %vm1868_vm9, %v1335_v35, 0.0  ;;  %v2444_v17 = vsel %vm1932_vm10, %v1335_v35, 0.0  ;;  %v2508_v40 = vsel %vm1996_vm11, %v1335_v35, 0.0 }
 0x21b   : > { %v2572_v4 = vsel %vm2060_vm12, %v1335_v35, 0.0  ;;  %v2636_v3 = vsel %vm2124_vm13, %v1335_v35, 0.0  ;;  %v2700_v13 = vsel %vm2188_vm14, %v1335_v35, 0.0  ;;  %v2764_v49 = vsel %vm2252_vm15, %v1335_v35, 0.0 }
 0x21c   : > { %v2828_v48 = vadd.f32 %v2827_v0, %v2316_v1  ;;  %v2897_v43 = vadd.f32 %v2896_v14, %v2380_v39  ;;  %v2966_v38 = vadd.f32 %v2965_v21, %v2444_v17  ;;  %v3035_v59 = vadd.f32 %v3034_v36, %v2508_v40 }
 0x21d   : > { %v3104_v50 = vadd.f32 %v3103_v42, %v2572_v4  ;;  %v3173_v27 = vadd.f32 %v3172_v34, %v2636_v3  ;;  %v3242_v51 = vadd.f32 %v3241_v19, %v2700_v13  ;;  %v3311_v53 = vadd.f32 %v3310_v6, %v2764_v49  ;;  %v1349_v42 = vpop.xlane.xlu1 %1348  ;;  %v1356_v4 = vpop.xlane.xlu0 %1355 }
 0x21e   : > { %v1660_v2 = vadd.s32 %v4837_v32, %v1595_v57  ;;  %v1661_v46 = vadd.s32 %v4837_v32, %v1596_v44  ;;  %v5453_v41 = vadd.s32 %v4837_v32, %v1597_v63  ;;  %v5456_v8 = vadd.s32 %v4837_v32, %v1598_v23 }
 0x21f   : > { %v5459_v47 = vadd.s32 %v4837_v32, %v1599_v55  ;;  %v5462_v62 = vadd.s32 %v4837_v32, %v1600_v52  ;;  %v5465_v56 = vadd.s32 %v4837_v32, %v1601_v5  ;;  %v5468_v58 = vadd.s32 312, %v6048_v28 }
 0x220   : > { %vm1805_vm0 = vcmp.eq.s32.totalorder %v4898_v30, %v1660_v2  ;;  %vm1869_vm1 = vcmp.eq.s32.totalorder %v4910_v26, %v1660_v2  ;;  %vm1933_vm2 = vcmp.eq.s32.totalorder %v4913_v37, %v1660_v2  ;;  %vm1997_vm3 = vcmp.eq.s32.totalorder %v4926_v18, %v1660_v2 }
 0x221   : > { %vm2061_vm4 = vcmp.eq.s32.totalorder %v4901_v25, %v1660_v2  ;;  %vm2125_vm5 = vcmp.eq.s32.totalorder %v4916_v29, %v1660_v2  ;;  %vm2189_vm6 = vcmp.eq.s32.totalorder %v4919_v16, %v1660_v2  ;;  %vm2253_vm7 = vcmp.eq.s32.totalorder %v4929_v33, %v1660_v2 }
 0x222   : > { %v2317_v9 = vsel %vm1805_vm0, %v1342_v45, 0.0  ;;  %v2381_v10 = vsel %vm1869_vm1, %v1342_v45, 0.0  ;;  %v2445_v15 = vsel %vm1933_vm2, %v1342_v45, 0.0  ;;  %v2509_v11 = vsel %vm1997_vm3, %v1342_v45, 0.0 }
 0x223   : > { %v2573_v61 = vsel %vm2061_vm4, %v1342_v45, 0.0  ;;  %v2637_v54 = vsel %vm2125_vm5, %v1342_v45, 0.0  ;;  %v2701_v20 = vsel %vm2189_vm6, %v1342_v45, 0.0  ;;  %v2765_v24 = vsel %vm2253_vm7, %v1342_v45, 0.0 }
 0x224   : > { %v2829_v12 = vadd.f32 %v2828_v48, %v2317_v9  ;;  %v2898_v60 = vadd.f32 %v2897_v43, %v2381_v10  ;;  %v2967_v7 = vadd.f32 %v2966_v38, %v2445_v15  ;;  %v3036_v31 = vadd.f32 %v3035_v59, %v2509_v11  ;;  %v1363_v15 = vpop.xlane.xlu1 %1362 }
 0x225   : > { %v3105_v0 = vadd.f32 %v3104_v50, %v2573_v61  ;;  %v3174_v14 = vadd.f32 %v3173_v27, %v2637_v54  ;;  %v3243_v21 = vadd.f32 %v3242_v51, %v2701_v20  ;;  %v3312_v36 = vadd.f32 %v3311_v53, %v2765_v24 }
 0x226   : > { %vm1806_vm8 = vcmp.eq.s32.totalorder %v4898_v30, %v1661_v46  ;;  %vm1870_vm9 = vcmp.eq.s32.totalorder %v4910_v26, %v1661_v46  ;;  %vm1934_vm10 = vcmp.eq.s32.totalorder %v4913_v37, %v1661_v46  ;;  %vm1998_vm11 = vcmp.eq.s32.totalorder %v4926_v18, %v1661_v46 }
 0x227   : > { %vm2062_vm12 = vcmp.eq.s32.totalorder %v4901_v25, %v1661_v46  ;;  %vm2126_vm13 = vcmp.eq.s32.totalorder %v4916_v29, %v1661_v46  ;;  %vm2190_vm14 = vcmp.eq.s32.totalorder %v4919_v16, %v1661_v46  ;;  %vm2254_vm15 = vcmp.eq.s32.totalorder %v4929_v33, %v1661_v46 }
 0x228   : > { %v2318_v34 = vsel %vm1806_vm8, %v1349_v42, 0.0  ;;  %v2382_v19 = vsel %vm1870_vm9, %v1349_v42, 0.0  ;;  %v2446_v6 = vsel %vm1934_vm10, %v1349_v42, 0.0  ;;  %v2510_v22 = vsel %vm1998_vm11, %v1349_v42, 0.0 }
 0x229   : > { %v2574_v57 = vsel %vm2062_vm12, %v1349_v42, 0.0  ;;  %v2638_v44 = vsel %vm2126_vm13, %v1349_v42, 0.0  ;;  %v2702_v63 = vsel %vm2190_vm14, %v1349_v42, 0.0  ;;  %v2766_v35 = vsel %vm2254_vm15, %v1349_v42, 0.0 }
 0x22a   : > { %v2830_v23 = vadd.f32 %v2829_v12, %v2318_v34  ;;  %v2899_v55 = vadd.f32 %v2898_v60, %v2382_v19  ;;  %v2968_v52 = vadd.f32 %v2967_v7, %v2446_v6  ;;  %v3037_v5 = vadd.f32 %v3036_v31, %v2510_v22  ;;  %v1370_v19 = vpop.xlane.xlu0 %1369 }
 0x22b   : > { %v3106_v1 = vadd.f32 %v3105_v0, %v2574_v57  ;;  %v3175_v39 = vadd.f32 %v3174_v14, %v2638_v44  ;;  %v3244_v17 = vadd.f32 %v3243_v21, %v2702_v63  ;;  %v3313_v40 = vadd.f32 %v3312_v36, %v2766_v35 }
 0x22c   : > { %vm1807_vm0 = vcmp.eq.s32.totalorder %v4898_v30, %v5453_v41  ;;  %vm1871_vm1 = vcmp.eq.s32.totalorder %v4910_v26, %v5453_v41  ;;  %vm1935_vm2 = vcmp.eq.s32.totalorder %v4913_v37, %v5453_v41  ;;  %vm1999_vm3 = vcmp.eq.s32.totalorder %v4926_v18, %v5453_v41 }
 0x22d   : > { %vm2063_vm4 = vcmp.eq.s32.totalorder %v4901_v25, %v5453_v41  ;;  %vm2127_vm5 = vcmp.eq.s32.totalorder %v4916_v29, %v5453_v41  ;;  %vm2191_vm6 = vcmp.eq.s32.totalorder %v4919_v16, %v5453_v41  ;;  %vm2255_vm7 = vcmp.eq.s32.totalorder %v4929_v33, %v5453_v41 }
 0x22e   : > { %v2319_v3 = vsel %vm1807_vm0, %v1356_v4, 0.0  ;;  %v2383_v13 = vsel %vm1871_vm1, %v1356_v4, 0.0  ;;  %v2447_v49 = vsel %vm1935_vm2, %v1356_v4, 0.0  ;;  %v2511_v48 = vsel %vm1999_vm3, %v1356_v4, 0.0 }
 0x22f   : > { %v2575_v43 = vsel %vm2063_vm4, %v1356_v4, 0.0  ;;  %v2639_v38 = vsel %vm2127_vm5, %v1356_v4, 0.0  ;;  %v2703_v59 = vsel %vm2191_vm6, %v1356_v4, 0.0  ;;  %v2767_v50 = vsel %vm2255_vm7, %v1356_v4, 0.0 }
 0x230   : > { %v2831_v27 = vadd.f32 %v2830_v23, %v2319_v3  ;;  %v2900_v51 = vadd.f32 %v2899_v55, %v2383_v13  ;;  %v2969_v53 = vadd.f32 %v2968_v52, %v2447_v49  ;;  %v3038_v2 = vadd.f32 %v3037_v5, %v2511_v48  ;;  %v1377_v3 = vpop.xlane.xlu1 %1376 }
 0x231   : > { %v3107_v46 = vadd.f32 %v3106_v1, %v2575_v43  ;;  %v3176_v45 = vadd.f32 %v3175_v39, %v2639_v38  ;;  %v3245_v9 = vadd.f32 %v3244_v17, %v2703_v59  ;;  %v3314_v10 = vadd.f32 %v3313_v40, %v2767_v50 }
 0x232   : > { %vm1808_vm8 = vcmp.eq.s32.totalorder %v4898_v30, %v5456_v8  ;;  %vm1872_vm9 = vcmp.eq.s32.totalorder %v4910_v26, %v5456_v8  ;;  %vm1936_vm10 = vcmp.eq.s32.totalorder %v4913_v37, %v5456_v8  ;;  %vm2000_vm11 = vcmp.eq.s32.totalorder %v4926_v18, %v5456_v8 }
 0x233   : > { %vm2064_vm12 = vcmp.eq.s32.totalorder %v4901_v25, %v5456_v8  ;;  %vm2128_vm13 = vcmp.eq.s32.totalorder %v4916_v29, %v5456_v8  ;;  %vm2192_vm14 = vcmp.eq.s32.totalorder %v4919_v16, %v5456_v8  ;;  %vm2256_vm15 = vcmp.eq.s32.totalorder %v4929_v33, %v5456_v8 }
 0x234   : > { %v2320_v41 = vsel %vm1808_vm8, %v1363_v15, 0.0  ;;  %v2384_v11 = vsel %vm1872_vm9, %v1363_v15, 0.0  ;;  %v2448_v61 = vsel %vm1936_vm10, %v1363_v15, 0.0  ;;  %v2512_v54 = vsel %vm2000_vm11, %v1363_v15, 0.0 }
 0x235   : > { %v2576_v20 = vsel %vm2064_vm12, %v1363_v15, 0.0  ;;  %v2640_v24 = vsel %vm2128_vm13, %v1363_v15, 0.0  ;;  %v2704_v12 = vsel %vm2192_vm14, %v1363_v15, 0.0  ;;  %v2768_v60 = vsel %vm2256_vm15, %v1363_v15, 0.0  ;;  %v1384_v15 = vpop.xlane.xlu0 %1383 }
 0x236   : > { %v2832_v7 = vadd.f32 %v2831_v27, %v2320_v41  ;;  %v2901_v31 = vadd.f32 %v2900_v51, %v2384_v11  ;;  %v2970_v0 = vadd.f32 %v2969_v53, %v2448_v61  ;;  %v3039_v14 = vadd.f32 %v3038_v2, %v2512_v54 }
 0x237   : > { %v3108_v21 = vadd.f32 %v3107_v46, %v2576_v20  ;;  %v3177_v36 = vadd.f32 %v3176_v45, %v2640_v24  ;;  %v3246_v42 = vadd.f32 %v3245_v9, %v2704_v12  ;;  %v3315_v34 = vadd.f32 %v3314_v10, %v2768_v60 }
 0x238   : > { %vm1809_vm0 = vcmp.eq.s32.totalorder %v4898_v30, %v5459_v47  ;;  %vm1873_vm1 = vcmp.eq.s32.totalorder %v4910_v26, %v5459_v47  ;;  %vm1937_vm2 = vcmp.eq.s32.totalorder %v4913_v37, %v5459_v47  ;;  %vm2001_vm3 = vcmp.eq.s32.totalorder %v4926_v18, %v5459_v47 }
 0x239   : > { %vm2065_vm4 = vcmp.eq.s32.totalorder %v4901_v25, %v5459_v47  ;;  %vm2129_vm5 = vcmp.eq.s32.totalorder %v4916_v29, %v5459_v47  ;;  %vm2193_vm6 = vcmp.eq.s32.totalorder %v4919_v16, %v5459_v47  ;;  %vm2257_vm7 = vcmp.eq.s32.totalorder %v4929_v33, %v5459_v47 }
 0x23a   : > { %v2321_v8 = vsel %vm1809_vm0, %v1370_v19, 0.0  ;;  %v2385_v6 = vsel %vm1873_vm1, %v1370_v19, 0.0  ;;  %v2449_v22 = vsel %vm1937_vm2, %v1370_v19, 0.0  ;;  %v2513_v57 = vsel %vm2001_vm3, %v1370_v19, 0.0 }
 0x23b   : > { %v2577_v44 = vsel %vm2065_vm4, %v1370_v19, 0.0  ;;  %v2641_v63 = vsel %vm2129_vm5, %v1370_v19, 0.0  ;;  %v2705_v35 = vsel %vm2193_vm6, %v1370_v19, 0.0  ;;  %v2769_v23 = vsel %vm2257_vm7, %v1370_v19, 0.0 }
 0x23c   : > { %v2833_v55 = vadd.f32 %v2832_v7, %v2321_v8  ;;  %v2902_v52 = vadd.f32 %v2901_v31, %v2385_v6  ;;  %v2971_v5 = vadd.f32 %v2970_v0, %v2449_v22  ;;  %v3040_v1 = vadd.f32 %v3039_v14, %v2513_v57  ;;  %v1391_v6 = vpop.xlane.xlu1 %1390 }
 0x23d   : > { %v3109_v39 = vadd.f32 %v3108_v21, %v2577_v44  ;;  %v3178_v17 = vadd.f32 %v3177_v36, %v2641_v63  ;;  %v3247_v40 = vadd.f32 %v3246_v42, %v2705_v35  ;;  %v3316_v4 = vadd.f32 %v3315_v34, %v2769_v23 }
 0x23e   : > { %vm1810_vm8 = vcmp.eq.s32.totalorder %v4898_v30, %v5462_v62  ;;  %vm1874_vm9 = vcmp.eq.s32.totalorder %v4910_v26, %v5462_v62  ;;  %vm1938_vm10 = vcmp.eq.s32.totalorder %v4913_v37, %v5462_v62  ;;  %vm2002_vm11 = vcmp.eq.s32.totalorder %v4926_v18, %v5462_v62 }
 0x23f   : > { %vm2066_vm12 = vcmp.eq.s32.totalorder %v4901_v25, %v5462_v62  ;;  %vm2130_vm13 = vcmp.eq.s32.totalorder %v4916_v29, %v5462_v62  ;;  %vm2194_vm14 = vcmp.eq.s32.totalorder %v4919_v16, %v5462_v62  ;;  %vm2258_vm15 = vcmp.eq.s32.totalorder %v4929_v33, %v5462_v62 }
 0x240   : > { %v2322_v47 = vsel %vm1810_vm8, %v1377_v3, 0.0  ;;  %v2386_v13 = vsel %vm1874_vm9, %v1377_v3, 0.0  ;;  %v2450_v49 = vsel %vm1938_vm10, %v1377_v3, 0.0  ;;  %v2514_v48 = vsel %vm2002_vm11, %v1377_v3, 0.0 }
 0x241   : > { %v2578_v43 = vsel %vm2066_vm12, %v1377_v3, 0.0  ;;  %v2642_v38 = vsel %vm2130_vm13, %v1377_v3, 0.0  ;;  %v2706_v59 = vsel %vm2194_vm14, %v1377_v3, 0.0  ;;  %v2770_v50 = vsel %vm2258_vm15, %v1377_v3, 0.0 }
 0x242   : > { %v2834_v27 = vadd.f32 %v2833_v55, %v2322_v47  ;;  %v2903_v51 = vadd.f32 %v2902_v52, %v2386_v13  ;;  %v2972_v53 = vadd.f32 %v2971_v5, %v2450_v49  ;;  %v3041_v2 = vadd.f32 %v3040_v1, %v2514_v48 }
 0x243   : > { %v3110_v46 = vadd.f32 %v3109_v39, %v2578_v43  ;;  %v3179_v45 = vadd.f32 %v3178_v17, %v2642_v38  ;;  %v3248_v9 = vadd.f32 %v3247_v40, %v2706_v59  ;;  %v3317_v10 = vadd.f32 %v3316_v4, %v2770_v50 }
 0x244   : > { %vm1811_vm0 = vcmp.eq.s32.totalorder %v4898_v30, %v5465_v56  ;;  %vm1875_vm1 = vcmp.eq.s32.totalorder %v4910_v26, %v5465_v56  ;;  %vm1939_vm2 = vcmp.eq.s32.totalorder %v4913_v37, %v5465_v56  ;;  %vm2003_vm3 = vcmp.eq.s32.totalorder %v4926_v18, %v5465_v56 }
 0x245   : > { %vm2067_vm4 = vcmp.eq.s32.totalorder %v4901_v25, %v5465_v56  ;;  %vm2131_vm5 = vcmp.eq.s32.totalorder %v4916_v29, %v5465_v56  ;;  %vm2195_vm6 = vcmp.eq.s32.totalorder %v4919_v16, %v5465_v56  ;;  %vm2259_vm7 = vcmp.eq.s32.totalorder %v4929_v33, %v5465_v56 }
 0x246   : > { %v2323_v62 = vsel %vm1811_vm0, %v1384_v15, 0.0  ;;  %v2387_v41 = vsel %vm1875_vm1, %v1384_v15, 0.0  ;;  %v2451_v11 = vsel %vm1939_vm2, %v1384_v15, 0.0  ;;  %v2515_v61 = vsel %vm2003_vm3, %v1384_v15, 0.0 }
 0x247   : > { %v2579_v54 = vsel %vm2067_vm4, %v1384_v15, 0.0  ;;  %v2643_v20 = vsel %vm2131_vm5, %v1384_v15, 0.0  ;;  %v2707_v24 = vsel %vm2195_vm6, %v1384_v15, 0.0  ;;  %v2771_v12 = vsel %vm2259_vm7, %v1384_v15, 0.0 }
 0x248   : > { %v2835_v60 = vadd.f32 %v2834_v27, %v2323_v62  ;;  %v2904_v7 = vadd.f32 %v2903_v51, %v2387_v41  ;;  %v2973_v31 = vadd.f32 %v2972_v53, %v2451_v11  ;;  %v3042_v0 = vadd.f32 %v3041_v2, %v2515_v61  ;;  %v1398_v27 = vpop.xlane.xlu0 %1397 }
 0x249   : > { %v3111_v14 = vadd.f32 %v3110_v46, %v2579_v54  ;;  %v3180_v21 = vadd.f32 %v3179_v45, %v2643_v20  ;;  %v3249_v36 = vadd.f32 %v3248_v9, %v2707_v24  ;;  %v3318_v42 = vadd.f32 %v3317_v10, %v2771_v12 }
 0x24a   : > { %v1667_v34 = vadd.s32 %v4837_v32, %v5468_v58  ;;  %v1603_v56 = vadd.s32 320, %v6048_v28  ;;  %v1604_v19 = vadd.s32 328, %v6048_v28  ;;  %v1605_v8 = vadd.s32 336, %v6048_v28 }
 0x24b   : > { %v1606_v22 = vadd.s32 344, %v6048_v28  ;;  %v1607_v57 = vadd.s32 352, %v6048_v28  ;;  %v1608_v44 = vadd.s32 360, %v6048_v28  ;;  %v1609_v63 = vadd.s32 368, %v6048_v28 }
 0x24c   : > { %vm1812_vm8 = vcmp.eq.s32.totalorder %v4898_v30, %v1667_v34  ;;  %vm1876_vm9 = vcmp.eq.s32.totalorder %v4910_v26, %v1667_v34  ;;  %vm1940_vm10 = vcmp.eq.s32.totalorder %v4913_v37, %v1667_v34  ;;  %vm2004_vm11 = vcmp.eq.s32.totalorder %v4926_v18, %v1667_v34 }
 0x24d   : > { %vm2068_vm12 = vcmp.eq.s32.totalorder %v4901_v25, %v1667_v34  ;;  %vm2132_vm13 = vcmp.eq.s32.totalorder %v4916_v29, %v1667_v34  ;;  %vm2196_vm14 = vcmp.eq.s32.totalorder %v4919_v16, %v1667_v34  ;;  %vm2260_vm15 = vcmp.eq.s32.totalorder %v4929_v33, %v1667_v34 }
 0x24e   : > { %v2324_v58 = vsel %vm1812_vm8, %v1391_v6, 0.0  ;;  %v2388_v35 = vsel %vm1876_vm9, %v1391_v6, 0.0  ;;  %v2452_v23 = vsel %vm1940_vm10, %v1391_v6, 0.0  ;;  %v2516_v55 = vsel %vm2004_vm11, %v1391_v6, 0.0 }
 0x24f   : > { %v2580_v52 = vsel %vm2068_vm12, %v1391_v6, 0.0  ;;  %v2644_v5 = vsel %vm2132_vm13, %v1391_v6, 0.0  ;;  %v2708_v1 = vsel %vm2196_vm14, %v1391_v6, 0.0  ;;  %v2772_v39 = vsel %vm2260_vm15, %v1391_v6, 0.0 }
 0x250   : > { %v2836_v17 = vadd.f32 %v2835_v60, %v2324_v58  ;;  %v2905_v40 = vadd.f32 %v2904_v7, %v2388_v35  ;;  %v2974_v4 = vadd.f32 %v2973_v31, %v2452_v23  ;;  %v3043_v3 = vadd.f32 %v3042_v0, %v2516_v55 }
 0x251   : > { %v3112_v47 = vadd.f32 %v3111_v14, %v2580_v52  ;;  %v3181_v13 = vadd.f32 %v3180_v21, %v2644_v5  ;;  %v3250_v49 = vadd.f32 %v3249_v36, %v2708_v1  ;;  %v3319_v48 = vadd.f32 %v3318_v42, %v2772_v39  ;;  %v1405_v14 = vpop.xlane.xlu1 %1404  ;;  %v1412_v52 = vpop.xlane.xlu0 %1411 }
 0x252   : > { %v1668_v43 = vadd.s32 %v4837_v32, %v1603_v56  ;;  %v1669_v38 = vadd.s32 %v4837_v32, %v1604_v19  ;;  %v5586_v59 = vadd.s32 %v4837_v32, %v1605_v8  ;;  %v5589_v50 = vadd.s32 %v4837_v32, %v1606_v22 }
 0x253   : > { %v5592_v51 = vadd.s32 %v4837_v32, %v1607_v57  ;;  %v5595_v53 = vadd.s32 %v4837_v32, %v1608_v44  ;;  %v5598_v2 = vadd.s32 %v4837_v32, %v1609_v63  ;;  %v5601_v46 = vadd.s32 376, %v6048_v28 }
 0x254   : > { %vm1813_vm0 = vcmp.eq.s32.totalorder %v4898_v30, %v1668_v43  ;;  %vm1877_vm1 = vcmp.eq.s32.totalorder %v4910_v26, %v1668_v43  ;;  %vm1941_vm2 = vcmp.eq.s32.totalorder %v4913_v37, %v1668_v43  ;;  %vm2005_vm3 = vcmp.eq.s32.totalorder %v4926_v18, %v1668_v43 }
 0x255   : > { %vm2069_vm4 = vcmp.eq.s32.totalorder %v4901_v25, %v1668_v43  ;;  %vm2133_vm5 = vcmp.eq.s32.totalorder %v4916_v29, %v1668_v43  ;;  %vm2197_vm6 = vcmp.eq.s32.totalorder %v4919_v16, %v1668_v43  ;;  %vm2261_vm7 = vcmp.eq.s32.totalorder %v4929_v33, %v1668_v43 }
 0x256   : > { %v2325_v45 = vsel %vm1813_vm0, %v1398_v27, 0.0  ;;  %v2389_v9 = vsel %vm1877_vm1, %v1398_v27, 0.0  ;;  %v2453_v10 = vsel %vm1941_vm2, %v1398_v27, 0.0  ;;  %v2517_v15 = vsel %vm2005_vm3, %v1398_v27, 0.0 }
 0x257   : > { %v2581_v62 = vsel %vm2069_vm4, %v1398_v27, 0.0  ;;  %v2645_v41 = vsel %vm2133_vm5, %v1398_v27, 0.0  ;;  %v2709_v11 = vsel %vm2197_vm6, %v1398_v27, 0.0  ;;  %v2773_v61 = vsel %vm2261_vm7, %v1398_v27, 0.0 }
 0x258   : > { %v2837_v54 = vadd.f32 %v2836_v17, %v2325_v45  ;;  %v2906_v20 = vadd.f32 %v2905_v40, %v2389_v9  ;;  %v2975_v24 = vadd.f32 %v2974_v4, %v2453_v10  ;;  %v3044_v12 = vadd.f32 %v3043_v3, %v2517_v15  ;;  %v1419_v10 = vpop.xlane.xlu1 %1418 }
 0x259   : > { %v3113_v60 = vadd.f32 %v3112_v47, %v2581_v62  ;;  %v3182_v7 = vadd.f32 %v3181_v13, %v2645_v41  ;;  %v3251_v31 = vadd.f32 %v3250_v49, %v2709_v11  ;;  %v3320_v0 = vadd.f32 %v3319_v48, %v2773_v61 }
 0x25a   : > { %vm1814_vm8 = vcmp.eq.s32.totalorder %v4898_v30, %v1669_v38  ;;  %vm1878_vm9 = vcmp.eq.s32.totalorder %v4910_v26, %v1669_v38  ;;  %vm1942_vm10 = vcmp.eq.s32.totalorder %v4913_v37, %v1669_v38  ;;  %vm2006_vm11 = vcmp.eq.s32.totalorder %v4926_v18, %v1669_v38 }
 0x25b   : > { %vm2070_vm12 = vcmp.eq.s32.totalorder %v4901_v25, %v1669_v38  ;;  %vm2134_vm13 = vcmp.eq.s32.totalorder %v4916_v29, %v1669_v38  ;;  %vm2198_vm14 = vcmp.eq.s32.totalorder %v4919_v16, %v1669_v38  ;;  %vm2262_vm15 = vcmp.eq.s32.totalorder %v4929_v33, %v1669_v38 }
 0x25c   : > { %v2326_v21 = vsel %vm1814_vm8, %v1405_v14, 0.0  ;;  %v2390_v36 = vsel %vm1878_vm9, %v1405_v14, 0.0  ;;  %v2454_v42 = vsel %vm1942_vm10, %v1405_v14, 0.0  ;;  %v2518_v34 = vsel %vm2006_vm11, %v1405_v14, 0.0 }
 0x25d   : > { %v2582_v56 = vsel %vm2070_vm12, %v1405_v14, 0.0  ;;  %v2646_v19 = vsel %vm2134_vm13, %v1405_v14, 0.0  ;;  %v2710_v8 = vsel %vm2198_vm14, %v1405_v14, 0.0  ;;  %v2774_v6 = vsel %vm2262_vm15, %v1405_v14, 0.0 }
 0x25e   : > { %v2838_v22 = vadd.f32 %v2837_v54, %v2326_v21  ;;  %v2907_v57 = vadd.f32 %v2906_v20, %v2390_v36  ;;  %v2976_v44 = vadd.f32 %v2975_v24, %v2454_v42  ;;  %v3045_v63 = vadd.f32 %v3044_v12, %v2518_v34  ;;  %v1426_v36 = vpop.xlane.xlu0 %1425 }
 0x25f   : > { %v3114_v58 = vadd.f32 %v3113_v60, %v2582_v56  ;;  %v3183_v35 = vadd.f32 %v3182_v7, %v2646_v19  ;;  %v3252_v23 = vadd.f32 %v3251_v31, %v2710_v8  ;;  %v3321_v55 = vadd.f32 %v3320_v0, %v2774_v6 }
 0x260   : > { %vm1815_vm0 = vcmp.eq.s32.totalorder %v4898_v30, %v5586_v59  ;;  %vm1879_vm1 = vcmp.eq.s32.totalorder %v4910_v26, %v5586_v59  ;;  %vm1943_vm2 = vcmp.eq.s32.totalorder %v4913_v37, %v5586_v59  ;;  %vm2007_vm3 = vcmp.eq.s32.totalorder %v4926_v18, %v5586_v59 }
 0x261   : > { %vm2071_vm4 = vcmp.eq.s32.totalorder %v4901_v25, %v5586_v59  ;;  %vm2135_vm5 = vcmp.eq.s32.totalorder %v4916_v29, %v5586_v59  ;;  %vm2199_vm6 = vcmp.eq.s32.totalorder %v4919_v16, %v5586_v59  ;;  %vm2263_vm7 = vcmp.eq.s32.totalorder %v4929_v33, %v5586_v59 }
 0x262   : > { %v2327_v5 = vsel %vm1815_vm0, %v1412_v52, 0.0  ;;  %v2391_v1 = vsel %vm1879_vm1, %v1412_v52, 0.0  ;;  %v2455_v39 = vsel %vm1943_vm2, %v1412_v52, 0.0  ;;  %v2519_v17 = vsel %vm2007_vm3, %v1412_v52, 0.0 }
 0x263   : > { %v2583_v40 = vsel %vm2071_vm4, %v1412_v52, 0.0  ;;  %v2647_v4 = vsel %vm2135_vm5, %v1412_v52, 0.0  ;;  %v2711_v3 = vsel %vm2199_vm6, %v1412_v52, 0.0  ;;  %v2775_v47 = vsel %vm2263_vm7, %v1412_v52, 0.0 }
 0x264   : > { %v2839_v13 = vadd.f32 %v2838_v22, %v2327_v5  ;;  %v2908_v49 = vadd.f32 %v2907_v57, %v2391_v1  ;;  %v2977_v48 = vadd.f32 %v2976_v44, %v2455_v39  ;;  %v3046_v43 = vadd.f32 %v3045_v63, %v2519_v17  ;;  %v1433_v5 = vpop.xlane.xlu1 %1432 }
 0x265   : > { %v3115_v38 = vadd.f32 %v3114_v58, %v2583_v40  ;;  %v3184_v27 = vadd.f32 %v3183_v35, %v2647_v4  ;;  %v3253_v45 = vadd.f32 %v3252_v23, %v2711_v3  ;;  %v3322_v9 = vadd.f32 %v3321_v55, %v2775_v47 }
 0x266   : > { %vm1816_vm8 = vcmp.eq.s32.totalorder %v4898_v30, %v5589_v50  ;;  %vm1880_vm9 = vcmp.eq.s32.totalorder %v4910_v26, %v5589_v50  ;;  %vm1944_vm10 = vcmp.eq.s32.totalorder %v4913_v37, %v5589_v50  ;;  %vm2008_vm11 = vcmp.eq.s32.totalorder %v4926_v18, %v5589_v50 }
 0x267   : > { %vm2072_vm12 = vcmp.eq.s32.totalorder %v4901_v25, %v5589_v50  ;;  %vm2136_vm13 = vcmp.eq.s32.totalorder %v4916_v29, %v5589_v50  ;;  %vm2200_vm14 = vcmp.eq.s32.totalorder %v4919_v16, %v5589_v50  ;;  %vm2264_vm15 = vcmp.eq.s32.totalorder %v4929_v33, %v5589_v50 }
 0x268   : > { %v2328_v59 = vsel %vm1816_vm8, %v1419_v10, 0.0  ;;  %v2392_v15 = vsel %vm1880_vm9, %v1419_v10, 0.0  ;;  %v2456_v62 = vsel %vm1944_vm10, %v1419_v10, 0.0  ;;  %v2520_v41 = vsel %vm2008_vm11, %v1419_v10, 0.0 }
 0x269   : > { %v2584_v11 = vsel %vm2072_vm12, %v1419_v10, 0.0  ;;  %v2648_v61 = vsel %vm2136_vm13, %v1419_v10, 0.0  ;;  %v2712_v54 = vsel %vm2200_vm14, %v1419_v10, 0.0  ;;  %v2776_v20 = vsel %vm2264_vm15, %v1419_v10, 0.0  ;;  %v1440_v10 = vpop.xlane.xlu0 %1439 }
 0x26a   : > { %v2840_v24 = vadd.f32 %v2839_v13, %v2328_v59  ;;  %v2909_v12 = vadd.f32 %v2908_v49, %v2392_v15  ;;  %v2978_v60 = vadd.f32 %v2977_v48, %v2456_v62  ;;  %v3047_v7 = vadd.f32 %v3046_v43, %v2520_v41 }
 0x26b   : > { %v3116_v31 = vadd.f32 %v3115_v38, %v2584_v11  ;;  %v3185_v0 = vadd.f32 %v3184_v27, %v2648_v61  ;;  %v3254_v14 = vadd.f32 %v3253_v45, %v2712_v54  ;;  %v3323_v21 = vadd.f32 %v3322_v9, %v2776_v20 }
 0x26c   : > { %vm1817_vm0 = vcmp.eq.s32.totalorder %v4898_v30, %v5592_v51  ;;  %vm1881_vm1 = vcmp.eq.s32.totalorder %v4910_v26, %v5592_v51  ;;  %vm1945_vm2 = vcmp.eq.s32.totalorder %v4913_v37, %v5592_v51  ;;  %vm2009_vm3 = vcmp.eq.s32.totalorder %v4926_v18, %v5592_v51 }
 0x26d   : > { %vm2073_vm4 = vcmp.eq.s32.totalorder %v4901_v25, %v5592_v51  ;;  %vm2137_vm5 = vcmp.eq.s32.totalorder %v4916_v29, %v5592_v51  ;;  %vm2201_vm6 = vcmp.eq.s32.totalorder %v4919_v16, %v5592_v51  ;;  %vm2265_vm7 = vcmp.eq.s32.totalorder %v4929_v33, %v5592_v51 }
 0x26e   : > { %v2329_v50 = vsel %vm1817_vm0, %v1426_v36, 0.0  ;;  %v2393_v42 = vsel %vm1881_vm1, %v1426_v36, 0.0  ;;  %v2457_v34 = vsel %vm1945_vm2, %v1426_v36, 0.0  ;;  %v2521_v56 = vsel %vm2009_vm3, %v1426_v36, 0.0 }
 0x26f   : > { %v2585_v19 = vsel %vm2073_vm4, %v1426_v36, 0.0  ;;  %v2649_v8 = vsel %vm2137_vm5, %v1426_v36, 0.0  ;;  %v2713_v6 = vsel %vm2201_vm6, %v1426_v36, 0.0  ;;  %v2777_v22 = vsel %vm2265_vm7, %v1426_v36, 0.0 }
 0x270   : > { %v2841_v57 = vadd.f32 %v2840_v24, %v2329_v50  ;;  %v2910_v44 = vadd.f32 %v2909_v12, %v2393_v42  ;;  %v2979_v63 = vadd.f32 %v2978_v60, %v2457_v34  ;;  %v3048_v58 = vadd.f32 %v3047_v7, %v2521_v56  ;;  %v1447_v42 = vpop.xlane.xlu1 %1446 }
 0x271   : > { %v3117_v35 = vadd.f32 %v3116_v31, %v2585_v19  ;;  %v3186_v23 = vadd.f32 %v3185_v0, %v2649_v8  ;;  %v3255_v55 = vadd.f32 %v3254_v14, %v2713_v6  ;;  %v3324_v52 = vadd.f32 %v3323_v21, %v2777_v22 }
 0x272   : > { %vm1818_vm8 = vcmp.eq.s32.totalorder %v4898_v30, %v5595_v53  ;;  %vm1882_vm9 = vcmp.eq.s32.totalorder %v4910_v26, %v5595_v53  ;;  %vm1946_vm10 = vcmp.eq.s32.totalorder %v4913_v37, %v5595_v53  ;;  %vm2010_vm11 = vcmp.eq.s32.totalorder %v4926_v18, %v5595_v53 }
 0x273   : > { %vm2074_vm12 = vcmp.eq.s32.totalorder %v4901_v25, %v5595_v53  ;;  %vm2138_vm13 = vcmp.eq.s32.totalorder %v4916_v29, %v5595_v53  ;;  %vm2202_vm14 = vcmp.eq.s32.totalorder %v4919_v16, %v5595_v53  ;;  %vm2266_vm15 = vcmp.eq.s32.totalorder %v4929_v33, %v5595_v53 }
 0x274   : > { %v2330_v51 = vsel %vm1818_vm8, %v1433_v5, 0.0  ;;  %v2394_v1 = vsel %vm1882_vm9, %v1433_v5, 0.0  ;;  %v2458_v39 = vsel %vm1946_vm10, %v1433_v5, 0.0  ;;  %v2522_v17 = vsel %vm2010_vm11, %v1433_v5, 0.0 }
 0x275   : > { %v2586_v40 = vsel %vm2074_vm12, %v1433_v5, 0.0  ;;  %v2650_v4 = vsel %vm2138_vm13, %v1433_v5, 0.0  ;;  %v2714_v3 = vsel %vm2202_vm14, %v1433_v5, 0.0  ;;  %v2778_v47 = vsel %vm2266_vm15, %v1433_v5, 0.0 }
 0x276   : > { %v2842_v13 = vadd.f32 %v2841_v57, %v2330_v51  ;;  %v2911_v49 = vadd.f32 %v2910_v44, %v2394_v1  ;;  %v2980_v48 = vadd.f32 %v2979_v63, %v2458_v39  ;;  %v3049_v43 = vadd.f32 %v3048_v58, %v2522_v17 }
 0x277   : > { %v3118_v38 = vadd.f32 %v3117_v35, %v2586_v40  ;;  %v3187_v27 = vadd.f32 %v3186_v23, %v2650_v4  ;;  %v3256_v45 = vadd.f32 %v3255_v55, %v2714_v3  ;;  %v3325_v9 = vadd.f32 %v3324_v52, %v2778_v47  ;;  %v1454_v47 = vpop.xlane.xlu0 %1453 }
 0x278   : > { %vm1819_vm0 = vcmp.eq.s32.totalorder %v4898_v30, %v5598_v2  ;;  %vm1883_vm1 = vcmp.eq.s32.totalorder %v4910_v26, %v5598_v2  ;;  %vm1947_vm2 = vcmp.eq.s32.totalorder %v4913_v37, %v5598_v2  ;;  %vm2011_vm3 = vcmp.eq.s32.totalorder %v4926_v18, %v5598_v2 }
 0x279   : > { %vm2075_vm4 = vcmp.eq.s32.totalorder %v4901_v25, %v5598_v2  ;;  %vm2139_vm5 = vcmp.eq.s32.totalorder %v4916_v29, %v5598_v2  ;;  %vm2203_vm6 = vcmp.eq.s32.totalorder %v4919_v16, %v5598_v2  ;;  %vm2267_vm7 = vcmp.eq.s32.totalorder %v4929_v33, %v5598_v2 }
 0x27a   : > { %v2331_v53 = vsel %vm1819_vm0, %v1440_v10, 0.0  ;;  %v2395_v59 = vsel %vm1883_vm1, %v1440_v10, 0.0  ;;  %v2459_v15 = vsel %vm1947_vm2, %v1440_v10, 0.0  ;;  %v2523_v62 = vsel %vm2011_vm3, %v1440_v10, 0.0 }
 0x27b   : > { %v2587_v41 = vsel %vm2075_vm4, %v1440_v10, 0.0  ;;  %v2651_v11 = vsel %vm2139_vm5, %v1440_v10, 0.0  ;;  %v2715_v61 = vsel %vm2203_vm6, %v1440_v10, 0.0  ;;  %v2779_v54 = vsel %vm2267_vm7, %v1440_v10, 0.0 }
 0x27c   : > { %v2843_v20 = vadd.f32 %v2842_v13, %v2331_v53  ;;  %v2912_v24 = vadd.f32 %v2911_v49, %v2395_v59  ;;  %v2981_v12 = vadd.f32 %v2980_v48, %v2459_v15  ;;  %v3050_v60 = vadd.f32 %v3049_v43, %v2523_v62 }
 0x27d   : > { %v3119_v7 = vadd.f32 %v3118_v38, %v2587_v41  ;;  %v3188_v31 = vadd.f32 %v3187_v27, %v2651_v11  ;;  %v3257_v0 = vadd.f32 %v3256_v45, %v2715_v61  ;;  %v3326_v14 = vadd.f32 %v3325_v9, %v2779_v54 }
 0x27e   : > { %v1675_v21 = vadd.s32 %v4837_v32, %v5601_v46  ;;  %v1611_v2 = vadd.s32 384, %v6048_v28  ;;  %v1612_v36 = vadd.s32 392, %v6048_v28  ;;  %v1613_v50 = vadd.s32 400, %v6048_v28 }
 0x27f   : > { %v1614_v34 = vadd.s32 408, %v6048_v28  ;;  %v1615_v56 = vadd.s32 416, %v6048_v28  ;;  %v1616_v19 = vadd.s32 424, %v6048_v28  ;;  %v1617_v8 = vadd.s32 432, %v6048_v28 }
 0x280   : > { %vm1820_vm8 = vcmp.eq.s32.totalorder %v4898_v30, %v1675_v21  ;;  %vm1884_vm9 = vcmp.eq.s32.totalorder %v4910_v26, %v1675_v21  ;;  %vm1948_vm10 = vcmp.eq.s32.totalorder %v4913_v37, %v1675_v21  ;;  %vm2012_vm11 = vcmp.eq.s32.totalorder %v4926_v18, %v1675_v21 }
 0x281   : > { %vm2076_vm12 = vcmp.eq.s32.totalorder %v4901_v25, %v1675_v21  ;;  %vm2140_vm13 = vcmp.eq.s32.totalorder %v4916_v29, %v1675_v21  ;;  %vm2204_vm14 = vcmp.eq.s32.totalorder %v4919_v16, %v1675_v21  ;;  %vm2268_vm15 = vcmp.eq.s32.totalorder %v4929_v33, %v1675_v21 }
 0x282   : > { %v2332_v46 = vsel %vm1820_vm8, %v1447_v42, 0.0  ;;  %v2396_v6 = vsel %vm1884_vm9, %v1447_v42, 0.0  ;;  %v2460_v22 = vsel %vm1948_vm10, %v1447_v42, 0.0  ;;  %v2524_v57 = vsel %vm2012_vm11, %v1447_v42, 0.0 }
 0x283   : > { %v2588_v44 = vsel %vm2076_vm12, %v1447_v42, 0.0  ;;  %v2652_v63 = vsel %vm2140_vm13, %v1447_v42, 0.0  ;;  %v2716_v58 = vsel %vm2204_vm14, %v1447_v42, 0.0  ;;  %v2780_v35 = vsel %vm2268_vm15, %v1447_v42, 0.0 }
 0x284   : > { %v2844_v23 = vadd.f32 %v2843_v20, %v2332_v46  ;;  %v2913_v55 = vadd.f32 %v2912_v24, %v2396_v6  ;;  %v2982_v52 = vadd.f32 %v2981_v12, %v2460_v22  ;;  %v3051_v5 = vadd.f32 %v3050_v60, %v2524_v57  ;;  %v1461_v60 = vpop.xlane.xlu1 %1460  ;;  %v1468_v57 = vpop.xlane.xlu0 %1467 }
 0x285   : > { %v3120_v51 = vadd.f32 %v3119_v7, %v2588_v44  ;;  %v3189_v1 = vadd.f32 %v3188_v31, %v2652_v63  ;;  %v3258_v39 = vadd.f32 %v3257_v0, %v2716_v58  ;;  %v3327_v17 = vadd.f32 %v3326_v14, %v2780_v35 }
 0x286   : > { %v1676_v40 = vadd.s32 %v4837_v32, %v1611_v2  ;;  %v1677_v4 = vadd.s32 %v4837_v32, %v1612_v36  ;;  %v5719_v3 = vadd.s32 %v4837_v32, %v1613_v50  ;;  %v5722_v13 = vadd.s32 %v4837_v32, %v1614_v34 }
 0x287   : > { %v5725_v49 = vadd.s32 %v4837_v32, %v1615_v56  ;;  %v5728_v48 = vadd.s32 %v4837_v32, %v1616_v19  ;;  %v5731_v43 = vadd.s32 %v4837_v32, %v1617_v8  ;;  %v5742_v15 = vadd.s32 440, %v6048_v28 }
 0x288   : > { %vm1821_vm0 = vcmp.eq.s32.totalorder %v4898_v30, %v1676_v40  ;;  %vm1885_vm1 = vcmp.eq.s32.totalorder %v4910_v26, %v1676_v40  ;;  %vm1949_vm2 = vcmp.eq.s32.totalorder %v4913_v37, %v1676_v40  ;;  %vm2013_vm3 = vcmp.eq.s32.totalorder %v4926_v18, %v1676_v40 }
 0x289   : > { %vm2077_vm4 = vcmp.eq.s32.totalorder %v4901_v25, %v1676_v40  ;;  %vm2141_vm5 = vcmp.eq.s32.totalorder %v4916_v29, %v1676_v40  ;;  %vm2205_vm6 = vcmp.eq.s32.totalorder %v4919_v16, %v1676_v40  ;;  %vm2269_vm7 = vcmp.eq.s32.totalorder %v4929_v33, %v1676_v40 }
 0x28a   : > { %v2333_v38 = vsel %vm1821_vm0, %v1454_v47, 0.0  ;;  %v2397_v27 = vsel %vm1885_vm1, %v1454_v47, 0.0  ;;  %v2461_v45 = vsel %vm1949_vm2, %v1454_v47, 0.0  ;;  %v2525_v9 = vsel %vm2013_vm3, %v1454_v47, 0.0 }
 0x28b   : > { %v2589_v10 = vsel %vm2077_vm4, %v1454_v47, 0.0  ;;  %v2653_v53 = vsel %vm2141_vm5, %v1454_v47, 0.0  ;;  %v2717_v59 = vsel %vm2205_vm6, %v1454_v47, 0.0  ;;  %v2781_v62 = vsel %vm2269_vm7, %v1454_v47, 0.0 }
 0x28c   : > { %v2845_v41 = vadd.f32 %v2844_v23, %v2333_v38  ;;  %v2914_v11 = vadd.f32 %v2913_v55, %v2397_v27  ;;  %v2983_v61 = vadd.f32 %v2982_v52, %v2461_v45  ;;  %v3052_v54 = vadd.f32 %v3051_v5, %v2525_v9  ;;  %v1475_v27 = vpop.xlane.xlu1 %1474 }
 0x28d   : > { %v3121_v20 = vadd.f32 %v3120_v51, %v2589_v10  ;;  %v3190_v24 = vadd.f32 %v3189_v1, %v2653_v53  ;;  %v3259_v12 = vadd.f32 %v3258_v39, %v2717_v59  ;;  %vm1822_vm8 = vcmp.eq.s32.totalorder %v4898_v30, %v1677_v4 }
 0x28e   : > { %vm1886_vm9 = vcmp.eq.s32.totalorder %v4910_v26, %v1677_v4  ;;  %vm1950_vm10 = vcmp.eq.s32.totalorder %v4913_v37, %v1677_v4  ;;  %vm2014_vm11 = vcmp.eq.s32.totalorder %v4926_v18, %v1677_v4  ;;  %vm2078_vm12 = vcmp.eq.s32.totalorder %v4901_v25, %v1677_v4 }
 0x28f   : > { %vm2142_vm13 = vcmp.eq.s32.totalorder %v4916_v29, %v1677_v4  ;;  %vm2206_vm14 = vcmp.eq.s32.totalorder %v4919_v16, %v1677_v4  ;;  %vm2270_vm15 = vcmp.eq.s32.totalorder %v4929_v33, %v1677_v4  ;;  %v2334_v7 = vsel %vm1822_vm8, %v1461_v60, 0.0 }
 0x290   : > { %v2398_v31 = vsel %vm1886_vm9, %v1461_v60, 0.0  ;;  %v2462_v0 = vsel %vm1950_vm10, %v1461_v60, 0.0  ;;  %v2526_v14 = vsel %vm2014_vm11, %v1461_v60, 0.0  ;;  %v3328_v21 = vadd.f32 %v3327_v17, %v2781_v62 }
 0x291   : > { %v2590_v2 = vsel %vm2078_vm12, %v1461_v60, 0.0  ;;  %v2654_v36 = vsel %vm2142_vm13, %v1461_v60, 0.0  ;;  %v2718_v50 = vsel %vm2206_vm14, %v1461_v60, 0.0  ;;  %v2782_v42 = vsel %vm2270_vm15, %v1461_v60, 0.0 }
 0x292   : > { %v2846_v34 = vadd.f32 %v2845_v41, %v2334_v7  ;;  %v2915_v56 = vadd.f32 %v2914_v11, %v2398_v31  ;;  %v2984_v19 = vadd.f32 %v2983_v61, %v2462_v0  ;;  %v3053_v8 = vadd.f32 %v3052_v54, %v2526_v14  ;;  %v1482_v31 = vpop.xlane.xlu0 %1481 }
 0x293   : > { %v3122_v46 = vadd.f32 %v3121_v20, %v2590_v2  ;;  %v3191_v6 = vadd.f32 %v3190_v24, %v2654_v36  ;;  %v3260_v22 = vadd.f32 %v3259_v12, %v2718_v50  ;;  %vm1823_vm0 = vcmp.eq.s32.totalorder %v4898_v30, %v5719_v3 }
 0x294   : > { %vm1887_vm1 = vcmp.eq.s32.totalorder %v4910_v26, %v5719_v3  ;;  %vm1951_vm2 = vcmp.eq.s32.totalorder %v4913_v37, %v5719_v3  ;;  %vm2015_vm3 = vcmp.eq.s32.totalorder %v4926_v18, %v5719_v3  ;;  %vm2079_vm4 = vcmp.eq.s32.totalorder %v4901_v25, %v5719_v3 }
 0x295   : > { %vm2143_vm5 = vcmp.eq.s32.totalorder %v4916_v29, %v5719_v3  ;;  %vm2207_vm6 = vcmp.eq.s32.totalorder %v4919_v16, %v5719_v3  ;;  %vm2271_vm7 = vcmp.eq.s32.totalorder %v4929_v33, %v5719_v3  ;;  %v2335_v44 = vsel %vm1823_vm0, %v1468_v57, 0.0 }
 0x296   : > { %v2399_v63 = vsel %vm1887_vm1, %v1468_v57, 0.0  ;;  %v2463_v58 = vsel %vm1951_vm2, %v1468_v57, 0.0  ;;  %v2527_v35 = vsel %vm2015_vm3, %v1468_v57, 0.0  ;;  %v3329_v23 = vadd.f32 %v3328_v21, %v2782_v42 }
 0x297   : > { %v2591_v55 = vsel %vm2079_vm4, %v1468_v57, 0.0  ;;  %v2655_v52 = vsel %vm2143_vm5, %v1468_v57, 0.0  ;;  %v2719_v5 = vsel %vm2207_vm6, %v1468_v57, 0.0  ;;  %v2783_v51 = vsel %vm2271_vm7, %v1468_v57, 0.0 }
 0x298   : > { %v2847_v1 = vadd.f32 %v2846_v34, %v2335_v44  ;;  %v2916_v39 = vadd.f32 %v2915_v56, %v2399_v63  ;;  %v2985_v17 = vadd.f32 %v2984_v19, %v2463_v58  ;;  %v3054_v40 = vadd.f32 %v3053_v8, %v2527_v35  ;;  %v1489_v44 = vpop.xlane.xlu1 %1488 }
 0x299   : > { %v3123_v4 = vadd.f32 %v3122_v46, %v2591_v55  ;;  %v3192_v47 = vadd.f32 %v3191_v6, %v2655_v52  ;;  %v3261_v38 = vadd.f32 %v3260_v22, %v2719_v5  ;;  %vm1824_vm8 = vcmp.eq.s32.totalorder %v4898_v30, %v5722_v13 }
 0x29a   : > { %vm1888_vm9 = vcmp.eq.s32.totalorder %v4910_v26, %v5722_v13  ;;  %vm1952_vm10 = vcmp.eq.s32.totalorder %v4913_v37, %v5722_v13  ;;  %vm2016_vm11 = vcmp.eq.s32.totalorder %v4926_v18, %v5722_v13  ;;  %vm2080_vm12 = vcmp.eq.s32.totalorder %v4901_v25, %v5722_v13 }
 0x29b   : > { %vm2144_vm13 = vcmp.eq.s32.totalorder %v4916_v29, %v5722_v13  ;;  %vm2208_vm14 = vcmp.eq.s32.totalorder %v4919_v16, %v5722_v13  ;;  %vm2272_vm15 = vcmp.eq.s32.totalorder %v4929_v33, %v5722_v13  ;;  %v2336_v3 = vsel %vm1824_vm8, %v1475_v27, 0.0 }
 0x29c   : > { %v2400_v45 = vsel %vm1888_vm9, %v1475_v27, 0.0  ;;  %v2464_v9 = vsel %vm1952_vm10, %v1475_v27, 0.0  ;;  %v2528_v10 = vsel %vm2016_vm11, %v1475_v27, 0.0  ;;  %v3330_v53 = vadd.f32 %v3329_v23, %v2783_v51 }
 0x29d   : > { %v2592_v59 = vsel %vm2080_vm12, %v1475_v27, 0.0  ;;  %v2656_v62 = vsel %vm2144_vm13, %v1475_v27, 0.0  ;;  %v2720_v41 = vsel %vm2208_vm14, %v1475_v27, 0.0  ;;  %v2784_v11 = vsel %vm2272_vm15, %v1475_v27, 0.0  ;;  %v1496_v27 = vpop.xlane.xlu0 %1495 }
 0x29e   : > { %v2848_v61 = vadd.f32 %v2847_v1, %v2336_v3  ;;  %v2917_v54 = vadd.f32 %v2916_v39, %v2400_v45  ;;  %v2986_v20 = vadd.f32 %v2985_v17, %v2464_v9  ;;  %v3055_v24 = vadd.f32 %v3054_v40, %v2528_v10 }
 0x29f   : > { %v3124_v12 = vadd.f32 %v3123_v4, %v2592_v59  ;;  %v3193_v60 = vadd.f32 %v3192_v47, %v2656_v62  ;;  %v3262_v7 = vadd.f32 %v3261_v38, %v2720_v41  ;;  %vm1825_vm0 = vcmp.eq.s32.totalorder %v4898_v30, %v5725_v49 }
 0x2a0   : > { %vm1889_vm1 = vcmp.eq.s32.totalorder %v4910_v26, %v5725_v49  ;;  %vm1953_vm2 = vcmp.eq.s32.totalorder %v4913_v37, %v5725_v49  ;;  %vm2017_vm3 = vcmp.eq.s32.totalorder %v4926_v18, %v5725_v49  ;;  %vm2081_vm4 = vcmp.eq.s32.totalorder %v4901_v25, %v5725_v49 }
 0x2a1   : > { %vm2145_vm5 = vcmp.eq.s32.totalorder %v4916_v29, %v5725_v49  ;;  %vm2209_vm6 = vcmp.eq.s32.totalorder %v4919_v16, %v5725_v49  ;;  %vm2273_vm7 = vcmp.eq.s32.totalorder %v4929_v33, %v5725_v49  ;;  %v2337_v13 = vsel %vm1825_vm0, %v1482_v31, 0.0 }
 0x2a2   : > { %v2401_v0 = vsel %vm1889_vm1, %v1482_v31, 0.0  ;;  %v2465_v14 = vsel %vm1953_vm2, %v1482_v31, 0.0  ;;  %v2529_v21 = vsel %vm2017_vm3, %v1482_v31, 0.0  ;;  %v3331_v2 = vadd.f32 %v3330_v53, %v2784_v11 }
 0x2a3   : > { %v2593_v36 = vsel %vm2081_vm4, %v1482_v31, 0.0  ;;  %v2657_v50 = vsel %vm2145_vm5, %v1482_v31, 0.0  ;;  %v2721_v42 = vsel %vm2209_vm6, %v1482_v31, 0.0  ;;  %v2785_v34 = vsel %vm2273_vm7, %v1482_v31, 0.0  ;;  %v1503_v31 = vpop.xlane.xlu1 %1502 }
 0x2a4   : > { %v2849_v56 = vadd.f32 %v2848_v61, %v2337_v13  ;;  %v2918_v19 = vadd.f32 %v2917_v54, %v2401_v0  ;;  %v2987_v8 = vadd.f32 %v2986_v20, %v2465_v14  ;;  %v3056_v46 = vadd.f32 %v3055_v24, %v2529_v21 }
 0x2a5   : > { %v3125_v6 = vadd.f32 %v3124_v12, %v2593_v36  ;;  %v3194_v22 = vadd.f32 %v3193_v60, %v2657_v50  ;;  %v3263_v57 = vadd.f32 %v3262_v7, %v2721_v42  ;;  %vm1826_vm8 = vcmp.eq.s32.totalorder %v4898_v30, %v5728_v48 }
 0x2a6   : > { %vm1890_vm9 = vcmp.eq.s32.totalorder %v4910_v26, %v5728_v48  ;;  %vm1954_vm10 = vcmp.eq.s32.totalorder %v4913_v37, %v5728_v48  ;;  %vm2018_vm11 = vcmp.eq.s32.totalorder %v4926_v18, %v5728_v48  ;;  %vm2082_vm12 = vcmp.eq.s32.totalorder %v4901_v25, %v5728_v48 }
 0x2a7   : > { %vm2146_vm13 = vcmp.eq.s32.totalorder %v4916_v29, %v5728_v48  ;;  %vm2210_vm14 = vcmp.eq.s32.totalorder %v4919_v16, %v5728_v48  ;;  %vm2274_vm15 = vcmp.eq.s32.totalorder %v4929_v33, %v5728_v48  ;;  %v2338_v49 = vsel %vm1826_vm8, %v1489_v44, 0.0 }
 0x2a8   : > { %v2402_v63 = vsel %vm1890_vm9, %v1489_v44, 0.0  ;;  %v2466_v58 = vsel %vm1954_vm10, %v1489_v44, 0.0  ;;  %v2530_v35 = vsel %vm2018_vm11, %v1489_v44, 0.0  ;;  %v3332_v23 = vadd.f32 %v3331_v2, %v2785_v34 }
 0x2a9   : > { %v2594_v55 = vsel %vm2082_vm12, %v1489_v44, 0.0  ;;  %v2658_v52 = vsel %vm2146_vm13, %v1489_v44, 0.0  ;;  %v2722_v5 = vsel %vm2210_vm14, %v1489_v44, 0.0  ;;  %v2786_v51 = vsel %vm2274_vm15, %v1489_v44, 0.0 }
 0x2aa   : > { %v2850_v1 = vadd.f32 %v2849_v56, %v2338_v49  ;;  %v2919_v39 = vadd.f32 %v2918_v19, %v2402_v63  ;;  %v2988_v17 = vadd.f32 %v2987_v8, %v2466_v58  ;;  %v3057_v40 = vadd.f32 %v3056_v46, %v2530_v35 }
 0x2ab   : > { %v3126_v4 = vadd.f32 %v3125_v6, %v2594_v55  ;;  %v3195_v47 = vadd.f32 %v3194_v22, %v2658_v52  ;;  %v3264_v38 = vadd.f32 %v3263_v57, %v2722_v5  ;;  %vm1827_vm0 = vcmp.eq.s32.totalorder %v4898_v30, %v5731_v43  ;;  %v1510_v52 = vpop.xlane.xlu0 %1509 }
 0x2ac   : > { %vm1891_vm1 = vcmp.eq.s32.totalorder %v4910_v26, %v5731_v43  ;;  %vm1955_vm2 = vcmp.eq.s32.totalorder %v4913_v37, %v5731_v43  ;;  %vm2019_vm3 = vcmp.eq.s32.totalorder %v4926_v18, %v5731_v43  ;;  %vm2083_vm4 = vcmp.eq.s32.totalorder %v4901_v25, %v5731_v43 }
 0x2ad   : > { %vm2147_vm5 = vcmp.eq.s32.totalorder %v4916_v29, %v5731_v43  ;;  %vm2211_vm6 = vcmp.eq.s32.totalorder %v4919_v16, %v5731_v43  ;;  %vm2275_vm7 = vcmp.eq.s32.totalorder %v4929_v33, %v5731_v43  ;;  %v2339_v48 = vsel %vm1827_vm0, %v1496_v27, 0.0 }
 0x2ae   : > { %v2403_v3 = vsel %vm1891_vm1, %v1496_v27, 0.0  ;;  %v2467_v45 = vsel %vm1955_vm2, %v1496_v27, 0.0  ;;  %v2531_v9 = vsel %vm2019_vm3, %v1496_v27, 0.0  ;;  %v3333_v10 = vadd.f32 %v3332_v23, %v2786_v51 }
 0x2af   : > { %v2595_v53 = vsel %vm2083_vm4, %v1496_v27, 0.0  ;;  %v2659_v59 = vsel %vm2147_vm5, %v1496_v27, 0.0  ;;  %v2723_v62 = vsel %vm2211_vm6, %v1496_v27, 0.0  ;;  %v2787_v41 = vsel %vm2275_vm7, %v1496_v27, 0.0 }
 0x2b0   : > { %v2851_v11 = vadd.f32 %v2850_v1, %v2339_v48  ;;  %v2920_v61 = vadd.f32 %v2919_v39, %v2403_v3  ;;  %v2989_v54 = vadd.f32 %v2988_v17, %v2467_v45  ;;  %v3058_v20 = vadd.f32 %v3057_v40, %v2531_v9 }
 0x2b1   : > { %v3127_v24 = vadd.f32 %v3126_v4, %v2595_v53  ;;  %v3196_v12 = vadd.f32 %v3195_v47, %v2659_v59  ;;  %v3265_v60 = vadd.f32 %v3264_v38, %v2723_v62  ;;  %v1683_v7 = vadd.s32 %v4837_v32, %v5742_v15 }
 0x2b2   : > { %v3334_v43 = vadd.f32 %v3333_v10, %v2787_v41  ;;  %v1619_v13 = vadd.s32 448, %v6048_v28  ;;  %v1620_v0 = vadd.s32 456, %v6048_v28  ;;  %v1621_v14 = vadd.s32 464, %v6048_v28 }
 0x2b3   : > { %vm1828_vm8 = vcmp.eq.s32.totalorder %v4898_v30, %v1683_v7  ;;  %vm1892_vm9 = vcmp.eq.s32.totalorder %v4910_v26, %v1683_v7  ;;  %vm1956_vm10 = vcmp.eq.s32.totalorder %v4913_v37, %v1683_v7  ;;  %vm2020_vm11 = vcmp.eq.s32.totalorder %v4926_v18, %v1683_v7 }
 0x2b4   : > { %vm2084_vm12 = vcmp.eq.s32.totalorder %v4901_v25, %v1683_v7  ;;  %vm2148_vm13 = vcmp.eq.s32.totalorder %v4916_v29, %v1683_v7  ;;  %vm2212_vm14 = vcmp.eq.s32.totalorder %v4919_v16, %v1683_v7  ;;  %vm2276_vm15 = vcmp.eq.s32.totalorder %v4929_v33, %v1683_v7 }
 0x2b5   : > { %v2340_v15 = vsel %vm1828_vm8, %v1503_v31, 0.0  ;;  %v2404_v21 = vsel %vm1892_vm9, %v1503_v31, 0.0  ;;  %v2468_v2 = vsel %vm1956_vm10, %v1503_v31, 0.0  ;;  %v2532_v36 = vsel %vm2020_vm11, %v1503_v31, 0.0 }
 0x2b6   : > { %v2596_v50 = vsel %vm2084_vm12, %v1503_v31, 0.0  ;;  %v2660_v42 = vsel %vm2148_vm13, %v1503_v31, 0.0  ;;  %v2724_v34 = vsel %vm2212_vm14, %v1503_v31, 0.0  ;;  %v1622_v56 = vadd.s32 472, %v6048_v28 }
 0x2b7   : > { %v2788_v19 = vsel %vm2276_vm15, %v1503_v31, 0.0  ;;  %v1623_v8 = vadd.s32 480, %v6048_v28  ;;  %v1624_v46 = vadd.s32 488, %v6048_v28  ;;  %v1625_v6 = vadd.s32 496, %v6048_v28 }
 0x2b8   : > { %v2852_v22 = vadd.f32 %v2851_v11, %v2340_v15  ;;  %v2921_v57 = vadd.f32 %v2920_v61, %v2404_v21  ;;  %v2990_v44 = vadd.f32 %v2989_v54, %v2468_v2  ;;  %v3059_v49 = vadd.f32 %v3058_v20, %v2532_v36  ;;  %v1517_v11 = vpop.xlane.xlu1 %1516  ;;  %v1524_v36 = vpop.xlane.xlu0 %1523 }
 0x2b9   : > { %v3128_v63 = vadd.f32 %v3127_v24, %v2596_v50  ;;  %v3197_v58 = vadd.f32 %v3196_v12, %v2660_v42  ;;  %v3266_v35 = vadd.f32 %v3265_v60, %v2724_v34  ;;  %v1684_v23 = vadd.s32 %v4837_v32, %v1619_v13 }
 0x2ba   : > { %v3335_v55 = vadd.f32 %v3334_v43, %v2788_v19  ;;  %v1685_v5 = vadd.s32 %v4837_v32, %v1620_v0  ;;  %v5852_v51 = vadd.s32 %v4837_v32, %v1621_v14  ;;  %v5855_v1 = vadd.s32 %v4837_v32, %v1622_v56 }
 0x2bb   : > { %vm1829_vm0 = vcmp.eq.s32.totalorder %v4898_v30, %v1684_v23  ;;  %vm1893_vm1 = vcmp.eq.s32.totalorder %v4910_v26, %v1684_v23  ;;  %vm1957_vm2 = vcmp.eq.s32.totalorder %v4913_v37, %v1684_v23  ;;  %vm2021_vm3 = vcmp.eq.s32.totalorder %v4926_v18, %v1684_v23 }
 0x2bc   : > { %vm2085_vm4 = vcmp.eq.s32.totalorder %v4901_v25, %v1684_v23  ;;  %vm2149_vm5 = vcmp.eq.s32.totalorder %v4916_v29, %v1684_v23  ;;  %vm2213_vm6 = vcmp.eq.s32.totalorder %v4919_v16, %v1684_v23  ;;  %vm2277_vm7 = vcmp.eq.s32.totalorder %v4929_v33, %v1684_v23 }
 0x2bd   : > { %v2341_v39 = vsel %vm1829_vm0, %v1510_v52, 0.0  ;;  %v2405_v17 = vsel %vm1893_vm1, %v1510_v52, 0.0  ;;  %v2469_v40 = vsel %vm1957_vm2, %v1510_v52, 0.0  ;;  %v2533_v4 = vsel %vm2021_vm3, %v1510_v52, 0.0 }
 0x2be   : > { %v5866_v47 = vadd.s32 %v4837_v32, %v1623_v8  ;;  %v5869_v38 = vadd.s32 %v4837_v32, %v1624_v46  ;;  %v5872_v27 = vadd.s32 %v4837_v32, %v1625_v6  ;;  %v5875_v48 = vadd.s32 504, %v6048_v28 }
 0x2bf   : > { %v2597_v3 = vsel %vm2085_vm4, %v1510_v52, 0.0  ;;  %v2661_v45 = vsel %vm2149_vm5, %v1510_v52, 0.0  ;;  %v2725_v9 = vsel %vm2213_vm6, %v1510_v52, 0.0  ;;  %v2789_v10 = vsel %vm2277_vm7, %v1510_v52, 0.0 }
 0x2c0   : > { %v2853_v53 = vadd.f32 %v2852_v22, %v2341_v39  ;;  %v2922_v59 = vadd.f32 %v2921_v57, %v2405_v17  ;;  %v2991_v62 = vadd.f32 %v2990_v44, %v2469_v40  ;;  %v3060_v41 = vadd.f32 %v3059_v49, %v2533_v4 }
 0x2c1   : > { %vm1830_vm8 = vcmp.eq.s32.totalorder %v4898_v30, %v1685_v5  ;;  %vm1894_vm9 = vcmp.eq.s32.totalorder %v4910_v26, %v1685_v5  ;;  %vm1958_vm10 = vcmp.eq.s32.totalorder %v4913_v37, %v1685_v5  ;;  %vm2022_vm11 = vcmp.eq.s32.totalorder %v4926_v18, %v1685_v5 }
 0x2c2   : > { %vm2086_vm12 = vcmp.eq.s32.totalorder %v4901_v25, %v1685_v5  ;;  %vm2150_vm13 = vcmp.eq.s32.totalorder %v4916_v29, %v1685_v5  ;;  %vm2214_vm14 = vcmp.eq.s32.totalorder %v4919_v16, %v1685_v5  ;;  %vm2278_vm15 = vcmp.eq.s32.totalorder %v4929_v33, %v1685_v5 }
 0x2c3   : > { %v2342_v28 = vsel %vm1830_vm8, %v1517_v11, 0.0  ;;  %v2406_v61 = vsel %vm1894_vm9, %v1517_v11, 0.0  ;;  %v2470_v54 = vsel %vm1958_vm10, %v1517_v11, 0.0  ;;  %v2534_v20 = vsel %vm2022_vm11, %v1517_v11, 0.0 }
 0x2c4   : > { %v3129_v24 = vadd.f32 %v3128_v63, %v2597_v3  ;;  %v3198_v12 = vadd.f32 %v3197_v58, %v2661_v45  ;;  %v3267_v60 = vadd.f32 %v3266_v35, %v2725_v9  ;;  %v3336_v7 = vadd.f32 %v3335_v55, %v2789_v10  ;;  %v1531_v55 = vpop.xlane.xlu1 %1530 }
 0x2c5   : > { %v2598_v43 = vsel %vm2086_vm12, %v1517_v11, 0.0  ;;  %v2662_v31 = vsel %vm2150_vm13, %v1517_v11, 0.0  ;;  %v2726_v13 = vsel %vm2214_vm14, %v1517_v11, 0.0  ;;  %v2790_v0 = vsel %vm2278_vm15, %v1517_v11, 0.0 }
 0x2c6   : > { %v2854_v14 = vadd.f32 %v2853_v53, %v2342_v28  ;;  %v2923_v15 = vadd.f32 %v2922_v59, %v2406_v61  ;;  %v2992_v21 = vadd.f32 %v2991_v62, %v2470_v54  ;;  %v3061_v2 = vadd.f32 %v3060_v41, %v2534_v20 }
 0x2c7   : > { %vm1831_vm0 = vcmp.eq.s32.totalorder %v4898_v30, %v5852_v51  ;;  %vm1895_vm1 = vcmp.eq.s32.totalorder %v4910_v26, %v5852_v51  ;;  %vm1959_vm2 = vcmp.eq.s32.totalorder %v4913_v37, %v5852_v51  ;;  %vm2023_vm3 = vcmp.eq.s32.totalorder %v4926_v18, %v5852_v51 }
 0x2c8   : > { %vm2087_vm4 = vcmp.eq.s32.totalorder %v4901_v25, %v5852_v51  ;;  %vm2151_vm5 = vcmp.eq.s32.totalorder %v4916_v29, %v5852_v51  ;;  %vm2215_vm6 = vcmp.eq.s32.totalorder %v4919_v16, %v5852_v51  ;;  %vm2279_vm7 = vcmp.eq.s32.totalorder %v4929_v33, %v5852_v51 }
 0x2c9   : > { %v2343_v50 = vsel %vm1831_vm0, %v1524_v36, 0.0  ;;  %v2407_v42 = vsel %vm1895_vm1, %v1524_v36, 0.0  ;;  %v2471_v34 = vsel %vm1959_vm2, %v1524_v36, 0.0  ;;  %v2535_v56 = vsel %vm2023_vm3, %v1524_v36, 0.0 }
 0x2ca   : > { %v3130_v19 = vadd.f32 %v3129_v24, %v2598_v43  ;;  %v3199_v8 = vadd.f32 %v3198_v12, %v2662_v31  ;;  %v3268_v46 = vadd.f32 %v3267_v60, %v2726_v13  ;;  %v3337_v6 = vadd.f32 %v3336_v7, %v2790_v0 }
 0x2cb   : > { %v2599_v22 = vsel %vm2087_vm4, %v1524_v36, 0.0  ;;  %v2663_v57 = vsel %vm2151_vm5, %v1524_v36, 0.0  ;;  %v2727_v44 = vsel %vm2215_vm6, %v1524_v36, 0.0  ;;  %v2791_v49 = vsel %vm2279_vm7, %v1524_v36, 0.0 }
 0x2cc   : > { %v2855_v63 = vadd.f32 %v2854_v14, %v2343_v50  ;;  %v2924_v58 = vadd.f32 %v2923_v15, %v2407_v42  ;;  %v2993_v35 = vadd.f32 %v2992_v21, %v2471_v34  ;;  %v3062_v23 = vadd.f32 %v3061_v2, %v2535_v56  ;;  %v1545_v14 = vpop.xlane.xlu1 %1544 }
 0x2cd   : > { %vm1832_vm8 = vcmp.eq.s32.totalorder %v4898_v30, %v5855_v1  ;;  %vm1896_vm9 = vcmp.eq.s32.totalorder %v4910_v26, %v5855_v1  ;;  %vm1960_vm10 = vcmp.eq.s32.totalorder %v4913_v37, %v5855_v1  ;;  %vm2024_vm11 = vcmp.eq.s32.totalorder %v4926_v18, %v5855_v1 }
 0x2ce   : > { %vm2088_vm12 = vcmp.eq.s32.totalorder %v4901_v25, %v5855_v1  ;;  %vm2152_vm13 = vcmp.eq.s32.totalorder %v4916_v29, %v5855_v1  ;;  %vm2216_vm14 = vcmp.eq.s32.totalorder %v4919_v16, %v5855_v1  ;;  %vm2280_vm15 = vcmp.eq.s32.totalorder %v4929_v33, %v5855_v1  ;;  %v1538_v1 = vpop.xlane.xlu0 %1537 }
 0x2cf   : > { %v2344_v52 = vsel %vm1832_vm8, %v1531_v55, 0.0  ;;  %v2408_v5 = vsel %vm1896_vm9, %v1531_v55, 0.0  ;;  %v2472_v51 = vsel %vm1960_vm10, %v1531_v55, 0.0  ;;  %v2536_v39 = vsel %vm2024_vm11, %v1531_v55, 0.0 }
 0x2d0   : > { %v3131_v17 = vadd.f32 %v3130_v19, %v2599_v22  ;;  %v3200_v40 = vadd.f32 %v3199_v8, %v2663_v57  ;;  %v3269_v4 = vadd.f32 %v3268_v46, %v2727_v44  ;;  %v3338_v3 = vadd.f32 %v3337_v6, %v2791_v49 }
 0x2d1   : > { %v2600_v45 = vsel %vm2088_vm12, %v1531_v55, 0.0  ;;  %v2664_v9 = vsel %vm2152_vm13, %v1531_v55, 0.0  ;;  %v2728_v10 = vsel %vm2216_vm14, %v1531_v55, 0.0  ;;  %v2792_v53 = vsel %vm2280_vm15, %v1531_v55, 0.0 }
 0x2d2   : > { %v2856_v59 = vadd.f32 %v2855_v63, %v2344_v52  ;;  %v2925_v62 = vadd.f32 %v2924_v58, %v2408_v5  ;;  %v2994_v41 = vadd.f32 %v2993_v35, %v2472_v51  ;;  %v3063_v11 = vadd.f32 %v3062_v23, %v2536_v39  ;;  %v1552_v44 = vpop.xlane.xlu0 %1551 }
 0x2d3   : > { %vm1833_vm0 = vcmp.eq.s32.totalorder %v4898_v30, %v5866_v47  ;;  %vm1897_vm1 = vcmp.eq.s32.totalorder %v4910_v26, %v5866_v47  ;;  %vm1961_vm2 = vcmp.eq.s32.totalorder %v4913_v37, %v5866_v47  ;;  %vm2025_vm3 = vcmp.eq.s32.totalorder %v4926_v18, %v5866_v47 }
 0x2d4   : > { %vm2089_vm4 = vcmp.eq.s32.totalorder %v4901_v25, %v5866_v47  ;;  %vm2153_vm5 = vcmp.eq.s32.totalorder %v4916_v29, %v5866_v47  ;;  %vm2217_vm6 = vcmp.eq.s32.totalorder %v4919_v16, %v5866_v47  ;;  %vm2281_vm7 = vcmp.eq.s32.totalorder %v4929_v33, %v5866_v47 }
 0x2d5   : > { %v3132_v28 = vadd.f32 %v3131_v17, %v2600_v45  ;;  %v3201_v61 = vadd.f32 %v3200_v40, %v2664_v9  ;;  %v3270_v54 = vadd.f32 %v3269_v4, %v2728_v10  ;;  %v3339_v20 = vadd.f32 %v3338_v3, %v2792_v53 }
 0x2d6   : > { %v2345_v24 = vsel %vm1833_vm0, %v1538_v1, 0.0  ;;  %v2409_v12 = vsel %vm1897_vm1, %v1538_v1, 0.0  ;;  %v2473_v60 = vsel %vm1961_vm2, %v1538_v1, 0.0  ;;  %v2537_v7 = vsel %vm2025_vm3, %v1538_v1, 0.0 }
 0x2d7   : > { %v2601_v43 = vsel %vm2089_vm4, %v1538_v1, 0.0  ;;  %v2665_v31 = vsel %vm2153_vm5, %v1538_v1, 0.0  ;;  %v2729_v13 = vsel %vm2217_vm6, %v1538_v1, 0.0  ;;  %v2793_v0 = vsel %vm2281_vm7, %v1538_v1, 0.0 }
 0x2d8   : > { %vm1834_vm8 = vcmp.eq.s32.totalorder %v4898_v30, %v5869_v38  ;;  %vm1835_vm9 = vcmp.eq.s32.totalorder %v4898_v30, %v5872_v27  ;;  %vm1898_vm10 = vcmp.eq.s32.totalorder %v4910_v26, %v5869_v38  ;;  %vm1962_vm11 = vcmp.eq.s32.totalorder %v4913_v37, %v5869_v38 }
 0x2d9   : > { %vm1899_vm12 = vcmp.eq.s32.totalorder %v4910_v26, %v5872_v27  ;;  %vm2026_vm13 = vcmp.eq.s32.totalorder %v4926_v18, %v5869_v38  ;;  %vm2090_vm14 = vcmp.eq.s32.totalorder %v4901_v25, %v5869_v38  ;;  %vm2154_vm15 = vcmp.eq.s32.totalorder %v4916_v29, %v5869_v38 }
 0x2da   : > { %vm1963_vm0 = vcmp.eq.s32.totalorder %v4913_v37, %v5872_v27  ;;  %vm2027_vm1 = vcmp.eq.s32.totalorder %v4926_v18, %v5872_v27  ;;  %vm2091_vm2 = vcmp.eq.s32.totalorder %v4901_v25, %v5872_v27  ;;  %vm2218_vm3 = vcmp.eq.s32.totalorder %v4919_v16, %v5869_v38 }
 0x2db   : > { %vm2282_vm4 = vcmp.eq.s32.totalorder %v4929_v33, %v5869_v38  ;;  %v2346_v47 = vsel %vm1834_vm8, %v1545_v14, 0.0  ;;  %v2410_v15 = vsel %vm1898_vm10, %v1545_v14, 0.0  ;;  %v2474_v21 = vsel %vm1962_vm11, %v1545_v14, 0.0 }
 0x2dc   : > { %v2538_v2 = vsel %vm2026_vm13, %v1545_v14, 0.0  ;;  %v2602_v36 = vsel %vm2090_vm14, %v1545_v14, 0.0  ;;  %v2666_v50 = vsel %vm2154_vm15, %v1545_v14, 0.0  ;;  %v2730_v42 = vsel %vm2218_vm3, %v1545_v14, 0.0 }
 0x2dd   : > { %v2857_v34 = vadd.f32 %v2856_v59, %v2345_v24  ;;  %v2926_v56 = vadd.f32 %v2925_v62, %v2409_v12  ;;  %v2995_v19 = vadd.f32 %v2994_v41, %v2473_v60  ;;  %v3064_v8 = vadd.f32 %v3063_v11, %v2537_v7 }
 0x2de   : > { %v3133_v46 = vadd.f32 %v3132_v28, %v2601_v43  ;;  %v3202_v6 = vadd.f32 %v3201_v61, %v2665_v31  ;;  %v3271_v22 = vadd.f32 %v3270_v54, %v2729_v13  ;;  %v3340_v57 = vadd.f32 %v3339_v20, %v2793_v0  ;;  %v1559_v54 = vpop.xlane.xlu1 %1558 }
 0x2df   : > { %vm2155_vm5 = vcmp.eq.s32.totalorder %v4916_v29, %v5872_v27  ;;  %vm2219_vm6 = vcmp.eq.s32.totalorder %v4919_v16, %v5872_v27  ;;  %vm2283_vm7 = vcmp.eq.s32.totalorder %v4929_v33, %v5872_v27  ;;  %v2794_v49 = vsel %vm2282_vm4, %v1545_v14, 0.0 }
 0x2e0   : > { %v2858_v63 = vadd.f32 %v2857_v34, %v2346_v47  ;;  %v2927_v58 = vadd.f32 %v2926_v56, %v2410_v15  ;;  %v2996_v35 = vadd.f32 %v2995_v19, %v2474_v21  ;;  %v3065_v23 = vadd.f32 %v3064_v8, %v2538_v2 }
 0x2e1   : > { %v3134_v55 = vadd.f32 %v3133_v46, %v2602_v36  ;;  %v3203_v52 = vadd.f32 %v3202_v6, %v2666_v50  ;;  %v3272_v5 = vadd.f32 %v3271_v22, %v2730_v42  ;;  %v2347_v51 = vsel %vm1835_vm9, %v1552_v44, 0.0 }
 0x2e2   : > { %v3341_v39 = vadd.f32 %v3340_v57, %v2794_v49  ;;  %v2411_v17 = vsel %vm1899_vm12, %v1552_v44, 0.0  ;;  %v2475_v38 = vsel %vm1963_vm0, %v1552_v44, 0.0  ;;  %v2539_v40 = vsel %vm2027_vm1, %v1552_v44, 0.0 }
 0x2e3   : > { %v2603_v4 = vsel %vm2091_vm2, %v1552_v44, 0.0  ;;  %v2667_v3 = vsel %vm2155_vm5, %v1552_v44, 0.0  ;;  %v2731_v45 = vsel %vm2219_vm6, %v1552_v44, 0.0  ;;  %v2795_v9 = vsel %vm2283_vm7, %v1552_v44, 0.0 }
 0x2e4   : > { %v2859_v10 = vadd.f32 %v2858_v63, %v2347_v51  ;;  %v2928_v53 = vadd.f32 %v2927_v58, %v2411_v17  ;;  %v2997_v59 = vadd.f32 %v2996_v35, %v2475_v38  ;;  %v3066_v62 = vadd.f32 %v3065_v23, %v2539_v40 }
 0x2e5   : > { %v1691_v41 = vadd.s32 %v4837_v32, %v5875_v48  ;;  %v3135_v11 = vadd.f32 %v3134_v55, %v2603_v4  ;;  %v3204_v1 = vadd.f32 %v3203_v52, %v2667_v3  ;;  %v3273_v28 = vadd.f32 %v3272_v5, %v2731_v45 }
 0x2e6   : > { %v3342_v61 = vadd.f32 %v3341_v39, %v2795_v9  ;;  %vm3358_vm0 = vcmask 1041409   ;;  %vm3360_vm1 = vcmask 1042434   ;;  %vm3362_vm2 = vcmask 1043459  }
 0x2e7   : > { %vm1836_vm8 = vcmp.eq.s32.totalorder %v4898_v30, %v1691_v41  ;;  %vm1900_vm9 = vcmp.eq.s32.totalorder %v4910_v26, %v1691_v41  ;;  %vm1964_vm10 = vcmp.eq.s32.totalorder %v4913_v37, %v1691_v41  ;;  %vm2028_vm11 = vcmp.eq.s32.totalorder %v4926_v18, %v1691_v41 }
 0x2e8   : > { %vm2092_vm12 = vcmp.eq.s32.totalorder %v4901_v25, %v1691_v41  ;;  %vm2156_vm13 = vcmp.eq.s32.totalorder %v4916_v29, %v1691_v41  ;;  %vm2220_vm14 = vcmp.eq.s32.totalorder %v4919_v16, %v1691_v41  ;;  %vm2284_vm15 = vcmp.eq.s32.totalorder %v4929_v33, %v1691_v41 }
 0x2e9   : > { %v2348_v32 = vsel %vm1836_vm8, %v1559_v54, 0.0  ;;  %v2412_v27 = vsel %vm1900_vm9, %v1559_v54, 0.0  ;;  %v2476_v48 = vsel %vm1964_vm10, %v1559_v54, 0.0  ;;  %v2540_v20 = vsel %vm2028_vm11, %v1559_v54, 0.0 }
 0x2ea   : > { %v2604_v24 = vsel %vm2092_vm12, %v1559_v54, 0.0  ;;  %v2668_v30 = vsel %vm2156_vm13, %v1559_v54, 0.0  ;;  %v2732_v12 = vsel %vm2220_vm14, %v1559_v54, 0.0  ;;  %v2796_v26 = vsel %vm2284_vm15, %v1559_v54, 0.0 }
 0x2eb   : > { %v2860_v60 = vadd.f32 %v2859_v10, %v2348_v32  ;;  %v2929_v37 = vadd.f32 %v2928_v53, %v2412_v27  ;;  %v2998_v7 = vadd.f32 %v2997_v59, %v2476_v48  ;;  %v3067_v18 = vadd.f32 %v3066_v62, %v2540_v20  ;;  %v2797_v20 = vld [vmem:[#allocation2] sm:$0xff] }
 0x2ec   : > { %v3136_v43 = vadd.f32 %v3135_v11, %v2604_v24  ;;  %v3205_v25 = vadd.f32 %v3204_v1, %v2668_v30  ;;  %v3274_v31 = vadd.f32 %v3273_v28, %v2732_v12  ;;  %v3343_v29 = vadd.f32 %v3342_v61, %v2796_v26 }
 0x2ed   : > { %v2861_v13 = vrot.slane %v2860_v60, 4  ;;  %v2930_v16 = vrot.slane %v2929_v37, 4  ;;  %v2999_v0 = vrot.slane %v2998_v7, 4  ;;  %v3068_v33 = vrot.slane %v3067_v18, 4 }
 0x2ee   : > { %v3137_v14 = vrot.slane %v3136_v43, 4  ;;  %v3206_v47 = vrot.slane %v3205_v25, 4  ;;  %v3275_v15 = vrot.slane %v3274_v31, 4  ;;  %v3344_v21 = vrot.slane %v3343_v29, 4 }
 0x2ef   : > { %v2862_v2 = vadd.f32 %v2861_v13, %v2860_v60  ;;  %v2931_v36 = vadd.f32 %v2930_v16, %v2929_v37  ;;  %v3000_v50 = vadd.f32 %v2999_v0, %v2998_v7  ;;  %v3069_v42 = vadd.f32 %v3068_v33, %v3067_v18  ;;  %v3379_v37 = vld [vmem:[#allocation6] sm:$0xff] (!%p3517_p5) }
 0x2f0   : > { %v3138_v34 = vadd.f32 %v3137_v14, %v3136_v43  ;;  %v3207_v56 = vadd.f32 %v3206_v47, %v3205_v25  ;;  %v3276_v19 = vadd.f32 %v3275_v15, %v3274_v31  ;;  %v3345_v8 = vadd.f32 %v3344_v21, %v3343_v29  ;;  %3384 = vadd.xlane.f32.xlu0 (!%p3517_p5), %v3379_v37 }
 0x2f1   : > { %v2863_v46 = vrot.slane %v2862_v2, 2  ;;  %v2932_v6 = vrot.slane %v2931_v36, 2  ;;  %v3001_v22 = vrot.slane %v3000_v50, 2  ;;  %v3070_v57 = vrot.slane %v3069_v42, 2 }
 0x2f2   : > { %v3139_v44 = vrot.slane %v3138_v34, 2  ;;  %v3208_v49 = vrot.slane %v3207_v56, 2  ;;  %v3277_v63 = vrot.slane %v3276_v19, 2  ;;  %v3346_v58 = vrot.slane %v3345_v8, 2 }
 0x2f3   : > { %v2864_v35 = vadd.f32 %v2863_v46, %v2862_v2  ;;  %v2933_v23 = vadd.f32 %v2932_v6, %v2931_v36  ;;  %v3002_v55 = vadd.f32 %v3001_v22, %v3000_v50  ;;  %v3071_v52 = vadd.f32 %v3070_v57, %v3069_v42 }
 0x2f4   : > { %v3140_v5 = vadd.f32 %v3139_v44, %v3138_v34  ;;  %v3209_v51 = vadd.f32 %v3208_v49, %v3207_v56  ;;  %v3278_v39 = vadd.f32 %v3277_v63, %v3276_v19  ;;  %v3347_v17 = vadd.f32 %v3346_v58, %v3345_v8 }
 0x2f5   : > { %v2865_v38 = vrot.slane %v2864_v35, 1  ;;  %v2934_v40 = vrot.slane %v2933_v23, 1  ;;  %v3003_v4 = vrot.slane %v3002_v55, 1  ;;  %v3072_v3 = vrot.slane %v3071_v52, 1 }
 0x2f6   : > { %v3141_v45 = vrot.slane %v3140_v5, 1  ;;  %v3210_v59 = vrot.slane %v3209_v51, 1  ;;  %v3279_v62 = vrot.slane %v3278_v39, 1  ;;  %vm3364_vm3 = vcmask 1044484  }
 0x2f7   : > { %v2866_v9 = vadd.f32 %v2865_v38, %v2864_v35  ;;  %v2935_v10 = vadd.f32 %v2934_v40, %v2933_v23  ;;  %v3004_v53 = vadd.f32 %v3003_v4, %v3002_v55  ;;  %v3073_v41 = vadd.f32 %v3072_v3, %v3071_v52 }
 0x2f8   : > { %v3348_v11 = vrot.slane %v3347_v17, 1  ;;  %vm3366_vm4 = vcmask 1045509   ;;  %v3142_v28 = vadd.f32 %v3141_v45, %v3140_v5  ;;  %vm3368_vm5 = vcmask 1046534  }
 0x2f9   : > { %v3359_v1 = vsel %vm3358_vm0, %v2935_v10, %v2866_v9  ;;  %v3211_v54 = vadd.f32 %v3210_v59, %v3209_v51  ;;  %vm3370_vm6 = vcmask 1047559   ;;  %v3280_v27 = vadd.f32 %v3279_v62, %v3278_v39 }
 0x2fa   : > { %v3361_v61 = vsel %vm3360_vm1, %v3004_v53, %v3359_v1  ;;  %v3349_v24 = vadd.f32 %v3348_v11, %v3347_v17  ;;  %v3390_v13 = vstv (!%p3517_p5), %s3389_s27  ;;  %vm3398_vm7 = vcmask (!%p3517_p5), 7168  }
 0x2fb   : > { %v3363_v32 = vsel %vm3362_vm2, %v3073_v41, %v3361_v61 }
 0x2fc   : > { %v3365_v48 = vsel %vm3364_vm3, %v3142_v28, %v3363_v32  ;;  %3378 = sbr.rel (%p3517_p5) target bundleno = 953 (0x3b9), region = 64 }
 0x2fd   : > { %v3367_v30 = vsel %vm3366_vm4, %v3211_v54, %v3365_v48 }
 0x2fe   : > { %v3369_v12 = vsel %vm3368_vm5, %v3280_v27, %v3367_v30 }
 0x2ff   : > { %v3371_v26 = vsel %vm3370_vm6, %v3349_v24, %v3369_v12 }
 0x300   : > { %v3373_v60 = vadd.f32 %v3371_v26, %v2797_v20 }
 0x302   : > { %3374 = vst [vmem:[#allocation2] sm:$0xff] %v3373_v60 }
 0x309   : > { %v3380_v7 = vld [vmem:[#allocation2] sm:$0xff] }
 0x30a   : > { %v3381_v18 = vmul.f32 %v3380_v7, %v3379_v37 }
 0x30c   : > { %3382 = vadd.xlane.f32.xlu0 %v3381_v18 }
 0x37d   : > { %v3385_v43 = vpop.xlane.xlu0 %3384 }
 0x37e   : > { %v3386_v25 = vmax.f32 %v3385_v43, 1e-09 }
 0x380   : > { %3616 = vrcp.f32 %v3386_v25 }
 0x38a   : > { %v3617_v29 = vpop.eup %3616 }
 0x399   : > { %v3383_v31 = vpop.xlane.xlu0 %3382 }
 0x39a   : > { %v3388_v16 = vmul.f32 %v3617_v29, %v3383_v31 }
 0x39c   : > { %v3391_v0 = vadd.f32 %v3390_v13, %v3388_v16 }
 0x39e   : > { %v3518_v33 = vmul.f32 -1.442695, %v3391_v0 }
 0x3a0   : > { %3618 = vpow2.f32 %v3518_v33 }
 0x3aa   : > { %v3619_v14 = vpop.eup %3618 }
 0x3ab   : > { %v3395_v47 = vadd.f32 1.0, %v3619_v14 }
 0x3ad   : > { %3620 = vrcp.f32 %v3395_v47 }
 0x3b7   : > { %v3621_v15 = vpop.eup %3620 }
 0x3b8   : > { %3399 = vst.msk [vmem:[%s6029_s5] sm:$0xff] %vm3398_vm7, %v3621_v15 }
 0x3b9 PF: > { %s18_s25 = sadd.s32 1, %s3798_s25   ;;  %s6049_s20 = smov %s3782_s21 }
 0x3ba   : > { %p15_p7 = scmp.ge.s32.totalorder %s18_s25, 6   ;;  %s6050_s21 = smov %s3786_s22 }
 0x3bb   : > { %s6051_s22 = smov %s3991_s19  ;;  %s6052_s23 = smov %s3794_s24 }
 0x3bc   : > { %s6053_s24 = smov %s6055_s30  ;;  %17 = sbr.rel (!%p15_p7) target bundleno = 6 (0x6), region = 101 }
 0x3c3   :  { %3419 = vsyncpa [#allocation5], 1 }
 0x3c4   :  { %3421 = vsyncpa [#allocation5 + $0x1], 1 }
 0x3c5   :  { %3422 = vsyncpa [#allocation7], 1 }

</bundles_post_ra>
